<compile_context>
chip_gen: v7x
topology: tpu7x:2x2x1
jax: 0.10.0
libtpu: 0.0.40
codegen_flags: <defaults>
</compile_context>

<pallas_src>
import jax
import jax.numpy as jnp
from jax import lax
from jax.experimental import pallas as pl
from jax.experimental.pallas import tpu as pltpu


FEAT_DIM = 4096                 # width of `features`
SEM_ROWS = 300                  # semantics.shape[0]  -> width of `vec`
SEM_DIM = 32                    # semantics.shape[1] == labels.shape[1]
IN_DIM = FEAT_DIM + SEM_ROWS    # 4396  (matches nn.Linear(4396, 4096))
HID_DIM = 4096
TN = 512                        # hidden-dim tile
NUM_CORES = 2                   # leading "parallel" axis (v7x megacore split)
INNER = HID_DIM // (NUM_CORES * TN)   # reduction steps per core


# ---------------------------------------------------------------------------
# Fused kernel:
#   vec = labels @ semantics.T          (once per core, VMEM scratch)
#   h_j = leaky_relu(features @ W1f_j + vec @ W1v_j + b1_j)
#   out += sum(h_j * w2_j, axis=-1)     (VPU multiply + lane reduction)
# ---------------------------------------------------------------------------
def _disc_kernel(labels_ref, sem_ref, feat_ref, w1f_ref, w1v_ref, b1_ref,
                 w2_ref, out_ref, xb, vecb):
    j = pl.program_id(1)

    @pl.when(j == 0)
    def _():
        # vec = labels @ semantics.T — contract the last axes of both operands
        # (no in-kernel transpose through the XLU).
        vec = lax.dot_general(
            labels_ref[...], sem_ref[...],
            dimension_numbers=(((1,), (1,)), ((), ())),
            preferred_element_type=jnp.float32,
        )
        vecb[...] = vec.astype(jnp.bfloat16)
        xb[...] = feat_ref[...].astype(jnp.bfloat16)
        out_ref[...] = jnp.zeros_like(out_ref)

    # First linear layer, hidden tile j of this core (bf16 MXU, f32 acc).
    h = jnp.dot(xb[...], w1f_ref[...], preferred_element_type=jnp.float32)
    h = h + jnp.dot(vecb[...], w1v_ref[...], preferred_element_type=jnp.float32)
    h = h + b1_ref[...]                       # (1, TN) broadcast over batch
    h = jnp.where(h > 0.0, h, 0.01 * h)       # LeakyReLU, PyTorch default 0.01

    # Second linear layer: lane-dense w2 row tile, VPU mul + lane reduce.
    out_ref[...] += jnp.sum(h * w2_ref[...], axis=-1, keepdims=True)


def discriminator_forward(features, labels, semantics, params):
    B = features.shape[0]

    partials = pl.pallas_call(
        _disc_kernel,
        out_shape=jax.ShapeDtypeStruct((NUM_CORES, B, 1), jnp.float32),
        grid_spec=pltpu.PrefetchScalarGridSpec(
            num_scalar_prefetch=0,
            grid=(NUM_CORES, INNER),
            in_specs=[
                pl.BlockSpec((B, SEM_DIM), lambda c, j: (0, 0)),        # labels
                pl.BlockSpec((SEM_ROWS, SEM_DIM), lambda c, j: (0, 0)), # semantics
                pl.BlockSpec((B, FEAT_DIM), lambda c, j: (0, 0)),       # features
                pl.BlockSpec((FEAT_DIM, TN),                            # W1_feat tile
                             lambda c, j: (0, c * INNER + j)),
                pl.BlockSpec((SEM_ROWS, TN),                            # W1_vec tile
                             lambda c, j: (0, c * INNER + j)),
                pl.BlockSpec((1, TN), lambda c, j: (0, c * INNER + j)), # b1 tile
                pl.BlockSpec((1, TN), lambda c, j: (0, c * INNER + j)), # w2 row tile
            ],
            # One (B, 1) partial accumulator per core; squeeze the core axis.
            out_specs=pl.BlockSpec((None, B, 1), lambda c, j: (c, 0, 0)),
            scratch_shapes=[
                pltpu.VMEM((B, FEAT_DIM), jnp.bfloat16),   # features in bf16
                pltpu.VMEM((B, SEM_ROWS), jnp.bfloat16),   # vec in bf16
            ],
        ),
        compiler_params=pltpu.CompilerParams(
            # core axis parallel (2 TCs on v7x), reduction axis arbitrary.
            dimension_semantics=("parallel", "arbitrary"),
        ),
    )(labels, semantics, features,
      params["w1_feat"], params["w1_vec"], params["b1"], params["w2_row"])

    # Combine per-core partial sums and add the final bias (tiny XLA op).
    return jnp.sum(partials, axis=0) + params["b2"]


# ---------------------------------------------------------------------------
# Parameters.  Linear weights are stored as (in_features, out_features), i.e.
# already transposed w.r.t. PyTorch's nn.Linear storage, and W1 is split into
# the `features` rows and the `vec` rows.  W1 is kept in bfloat16 (streamed to
# the MXU with f32 accumulation); biases / w2 stay f32.
# ---------------------------------------------------------------------------
def init_params(key):
    k1, k2, k3, k4, k5 = jax.random.split(key, 5)
    lim1 = 1.0 / jnp.sqrt(float(IN_DIM))
    lim2 = 1.0 / jnp.sqrt(float(HID_DIM))
    return {
        "w1_feat": jax.random.uniform(
            k1, (FEAT_DIM, HID_DIM), jnp.float32, -lim1, lim1
        ).astype(jnp.bfloat16),
        "w1_vec": jax.random.uniform(
            k2, (SEM_ROWS, HID_DIM), jnp.float32, -lim1, lim1
        ).astype(jnp.bfloat16),
        "b1": jax.random.uniform(k3, (1, HID_DIM), jnp.float32, -lim1, lim1),
        "w2_row": jax.random.uniform(k4, (1, HID_DIM), jnp.float32, -lim2, lim2),
        "b2": jax.random.uniform(k5, (1, 1), jnp.float32, -lim2, lim2),
    }


def reference_forward(features, labels, semantics, params):
    vec = labels @ semantics.T
    x = jnp.concatenate([features, vec], axis=1)
    w1 = jnp.concatenate([params["w1_feat"], params["w1_vec"]], axis=0)  # bf16
    h = jnp.dot(x.astype(jnp.bfloat16), w1, preferred_element_type=jnp.float32)
    h = h + params["b1"]
    h = jnp.where(h > 0.0, h, 0.01 * h)
    return jnp.sum(h * params["w2_row"], axis=-1, keepdims=True) + params["b2"]


if __name__ == "__main__":
    key = jax.random.PRNGKey(0)
    kf, kl, ks, kp = jax.random.split(key, 4)

    B = 2
    features = jax.random.normal(kf, (B, FEAT_DIM), jnp.float32)
    labels = jax.random.normal(kl, (B, SEM_DIM), jnp.float32)
    semantics = jax.random.normal(ks, (SEM_ROWS, SEM_DIM), jnp.float32)
    params = init_params(kp)

    out = discriminator_forward(features, labels, semantics, params)
    out = jax.block_until_ready(out)

    ref = reference_forward(features, labels, semantics, params)
    assert out.shape == (B, 1)
    # Tolerance loosened because W1 is streamed in bfloat16 (f32 accumulation).
    assert jnp.allclose(out, ref, rtol=2e-2, atol=2e-2), (out, ref)

    print("KERNEL_OK")
</pallas_src>

<mosaic_0001>
module attributes {stable_mosaic.version = 11 : i64} {
  func.func @_disc_kernel(%arg0: i32, %arg1: i32, %arg2: memref<2x32xf32, #tpu.memory_space<vmem>>, %arg3: memref<300x32xf32, #tpu.memory_space<vmem>>, %arg4: memref<2x4096xf32, #tpu.memory_space<vmem>>, %arg5: memref<4096x512xbf16, #tpu.memory_space<vmem>>, %arg6: memref<300x512xbf16, #tpu.memory_space<vmem>>, %arg7: memref<1x512xf32, #tpu.memory_space<vmem>>, %arg8: memref<1x512xf32, #tpu.memory_space<vmem>>, %arg9: memref<1x2x1xf32, #tpu.memory_space<vmem>>, %arg10: memref<2x4096xbf16, #tpu.memory_space<vmem>>, %arg11: memref<2x300xbf16, #tpu.memory_space<vmem>>) attributes {dimension_semantics = [#tpu.dimension_semantics<parallel>, #tpu.dimension_semantics<arbitrary>], iteration_bounds = array<i64: 2, 4>, scalar_prefetch = 0 : i64, scratch_operands = 2 : i64, tpu.core_type = #tpu.core_type<tc>, window_params = [{pipeline_mode = #tpu.pipeline_mode<synchronous>, transform_indices = @transform_0, window_bounds = array<i64: 2, 32>}, {pipeline_mode = #tpu.pipeline_mode<synchronous>, transform_indices = @transform_1, window_bounds = array<i64: 300, 32>}, {pipeline_mode = #tpu.pipeline_mode<synchronous>, transform_indices = @transform_2, window_bounds = array<i64: 2, 4096>}, {transform_indices = @transform_3, window_bounds = array<i64: 4096, 512>}, {transform_indices = @transform_4, window_bounds = array<i64: 300, 512>}, {transform_indices = @transform_5, window_bounds = array<i64: 1, 512>}, {transform_indices = @transform_6, window_bounds = array<i64: 1, 512>}, {transform_indices = @transform_7, window_bounds = array<i64: 1, 2, 1>}]} {
    %c0_i32 = arith.constant 0 : i32
    %0 = arith.cmpi eq, %arg1, %c0_i32 : i32
    %1 = arith.extui %0 : i1 to i32
    %c0_i32_0 = arith.constant 0 : i32
    %2 = arith.cmpi ne, %1, %c0_i32_0 : i32
    scf.if %2 {
      %c0_22 = arith.constant 0 : index
      %c0_23 = arith.constant 0 : index
      %29 = vector.load %arg2[%c0_22, %c0_23] : memref<2x32xf32, #tpu.memory_space<vmem>>, vector<2x32xf32>
      %c0_24 = arith.constant 0 : index
      %c0_25 = arith.constant 0 : index
      %30 = vector.load %arg3[%c0_24, %c0_25] : memref<300x32xf32, #tpu.memory_space<vmem>>, vector<300x32xf32>
      %cst_26 = arith.constant dense<0.000000e+00> : vector<2x300xf32>
      %31 = tpu.matmul %29, %30, %cst_26 {dimension_numbers = #tpu.dot_dimension_numbers<[1], [1], [0], [0], [0, 0, 1, 0], [], []>} : vector<2x32xf32>, vector<300x32xf32>, vector<2x300xf32> -> vector<2x300xf32>
      %32 = arith.truncf %31 : vector<2x300xf32> to vector<2x300xbf16>
      %c0_27 = arith.constant 0 : index
      %c0_28 = arith.constant 0 : index
      %33 = vector.load %arg11[%c0_27, %c0_28] : memref<2x300xbf16, #tpu.memory_space<vmem>>, vector<2x300xbf16>
      tpu.vector_store %arg11[%c0_27, %c0_28], %32 {strides = array<i32>} : memref<2x300xbf16, #tpu.memory_space<vmem>>, vector<2x300xbf16>,
      %c0_29 = arith.constant 0 : index
      %c0_30 = arith.constant 0 : index
      %34 = vector.load %arg4[%c0_29, %c0_30] : memref<2x4096xf32, #tpu.memory_space<vmem>>, vector<2x4096xf32>
      %35 = arith.truncf %34 : vector<2x4096xf32> to vector<2x4096xbf16>
      %c0_31 = arith.constant 0 : index
      %c0_32 = arith.constant 0 : index
      %36 = vector.load %arg10[%c0_31, %c0_32] : memref<2x4096xbf16, #tpu.memory_space<vmem>>, vector<2x4096xbf16>
      tpu.vector_store %arg10[%c0_31, %c0_32], %35 {strides = array<i32>} : memref<2x4096xbf16, #tpu.memory_space<vmem>>, vector<2x4096xbf16>,
      %cst_33 = arith.constant 0.000000e+00 : f32
      %37 = vector.broadcast %cst_33 : f32 to vector<2x1xf32>
      %c0_34 = arith.constant 0 : index
      %c0_35 = arith.constant 0 : index
      %c0_36 = arith.constant 0 : index
      %38 = vector.load %arg9[%c0_34, %c0_35, %c0_36] : memref<1x2x1xf32, #tpu.memory_space<vmem>>, vector<1x2x1xf32>
      %39 = vector.shape_cast %38 : vector<1x2x1xf32> to vector<2x1xf32>
      %40 = vector.shape_cast %37 : vector<2x1xf32> to vector<1x2x1xf32>
      tpu.vector_store %arg9[%c0_34, %c0_35, %c0_36], %40 {strides = array<i32>} : memref<1x2x1xf32, #tpu.memory_space<vmem>>, vector<1x2x1xf32>,
    } else {
    }
    %c0 = arith.constant 0 : index
    %c0_1 = arith.constant 0 : index
    %3 = vector.load %arg10[%c0, %c0_1] : memref<2x4096xbf16, #tpu.memory_space<vmem>>, vector<2x4096xbf16>
    %c0_2 = arith.constant 0 : index
    %c0_3 = arith.constant 0 : index
    %4 = vector.load %arg5[%c0_2, %c0_3] : memref<4096x512xbf16, #tpu.memory_space<vmem>>, vector<4096x512xbf16>
    %cst = arith.constant dense<0.000000e+00> : vector<2x512xf32>
    %5 = tpu.matmul %3, %4, %cst {dimension_numbers = #tpu.dot_dimension_numbers<[1], [0], [0], [1], [0, 0, 1, 1], [], []>} : vector<2x4096xbf16>, vector<4096x512xbf16>, vector<2x512xf32> -> vector<2x512xf32>
    %c0_4 = arith.constant 0 : index
    %c0_5 = arith.constant 0 : index
    %6 = vector.load %arg11[%c0_4, %c0_5] : memref<2x300xbf16, #tpu.memory_space<vmem>>, vector<2x300xbf16>
    %c0_6 = arith.constant 0 : index
    %c0_7 = arith.constant 0 : index
    %7 = vector.load %arg6[%c0_6, %c0_7] : memref<300x512xbf16, #tpu.memory_space<vmem>>, vector<300x512xbf16>
    %cst_8 = arith.constant dense<0.000000e+00> : vector<2x512xf32>
    %8 = tpu.matmul %6, %7, %cst_8 {dimension_numbers = #tpu.dot_dimension_numbers<[1], [0], [0], [1], [0, 0, 1, 1], [], []>} : vector<2x300xbf16>, vector<300x512xbf16>, vector<2x512xf32> -> vector<2x512xf32>
    %9 = arith.addf %5, %8 : vector<2x512xf32>
    %c0_9 = arith.constant 0 : index
    %c0_10 = arith.constant 0 : index
    %10 = vector.load %arg7[%c0_9, %c0_10] : memref<1x512xf32, #tpu.memory_space<vmem>>, vector<1x512xf32>
    %11 = vector.broadcast %10 : vector<1x512xf32> to vector<2x512xf32>
    %12 = arith.addf %9, %11 : vector<2x512xf32>
    %cst_11 = arith.constant 0.000000e+00 : f32
    %13 = vector.broadcast %cst_11 : f32 to vector<2x512xf32>
    %14 = arith.cmpf ogt, %12, %13 : vector<2x512xf32>
    %cst_12 = arith.constant 0.00999999977 : f32
    %15 = vector.broadcast %cst_12 : f32 to vector<2x512xf32>
    %16 = arith.mulf %15, %12 : vector<2x512xf32>
    %17 = arith.select %14, %12, %16 : vector<2x512xi1>, vector<2x512xf32>
    %c0_13 = arith.constant 0 : index
    %c0_14 = arith.constant 0 : index
    %c0_15 = arith.constant 0 : index
    %18 = vector.load %arg9[%c0_13, %c0_14, %c0_15] : memref<1x2x1xf32, #tpu.memory_space<vmem>>, vector<1x2x1xf32>
    %19 = vector.shape_cast %18 : vector<1x2x1xf32> to vector<2x1xf32>
    %c0_16 = arith.constant 0 : index
    %c0_17 = arith.constant 0 : index
    %20 = vector.load %arg8[%c0_16, %c0_17] : memref<1x512xf32, #tpu.memory_space<vmem>>, vector<1x512xf32>
    %21 = vector.broadcast %20 : vector<1x512xf32> to vector<2x512xf32>
    %22 = arith.mulf %17, %21 : vector<2x512xf32>
    %cst_18 = arith.constant dense<0.000000e+00> : vector<2xf32>
    %23 = vector.multi_reduction <add>, %22, %cst_18 [1] : vector<2x512xf32> to vector<2xf32>
    %24 = vector.shape_cast %23 : vector<2xf32> to vector<2x1xf32>
    %25 = arith.addf %19, %24 : vector<2x1xf32>
    %c0_19 = arith.constant 0 : index
    %c0_20 = arith.constant 0 : index
    %c0_21 = arith.constant 0 : index
    %26 = vector.load %arg9[%c0_19, %c0_20, %c0_21] : memref<1x2x1xf32, #tpu.memory_space<vmem>>, vector<1x2x1xf32>
    %27 = vector.shape_cast %26 : vector<1x2x1xf32> to vector<2x1xf32>
    %28 = vector.shape_cast %25 : vector<2x1xf32> to vector<1x2x1xf32>
    tpu.vector_store %arg9[%c0_19, %c0_20, %c0_21], %28 {strides = array<i32>} : memref<1x2x1xf32, #tpu.memory_space<vmem>>, vector<1x2x1xf32>,
    return
  }
  func.func @transform_0(%arg0: i32, %arg1: i32) -> (i32, i32) {
    %c0_i32 = arith.constant 0 : i32
    %c0_i32_0 = arith.constant 0 : i32
    %c0_i32_1 = arith.constant 0 : i32
    return %c0_i32, %c0_i32_0 : i32, i32
  }
  func.func @transform_1(%arg0: i32, %arg1: i32) -> (i32, i32) {
    %c0_i32 = arith.constant 0 : i32
    %c0_i32_0 = arith.constant 0 : i32
    %c0_i32_1 = arith.constant 0 : i32
    return %c0_i32, %c0_i32_0 : i32, i32
  }
  func.func @transform_2(%arg0: i32, %arg1: i32) -> (i32, i32) {
    %c0_i32 = arith.constant 0 : i32
    %c0_i32_0 = arith.constant 0 : i32
    %c0_i32_1 = arith.constant 0 : i32
    return %c0_i32, %c0_i32_0 : i32, i32
  }
  func.func @transform_3(%arg0: i32, %arg1: i32) -> (i32, i32) {
    %c4_i32 = arith.constant 4 : i32
    %0 = arith.muli %arg0, %c4_i32 : i32
    %1 = arith.addi %0, %arg1 : i32
    %c0_i32 = arith.constant 0 : i32
    %c0_i32_0 = arith.constant 0 : i32
    return %c0_i32, %1 : i32, i32
  }
  func.func @transform_4(%arg0: i32, %arg1: i32) -> (i32, i32) {
    %c4_i32 = arith.constant 4 : i32
    %0 = arith.muli %arg0, %c4_i32 : i32
    %1 = arith.addi %0, %arg1 : i32
    %c0_i32 = arith.constant 0 : i32
    %c0_i32_0 = arith.constant 0 : i32
    return %c0_i32, %1 : i32, i32
  }
  func.func @transform_5(%arg0: i32, %arg1: i32) -> (i32, i32) {
    %c4_i32 = arith.constant 4 : i32
    %0 = arith.muli %arg0, %c4_i32 : i32
    %1 = arith.addi %0, %arg1 : i32
    %c0_i32 = arith.constant 0 : i32
    %c0_i32_0 = arith.constant 0 : i32
    return %c0_i32, %1 : i32, i32
  }
  func.func @transform_6(%arg0: i32, %arg1: i32) -> (i32, i32) {
    %c4_i32 = arith.constant 4 : i32
    %0 = arith.muli %arg0, %c4_i32 : i32
    %1 = arith.addi %0, %arg1 : i32
    %c0_i32 = arith.constant 0 : i32
    %c0_i32_0 = arith.constant 0 : i32
    return %c0_i32, %1 : i32, i32
  }
  func.func @transform_7(%arg0: i32, %arg1: i32) -> (i32, i32, i32) {
    %c0_i32 = arith.constant 0 : i32
    %c0_i32_0 = arith.constant 0 : i32
    %c0_i32_1 = arith.constant 0 : i32
    return %arg0, %c0_i32, %c0_i32_0 : i32, i32, i32
  }
}

</mosaic_0001>

<bundles_post_ra>
// kernel: tpu_custom_call.1
= control target key start
LH: loop header
LB: loop body
LE: loop exit
PB: predicated region body
PF: predicated region fallthrough
CT: control target
= control target key end

     0   :  { %s15277_s0 = inlined_call_operand.hbm [shape: f32[2,32], index: 0, kind: input, shape index: {}]   ;;  %s15278_s1 = inlined_call_operand.vmem [shape: f32[300,32], index: 1, kind: input, shape index: {}]   ;;  %s15279_s2 = inlined_call_operand.hbm [shape: f32[2,4096], index: 2, kind: input, shape index: {}]   ;;  %s15280_s3 = inlined_call_operand.hbm [shape: bf16[4096,4096], index: 3, kind: input, shape index: {}]   ;;  %s15281_s4 = inlined_call_operand.hbm [shape: bf16[300,4096], index: 4, kind: input, shape index: {}]   ;;  %s15282_s5 = inlined_call_operand.hbm [shape: f32[1,4096], index: 5, kind: input, shape index: {}]   ;;  %s15283_s6 = inlined_call_operand.hbm [shape: f32[1,4096], index: 6, kind: input, shape index: {}]   ;;  %s15284_s7 = inlined_call_operand.vmem [shape: f32[2,2,1], index: 7, kind: output, shape index: {}]  }
   0x1   :  { %15307 = sst [smem:[#allocation23_spill]] %s15277_s0 }
   0x2   :  { %15308 = sst [smem:[#allocation24_spill]] %s15278_s1 }
   0x3   :  { %15309 = sst [smem:[#allocation25_spill]] %s15280_s3 }
   0x4   :  { %15310 = sst [smem:[#allocation26_spill]] %s15284_s7 }
   0x5   :  { %12 = vsyncpa [#allocation5], 0 }
   0x6   :  { %13 = vsyncpa [#allocation7], 0  ;;  %s13273_s24 = smov 0   ;;  %s13275_s25 = smov 0  }
   0x7   :  { %s13277_s26 = smov 0   ;;  %s13279_s27 = smov 0  }
   0x8   :  { %s13281_s28 = smov 0   ;;  %s13283_s29 = smov 0  }
   0x9   :  { %s13285_s30 = smov 0   ;;  %s13287_s8 = smov 0  }
   0xa LB: > { %15311 = sst [smem:[#allocation15_spill]] %s13191_s25  ;;  %s15290_s9 = sadd.s32 4294967295, %s13215_s8   ;;  %s13215_s8 = sphi %s13287_s8, %s19_s8   ;;  %s13211_s30 = sphi %s13285_s30, %s15355_s30   ;;  %s13207_s29 = sphi %s13283_s29, %s15354_s29   ;;  %s13203_s28 = sphi %s13281_s28, %s15353_s28   ;;  %s13199_s27 = sphi %s13279_s27, %s15352_s27   ;;  %s13195_s26 = sphi %s13277_s26, %s15357_s26   ;;  %s13191_s25 = sphi %s13275_s25, %s15356_s25   ;;  %s13187_s24 = sphi %s13273_s24, %s15351_s24  }
   0xb   : > { %15312 = sst [smem:[#allocation16_spill]] %s13199_s27  ;;  %p112_p0 = scmp.ne.s32.totalorder %s13195_s26, %s13191_s25 }
   0xc   : > { %15313 = sst [smem:[#allocation17_spill]] %s13203_s28  ;;  %p113_p1 = scmp.eq.s32.totalorder %s13215_s8, 0 }
   0xd   : > { %15314 = sst [smem:[#allocation18_spill]] %s13207_s29  ;;  %p118_p2 = scmp.ne.s32.totalorder %s13191_s25, %s13187_s24 }
   0xe   : > { %15315 = sst [smem:[#allocation19_spill]] %s13211_s30  ;;  %p13319_p3 = scmp.eq.s32.totalorder %s15290_s9, 0 }
   0xf   : > { %p114_p4 = por %p113_p1, %p112_p0  ;;  %p9871_p5 = scmp.ge.s32.totalorder %s13215_s8, 1 }
  0x10   : > { %s15316_s11 = scalar_select %p13319_p3, 1, 0 }
  0x11   : > { %p13326_p6 = por %p13319_p3, %p118_p2  ;;  %p245_p7 = scmp.lt.s32.totalorder %s13215_s8, 9 }
  0x12   : > { %s13217_s14 = smov [#allocation4]   ;;  %p11222_p10 = scmp.lt.s32.totalorder %s13215_s8, 8 }
  0x13   : > { %s15317_s12 = scalar_select %p13326_p6, 1, 0 }
  0x14   : > { %p13331_p8 = pnand %p9871_p5, %p245_p7  ;;  %s258_s15 = sshll.u32 %s13217_s14, 4  ;;  %s259_s15 = int_to_ptr.vmem [resolvable:$true] %s258_s15 }
  0x15   : > { %15318 = sst [smem:[#allocation20_spill]] %s15317_s12  ;;  %p13344_p12 = pnand %p11222_p10, %p114_p4 }
  0x16   : > { %s15319_s13 = scalar_select %p13331_p8, 1, 0 }
  0x17   : > { %p11200_p9 = pneg %p13331_p8  ;;  %s15322_s0 = sld [smem:[#allocation23_spill]] }
  0x18   : > { %s15321_s17 = scalar_select %p13344_p12, 1, 0 }
  0x19   : > { %p13340_p11 = pnand %p11200_p9, %p13319_p3 }
  0x1b   : > { %s15320_s16 = scalar_select %p13340_p11, 1, 0 }
  0x1c   : > { %p15294_p0 = pneg %p13340_p11 }
  0x1d   : > { %s12965_s20 = scalar_lea.hbm %s15322_s0, 32 }
  0x1e   : > { %p12966_p13 = scmp.ne.s32.totalorder %s15322_s0, %s12965_s20  ;;  %p12972_p4 = scmp.lt.u32.totalorder %s12965_s20, %s15322_s0 }
  0x20   : > { %p12968_p1 = pnand %p15294_p0, %p12966_p13 }
  0x22   : > { %p12969_p2 = pneg %p12968_p1 }
  0x24   : > { %p12974_p5 = pnand %p12972_p4, %p12969_p2 }
  0x26   : > { %12977 = shalt.err (!%p12974_p5)
}
  0x27   : > { %s12978_s14 = scalar_lea.vmem %s259_s15, 32  ;;  %p12986_p6 = scmp.lt.s32.totalorder %s259_s15, %s259_s15 }
  0x28   : > { %p12979_p7 = scmp.ne.s32.totalorder %s259_s15, %s12978_s14  ;;  %p12987_p3 = scmp.lt.s32.totalorder %s12978_s14, %s12978_s14 }
  0x2a   : > { %p12981_p9 = pnand %p12979_p7, %p15294_p0  ;;  %p12988_p8 = por %p12987_p3, %p12986_p6 }
  0x2c   : > { %p12982_p10 = pneg %p12981_p9 }
  0x2e   : > { %p12989_p12 = pnand %p12988_p8, %p12982_p10 }
  0x30   : > { %12992 = shalt.err (!%p12989_p12)
}
  0x31   : > { %11203 = dma.hbm_to_vmem [thread:$0]  (!%p13340_p11), %s15322_s0, 32, %s259_s15, [#allocation5]  }
  0x32   : > { %s28_s20 = sadd.s32 1, %s13207_s29  ;;  %s31_s21 = sadd.s32 1, %s13211_s30 }
  0x33   : > { %p29_p13 = scmp.ge.s32.totalorder %s28_s20, 4  ;;  %s9863_s22 = sshll.u32 %s13211_s30, 2 }
  0x34   : > { %s13374_s23 = sadd.s32 %s13207_s29, %s9863_s22  ;;  %s283_s24 = sand.u32 1, %s13215_s8  }
  0x35   : > { %s15359_s20 = smov (%p29_p13, %s28_s20), 0  ;;  %s15361_s21 = smov (!%p29_p13, %s31_s21), %s13211_s30 }
  0x36   : > { %15323 = sst [smem:[#allocation21_spill]] %s15359_s20  ;;  %s13381_s14 = sand.u32 1, %s13195_s26  }
  0x37   : > { %p33_p3 = scmp.ge.s32.totalorder %s15361_s21, 2  ;;  %s9875_s15 = sshll.u32 %s13381_s14, 13 }
  0x38   : > { %s11062_s18 = sshll.u32 %s13374_s23, 8  ;;  %s15325_s3 = sld [smem:[#allocation25_spill]] }
  0x39   : > { %s15363_s21 = smov (%p33_p3, %s15361_s21), 0  ;;  %s287_s10 = scalar_lea.vmem [#allocation8], %s9875_s15 }
  0x3a   : > { %15324 = sst [smem:[#allocation22_spill]] %s15363_s21  ;;  %s296_s0 = sshll.u32 %s287_s10, 4  ;;  %s13395_s0 = int_to_ptr.vmem [resolvable:$true] %s296_s0 }
  0x3b   : > { %s9864_s30 = sshll.u32 %s15363_s21, 2  ;;  %s13403_s7 = scalar_lea.sflag [#allocation5], %s283_s24 }
  0x3c   : > { %s101_s29 = sadd.s32 %s9864_s30, %s15359_s20  ;;  %p15327_p12 = scmp.ne.s32.totalorder %s15321_s17, 0 }
  0x3d   : > { %s102_s1 = ssub.s32 %s13374_s23, %s101_s29 }
  0x3e   : > { %s13392_s9 = scalar_lea.hbm %s15325_s3, %s11062_s18  ;;  %p13399_p6 = scmp.eq.s32.totalorder %s102_s1, 0 }
  0x3f   : > { %s12993_s19 = scalar_lea.hbm %s13392_s9, 131072  ;;  %p13409_p1 = pneg %p15327_p12 }
  0x40   : > { %s15326_s27 = scalar_select %p13399_p6, 1, 0 }
  0x41   : > { %p12994_p8 = scmp.ne.s32.totalorder %s13392_s9, %s12993_s19  ;;  %s12998_s1 = scalar_lea.hbm %s15325_s3, 1048576 }
  0x42   : > { %s15328_s22 = scalar_select %p13409_p1, 1, 0 }
  0x43   : > { %p12996_p2 = pnand %p13409_p1, %p12994_p8  ;;  %p12999_p5 = scmp.lt.u32.totalorder %s13392_s9, %s15325_s3 }
  0x44   : > { %p13000_p7 = scmp.lt.u32.totalorder %s12998_s1, %s12993_s19  ;;  %p13002_p10 = scmp.lt.u32.totalorder %s12993_s19, %s13392_s9 }
  0x45   : > { %p12997_p4 = pneg %p12996_p2 }
  0x46   : > { %p13001_p9 = por %p13000_p7, %p12999_p5 }
  0x48   : > { %p13003_p13 = por %p13002_p10, %p13001_p9 }
  0x4a   : > { %p13004_p3 = pnand %p13003_p13, %p12997_p4 }
  0x4c   : > { %13007 = shalt.err (!%p13004_p3)
}
  0x4d   : > { %s13008_s24 = scalar_lea.vmem %s13395_s0, 131072  ;;  %s13218_s10 = smov [#allocation8]  }
  0x4e   : > { %p13009_p8 = scmp.ne.s32.totalorder %s13395_s0, %s13008_s24  ;;  %s13013_s30 = sshll.u32 %s13218_s10, 4  ;;  %s13014_s30 = int_to_ptr.vmem [resolvable:$false] %s13013_s30 }
  0x4f   : > { %s13015_s29 = scalar_lea.vmem %s13014_s30, 262144  ;;  %p13016_p11 = scmp.lt.s32.totalorder %s13395_s0, %s13014_s30 }
  0x50   : > { %p13011_p2 = pnand %p13009_p8, %p13409_p1  ;;  %p13017_p6 = scmp.lt.s32.totalorder %s13015_s29, %s13008_s24 }
  0x52   : > { %p13012_p0 = pneg %p13011_p2  ;;  %p13018_p5 = por %p13017_p6, %p13016_p11 }
  0x54   : > { %p13019_p7 = pnand %p13018_p5, %p13012_p0 }
  0x56   : > { %13022 = shalt.err (!%p13019_p7)
}
  0x57   : > { %s15303_s19 = smov 2048   ;;  %s13220_s1 = smov 256  }
  0x58   : > { %s13221_s15 = smov 16   ;;  %s15329_s24 = sadd.s32 1, %s13195_s26 }
  0x59   : > { %11210 = dma.hbm_to_vmem [thread:$0]  (!%p15327_p12), %s13392_s9, 131072, %s13395_s0, %s13403_s7, %s15303_s19, %s13220_s1, %s13221_s15  }
  0x5a   : > { %p15330_p11 = scmp.ne.s32.totalorder %s15326_s27, 0  ;;  %s11182_s30 = smul.u32 608, %s13381_s14 }
  0x5b   : > { %s13449_s21 = scalar_lea.hbm %s15281_s4, %s11062_s18  ;;  %s9882_s20 = sshll.u32 %s13381_s14, 2 }
  0x5c   : > { %s13441_s10 = scalar_select %p15330_p11, %s13195_s26, %s15329_s24  }
  0x5d   : > { %s11064_s28 = sshll.u32 %s13374_s23, 6  ;;  %s310_s12 = scalar_lea.vmem [#allocation9], %s11182_s30 }
  0x5e   : > { %s319_s25 = sshll.u32 %s310_s12, 4  ;;  %s13458_s9 = scalar_lea.hbm %s15282_s5, %s11064_s28  ;;  %s13460_s25 = int_to_ptr.vmem [resolvable:$true] %s319_s25 }
  0x5f   : > { %s13464_s3 = scalar_lea.vmem [#allocation10], %s9882_s20  ;;  %s13023_s24 = scalar_lea.hbm %s13449_s21, 9728 }
  0x60   : > { %s343_s18 = sshll.u32 %s13464_s3, 4  ;;  %p13024_p0 = scmp.ne.s32.totalorder %s13449_s21, %s13023_s24  ;;  %s344_s18 = int_to_ptr.vmem [resolvable:$true] %s343_s18 }
  0x61   : > { %s13028_s29 = scalar_lea.hbm %s15281_s4, 77824  ;;  %p13029_p9 = scmp.lt.u32.totalorder %s13449_s21, %s15281_s4 }
  0x62   : > { %p13026_p6 = pnand %p13024_p0, %p13409_p1  ;;  %p13030_p10 = scmp.lt.u32.totalorder %s13028_s29, %s13023_s24 }
  0x63   : > { %p13032_p3 = scmp.lt.u32.totalorder %s13023_s24, %s13449_s21 }
  0x64   : > { %p13027_p4 = pneg %p13026_p6  ;;  %p13031_p13 = por %p13030_p10, %p13029_p9 }
  0x66   : > { %p13033_p8 = por %p13032_p3, %p13031_p13 }
  0x68   : > { %p13034_p2 = pnand %p13033_p8, %p13027_p4 }
  0x6a   : > { %13037 = shalt.err (!%p13034_p2)
}
  0x6b   : > { %s13038_s27 = scalar_lea.vmem %s13460_s25, 9728  ;;  %s13222_s30 = smov [#allocation9]  }
  0x6c   : > { %p13039_p5 = scmp.ne.s32.totalorder %s13460_s25, %s13038_s27  ;;  %s13043_s12 = sshll.u32 %s13222_s30, 4  ;;  %s13044_s12 = int_to_ptr.vmem [resolvable:$false] %s13043_s12 }
  0x6d   : > { %s13045_s19 = scalar_lea.vmem %s13044_s12, 19456  ;;  %p13046_p0 = scmp.lt.s32.totalorder %s13460_s25, %s13044_s12 }
  0x6e   : > { %p13041_p7 = pnand %p13039_p5, %p13409_p1  ;;  %p13047_p6 = scmp.lt.s32.totalorder %s13045_s19, %s13038_s27 }
  0x70   : > { %p13042_p11 = pneg %p13041_p7  ;;  %p13048_p9 = por %p13047_p6, %p13046_p0 }
  0x72   : > { %p13049_p10 = pnand %p13048_p9, %p13042_p11 }
  0x74   : > { %13052 = shalt.err (!%p13049_p10)
}
  0x75   : > { %s15331_s24 = smov 2048   ;;  %s13053_s29 = scalar_lea.hbm %s13458_s9, 64 }
  0x76   : > { %11213 = dma.hbm_to_vmem [thread:$0]  (!%p15327_p12), %s13449_s21, 9728, %s13460_s25, %s13403_s7, %s15331_s24, %s13220_s1, %s13221_s15  }
  0x77   : > { %p13054_p4 = scmp.ne.s32.totalorder %s13458_s9, %s13053_s29  ;;  %s13058_s30 = scalar_lea.hbm %s15282_s5, 512 }
  0x78   : > { %p13059_p8 = scmp.lt.u32.totalorder %s13458_s9, %s15282_s5  ;;  %p13060_p2 = scmp.lt.u32.totalorder %s13058_s30, %s13053_s29 }
  0x79   : > { %p13056_p13 = pnand %p13054_p4, %p13409_p1  ;;  %p13062_p7 = scmp.lt.u32.totalorder %s13053_s29, %s13458_s9 }
  0x7a   : > { %p13061_p5 = por %p13060_p2, %p13059_p8 }
  0x7b   : > { %p13057_p3 = pneg %p13056_p13 }
  0x7c   : > { %p13063_p11 = por %p13062_p7, %p13061_p5 }
  0x7e   : > { %p13064_p0 = pnand %p13063_p11, %p13057_p3 }
  0x80   : > { %13067 = shalt.err (!%p13064_p0)
}
  0x81   : > { %s13068_s25 = scalar_lea.vmem %s344_s18, 64  ;;  %s13223_s21 = smov [#allocation10]  }
  0x82   : > { %p13069_p6 = scmp.ne.s32.totalorder %s344_s18, %s13068_s25  ;;  %s13073_s1 = sshll.u32 %s13223_s21, 4  ;;  %s13074_s1 = int_to_ptr.vmem [resolvable:$false] %s13073_s1 }
  0x83   : > { %s13075_s15 = scalar_lea.vmem %s13074_s1, 128  ;;  %p13076_p4 = scmp.lt.s32.totalorder %s344_s18, %s13074_s1 }
  0x84   : > { %p13071_p9 = pnand %p13069_p6, %p13409_p1  ;;  %p13077_p13 = scmp.lt.s32.totalorder %s13075_s15, %s13068_s25 }
  0x86   : > { %p13072_p10 = pneg %p13071_p9  ;;  %p13078_p12 = por %p13077_p13, %p13076_p4 }
  0x88   : > { %p13079_p2 = pnand %p13078_p12, %p13072_p10 }
  0x8a   : > { %13082 = shalt.err (!%p13079_p2)
}
  0x8b   : > { %p15332_p8 = scmp.ne.s32.totalorder %s15321_s17, 0  ;;  %s13224_s3 = smov [#allocation6]  }
  0x8c   : > { %s272_s24 = sshll.u32 %s13224_s3, 4  ;;  %s13517_s27 = scalar_lea.hbm %s15283_s6, %s11064_s28  ;;  %s273_s24 = int_to_ptr.vmem [resolvable:$true] %s272_s24 }
  0x8d   : > { %11216 = dma.hbm_to_vmem [thread:$0]  (!%p15332_p8), %s13458_s9, 64, %s344_s18, %s13403_s7  }
  0x8e   : > { %s13083_s19 = scalar_lea.hbm %s15279_s2, 1024  ;;  %p15333_p3 = scmp.ne.s32.totalorder %s15320_s16, 0 }
  0x8f   : > { %p13084_p12 = scmp.ne.s32.totalorder %s15279_s2, %s13083_s19  ;;  %p13090_p0 = scmp.lt.u32.totalorder %s13083_s19, %s15279_s2 }
  0x90   : > { %p15334_p5 = pneg %p15333_p3 }
  0x92   : > { %p13086_p7 = pnand %p13084_p12, %p15334_p5 }
  0x94   : > { %p13087_p11 = pneg %p13086_p7 }
  0x96   : > { %p13092_p6 = pnand %p13090_p0, %p13087_p11 }
  0x98   : > { %13095 = shalt.err (!%p13092_p6)
}
  0x99   : > { %s13096_s28 = scalar_lea.vmem %s273_s24, 1024  ;;  %p15335_p10 = pmov %p15334_p5 }
  0x9a   : > { %p13097_p9 = scmp.ne.s32.totalorder %s273_s24, %s13096_s28  ;;  %p13104_p2 = scmp.lt.s32.totalorder %s273_s24, %s273_s24 }
  0x9b   : > { %p13105_p8 = scmp.lt.s32.totalorder %s13096_s28, %s13096_s28 }
  0x9c   : > { %p13099_p4 = pnand %p13097_p9, %p15335_p10 }
  0x9d   : > { %p13106_p1 = por %p13105_p8, %p13104_p2 }
  0x9e   : > { %p13100_p13 = pneg %p13099_p4 }
  0xa0   : > { %p13107_p5 = pnand %p13106_p1, %p13100_p13 }
  0xa2   : > { %13110 = shalt.err (!%p13107_p5)
}
  0xa3   : > { %11206 = dma.hbm_to_vmem [thread:$0]  (!%p15333_p3), %s15279_s2, 1024, %s273_s24, [#allocation7]  }
  0xa4   : > { %s354_s15 = scalar_lea.vmem [#allocation11], %s9882_s20  ;;  %s13111_s29 = scalar_lea.hbm %s13517_s27, 64 }
  0xa5   : > { %s364_s3 = sshll.u32 %s354_s15, 4  ;;  %p13112_p8 = scmp.ne.s32.totalorder %s13517_s27, %s13111_s29  ;;  %s365_s3 = int_to_ptr.vmem [resolvable:$true] %s364_s3 }
  0xa6   : > { %p15336_p1 = scmp.ne.s32.totalorder %s15328_s22, 0  ;;  %s13116_s30 = scalar_lea.hbm %s15283_s6, 512 }
  0xa7   : > { %p13117_p11 = scmp.lt.u32.totalorder %s13517_s27, %s15283_s6  ;;  %p13118_p0 = scmp.lt.u32.totalorder %s13116_s30, %s13111_s29 }
  0xa8   : > { %p13114_p12 = pnand %p13112_p8, %p15336_p1  ;;  %p13120_p3 = scmp.lt.u32.totalorder %s13111_s29, %s13517_s27 }
  0xa9   : > { %p13119_p6 = por %p13118_p0, %p13117_p11 }
  0xaa   : > { %p13115_p7 = pneg %p13114_p12 }
  0xab   : > { %p13121_p9 = por %p13120_p3, %p13119_p6 }
  0xad   : > { %p13122_p10 = pnand %p13121_p9, %p13115_p7 }
  0xaf   : > { %13125 = shalt.err (!%p13122_p10)
}
  0xb0   : > { %s13126_s20 = scalar_lea.vmem %s365_s3, 64  ;;  %s13225_s14 = smov [#allocation11]  }
  0xb1   : > { %p13127_p4 = scmp.ne.s32.totalorder %s365_s3, %s13126_s20  ;;  %s13131_s24 = sshll.u32 %s13225_s14, 4  ;;  %s13132_s24 = int_to_ptr.vmem [resolvable:$false] %s13131_s24 }
  0xb2   : > { %s13133_s25 = scalar_lea.vmem %s13132_s24, 128  ;;  %p13134_p5 = scmp.lt.s32.totalorder %s365_s3, %s13132_s24 }
  0xb3   : > { %p13129_p13 = pnand %p13127_p4, %p15336_p1  ;;  %p13135_p8 = scmp.lt.s32.totalorder %s13133_s25, %s13126_s20 }
  0xb5   : > { %p13130_p2 = pneg %p13129_p13  ;;  %p13136_p12 = por %p13135_p8, %p13134_p5 }
  0xb7   : > { %p13137_p0 = pnand %p13136_p12, %p13130_p2 }
  0xb9   : > { %13140 = shalt.err (!%p13137_p0)
}
  0xba   : > { %p15337_p11 = scmp.ne.s32.totalorder %s15321_s17, 0  ;;  %p15338_p7 = scmp.ne.s32.totalorder %s15319_s13, 0 }
  0xbb   : > { %p15339_p1 = scmp.ne.s32.totalorder (!%p15338_p7), %s15316_s11, 0 }
  0xbc   : > { %11219 = dma.hbm_to_vmem [thread:$0]  (!%p15337_p11), %s13517_s27, 64, %s365_s3, %s13403_s7  }
  0xbd   : > { %373 = sbr.rel (%p15338_p7) target bundleno = 1989 (0x7c5), region = 48 }
  0xc4   : > { %13174 = dma.done.wait (%p15339_p1), [#allocation5], 32  }
  0xc5   : > { %13176 = vsyncadd (%p15339_p1), [#allocation5], 4294967264 }
  0xc6   : > { %13178 = dma.done.wait (%p15339_p1), [#allocation7], 1024  }
  0xc7   : > { %13180 = vsyncadd (%p15339_p1), [#allocation7], 4294966272  ;;  %s15340_s17 = sadd.s32 4294967295, %s13215_s8   ;;  %s15341_s22 = sld [smem:[#allocation15_spill]] }
  0xc8   : > { %s15342_s21 = sld [smem:[#allocation20_spill]]  ;;  %s383_s7 = sand.u32 1, %s15340_s17  }
  0xc9   : > { %s384_s9 = scalar_lea.sflag [#allocation5], %s383_s7 }
  0xcd   : > { %s385_s27 = sand.u32 1, %s15341_s22  }
  0xce   : > { %s9893_s13 = sshll.u32 %s385_s27, 13  ;;  %p15343_p6 = scmp.ne.s32.totalorder %s15342_s21, 0 }
  0xcf   : > { %s13572_s18 = scalar_lea.vmem [#allocation8], %s9893_s13 }
  0xd0   : > { %13182 = dma.done.wait (%p15343_p6), %s384_s9, 140928  }
  0xd1   : > { %13184 = vsyncadd (%p15343_p6), %s384_s9, 4294826368  ;;  %s15344_s28 = sld [smem:[#allocation17_spill]]  ;;  %s11183_s23 = smul.u32 608, %s385_s27 }
  0xd2   : > { %s9894_s11 = sshll.u32 %s385_s27, 2  ;;  %s15345_s29 = sld [smem:[#allocation26_spill]] }
  0xd3   : > { %s13585_s0 = scalar_lea.vmem [#allocation9], %s11183_s23  ;;  %s13587_s30 = scalar_lea.vmem [#allocation10], %s9894_s11 }
  0xd4   : > { %s13589_s12 = scalar_lea.vmem [#allocation11], %s9894_s11  ;;  %s15346_s19 = sld [smem:[#allocation16_spill]] }
  0xd7   : > { %p471_p3 = scmp.lt.s32.totalorder %s15344_s28, 1 }
  0xd9   : > { %s15365_s28 = smov (!%p471_p3, %s15344_s28), 1 }
  0xda   : > { %s9896_s1 = sshll.u32 %s15365_s28, 1  ;;  %p9897_p9 = scmp.ne.s32.totalorder %s15346_s19, 0 }
  0xdb   : > { %s13583_s16 = scalar_lea.vmem %s15345_s29, %s9896_s1  ;;  %s15347_s24 = sld [smem:[#allocation24_spill]] (!%p9897_p9)  ;;  %vm519_vm0 = vcmask (!%p9897_p9), 261120   ;;  %v13226_v7 = vmov (!%p9897_p9), 0.0|0.0   ;;  %vm1266_vm2 = vcmask (!%p9897_p9), 1024   ;;  %vm13227_vm3 = vmmov (!%p9897_p9), 0  }
  0xdc   : > { %479 = sbr.rel (%p9897_p9) target bundleno = 515 (0x203), region = 76  ;;  %vm13603_vm1 = vmpackc.low (!%p9897_p9), %vm519_vm0, %vm519_vm0  ;;  %11170 = vmatprep.subr.bf16.mxu1 (!%p9897_p9), %v13226_v7  ;;  %v13228_v10 = vmov (!%p9897_p9), 0.0   ;;  %v480_v25 = vld [vmem:[#allocation4] sm:$0x3] (!%p9897_p9)  ;;  %v788_v61 = vlaneseq (!%p9897_p9)  ;;  %v13229_v62 = vmov (!%p9897_p9), 1983009808  }
  0xdd   : > { %11119 = vmatprep.mubr.msk.f32.mxu1 (!%p9897_p9), %vm13227_vm3, %v13228_v10  ;;  %1267 = vst.msk [vmem:[%s13583_s16] sm:$0x3] (!%p9897_p9), %vm1266_vm2, %v13228_v10  ;;  %11098 = vmatprep.mubr.msk.f32.mxu0 (!%p9897_p9), %vm519_vm0, %v480_v25  ;;  %v832_v63 = vunpack.c.l.s4 (!%p9897_p9), %v13229_v62  ;;  %vm808_vm4 = vcmask (!%p9897_p9), 1040384   ;;  %vm809_vm5 = vcmask (!%p9897_p9), 1041409   ;;  %vm811_vm7 = vcmask (!%p9897_p9), 354306  }
  0xde   : > { %vm810_vm6 = vmor (!%p9897_p9), %vm809_vm5, %vm808_vm4 }
  0xdf   : > { %vm812_vm8 = vmor (!%p9897_p9), %vm811_vm7, %vm810_vm6 }
  0xe1   : > { %s15348_s17 = smov (!%p9897_p9), %s15347_s24  ;;  %v497_v0 = vld [vmem:[%s15347_s24 + $0x80] sm:$0xff] (!%p9897_p9) }
  0xe2   : > { %v498_v1 = vld [vmem:[%s15348_s17 + $0x88] sm:$0xff] (!%p9897_p9)  ;;  %v481_v2 = vld [vmem:[%s15348_s17] sm:$0xff] (!%p9897_p9)  ;;  %v499_v6 = vld [vmem:[%s15348_s17 + $0x90] sm:$0xff] (!%p9897_p9) }
  0xe3   : > { %v11122_v3 = vpack.c.bf16 %v498_v1, %v497_v0  ;;  %v482_v5 = vld [vmem:[%s15348_s17 + $0x8] sm:$0xff]  ;;  %v500_v9 = vld [vmem:[%s15348_s17 + $0x98] sm:$0xff]  ;;  %v483_v12 = vld [vmem:[%s15348_s17 + $0x10] sm:$0xff]  ;;  %v789_v0 = vshrl.u32 %v788_v61, 7  ;;  %v833_v1 = vunpack.c.0.s8 %v832_v63 }
  0xe4   : > { %v11125_v8 = vpack.c.bf16 %v482_v5, %v481_v2  ;;  %v11128_v11 = vpack.c.bf16 %v500_v9, %v499_v6  ;;  %v484_v13 = vld [vmem:[%s15348_s17 + $0x18] sm:$0xff]  ;;  %v501_v14 = vld [vmem:[%s15348_s17 + $0xa0] sm:$0xff]  ;;  %v502_v15 = vld [vmem:[%s15348_s17 + $0xa8] sm:$0xff] }
  0xe5   : > { %11124 = vmatprep.subr.msk.bf16.mxu0 %vm13603_vm1, %v11122_v3  ;;  %v11131_v16 = vpack.c.bf16 %v484_v13, %v483_v12  ;;  %v513_v17 = vld [vmem:[%s15348_s17 + $0x100] sm:$0xff]  ;;  %v514_v18 = vld [vmem:[%s15348_s17 + $0x108] sm:$0xff]  ;;  %v11134_v19 = vpack.c.bf16 %v502_v15, %v501_v14  ;;  %v515_v21 = vld [vmem:[%s15348_s17 + $0x110] sm:$0xff]  ;;  %v836_v10 = vsub.s32 %v833_v1, %v789_v0  ;;  %v13230_v15 = vmov 1966171168  }
  0xe6   : > { %11127 = vmatpush3.bf16.xpose.msk.msra.mxu0 %vm13603_vm1, %v11125_v8  ;;  %v11171_v20 = vpack.c.bf16 %v514_v18, %v513_v17  ;;  %v516_v22 = vld [vmem:[%s15348_s17 + $0x118] sm:$0xff]  ;;  %v485_v23 = vld [vmem:[%s15348_s17 + $0x20] sm:$0xff]  ;;  %v486_v24 = vld [vmem:[%s15348_s17 + $0x28] sm:$0xff] }
  0xe7   : > { %11130 = vmatprep.subr.msk.bf16.mxu0 %vm13603_vm1, %v11128_v11  ;;  %v503_v26 = vld [vmem:[%s15348_s17 + $0xb0] sm:$0xff]  ;;  %v504_v27 = vld [vmem:[%s15348_s17 + $0xb8] sm:$0xff]  ;;  %v11175_v28 = vpack.c.bf16 %v516_v22, %v515_v21  ;;  %v11137_v29 = vpack.c.bf16 %v486_v24, %v485_v23  ;;  %v517_v31 = vld [vmem:[%s15348_s17 + $0x120] sm:$0xff] }
  0xe8   : > { %11173 = vmatpush3.bf16.xpose.msk.msra.mxu1 %vm13603_vm1, %v11171_v20  ;;  %v11140_v30 = vpack.c.bf16 %v504_v27, %v503_v26  ;;  %v518_v32 = vld [vmem:[%s15348_s17 + $0x128] sm:$0xf]  ;;  %v487_v33 = vld [vmem:[%s15348_s17 + $0x30] sm:$0xff]  ;;  %v488_v34 = vld [vmem:[%s15348_s17 + $0x38] sm:$0xff] }
  0xe9   : > { %11174 = vmatprep.subr.bf16.mxu1 %v13226_v7  ;;  %v505_v35 = vld [vmem:[%s15348_s17 + $0xc0] sm:$0xff]  ;;  %v506_v36 = vld [vmem:[%s15348_s17 + $0xc8] sm:$0xff]  ;;  %v11179_v37 = vpack.c.bf16 %v518_v32, %v517_v31  ;;  %v11143_v38 = vpack.c.bf16 %v488_v34, %v487_v33  ;;  %v507_v42 = vld [vmem:[%s15348_s17 + $0xd0] sm:$0xff] }
  0xea   : > { %v11146_v39 = vpack.c.bf16 %v506_v36, %v505_v35  ;;  %v489_v40 = vld [vmem:[%s15348_s17 + $0x40] sm:$0xff]  ;;  %v490_v41 = vld [vmem:[%s15348_s17 + $0x48] sm:$0xff]  ;;  %v508_v43 = vld [vmem:[%s15348_s17 + $0xd8] sm:$0xff] }
  0xeb   : > { %v11149_v44 = vpack.c.bf16 %v490_v41, %v489_v40  ;;  %v11152_v45 = vpack.c.bf16 %v508_v43, %v507_v42  ;;  %v491_v46 = vld [vmem:[%s15348_s17 + $0x50] sm:$0xff]  ;;  %v492_v47 = vld [vmem:[%s15348_s17 + $0x58] sm:$0xff]  ;;  %v509_v48 = vld [vmem:[%s15348_s17 + $0xe0] sm:$0xff] }
  0xec   : > { %v510_v49 = vld [vmem:[%s15348_s17 + $0xe8] sm:$0xff]  ;;  %v11155_v50 = vpack.c.bf16 %v492_v47, %v491_v46  ;;  %v493_v52 = vld [vmem:[%s15348_s17 + $0x60] sm:$0xff]  ;;  %v511_v54 = vld [vmem:[%s15348_s17 + $0xf0] sm:$0xff] }
  0xed   : > { %v11158_v51 = vpack.c.bf16 %v510_v49, %v509_v48  ;;  %v494_v53 = vld [vmem:[%s15348_s17 + $0x68] sm:$0xff]  ;;  %v512_v55 = vld [vmem:[%s15348_s17 + $0xf8] sm:$0xff]  ;;  %v495_v58 = vld [vmem:[%s15348_s17 + $0x70] sm:$0xff] }
  0xee   : > { %11133 = vmatpush3.bf16.xpose.msk.msra.mxu0 %vm13603_vm1, %v11131_v16  ;;  %v11161_v56 = vpack.c.bf16 %v494_v53, %v493_v52  ;;  %v11164_v57 = vpack.c.bf16 %v512_v55, %v511_v54  ;;  %v496_v59 = vld [vmem:[%s15348_s17 + $0x78] sm:$0xff]  ;;  %v814_v2 = vld [vmem:[#allocation6] sm:$0xff]  ;;  %v815_v3 = vld [vmem:[#allocation6 + $0x8] sm:$0xff]  ;;  %v786_v16 = vunpack.c.l.s4 %v13230_v15 }
  0xef   : > { %11136 = vmatprep.subr.msk.bf16.mxu0 %vm13603_vm1, %v11134_v19  ;;  %v11167_v60 = vpack.c.bf16 %v496_v59, %v495_v58  ;;  %v816_v5 = vld [vmem:[#allocation6 + $0x10] sm:$0xff]  ;;  %v817_v6 = vld [vmem:[#allocation6 + $0x18] sm:$0xff]  ;;  %v819_v8 = vld [vmem:[#allocation6 + $0x28] sm:$0xff]  ;;  %v830_v9 = vcombine.high %v814_v2, %v814_v2  ;;  %v847_v11 = vcombine.high %v815_v3, %v815_v3  ;;  %v837_v17 = vrot.slane %v814_v2, %v836_v10 }
  0xf0   : > { %11177 = vmatpush3.bf16.xpose.msk.msra.mxu1 %vm13603_vm1, %v11175_v28  ;;  %v864_v12 = vcombine.high %v816_v5, %v816_v5  ;;  %v881_v13 = vcombine.high %v817_v6, %v817_v6  ;;  %v915_v14 = vcombine.high %v819_v8, %v819_v8  ;;  %v854_v19 = vrot.slane %v815_v3, %v836_v10 }
  0xf1   : > { %11178 = vmatprep.subr.bf16.mxu1 %v13226_v7  ;;  %v818_v7 = vld [vmem:[#allocation6 + $0x20] sm:$0xff]  ;;  %v844_v18 = vrot.slane %v830_v9, %v836_v10  ;;  %v861_v20 = vrot.slane %v847_v11, %v836_v10  ;;  %v871_v21 = vrot.slane %v816_v5, %v836_v10  ;;  %v888_v23 = vrot.slane %v817_v6, %v836_v10 }
  0xf2   : > { %v898_v4 = vcombine.high %v818_v7, %v818_v7  ;;  %v878_v22 = vrot.slane %v864_v12, %v836_v10  ;;  %v787_v24 = vunpack.c.0.s8 %v786_v16  ;;  %v845_v26 = vcombine.high %v837_v17, %v837_v17 }
  0xf3   : > { %v846_v27 = vcombine.high %v844_v18, %v844_v18  ;;  %v862_v28 = vcombine.high %v854_v19, %v854_v19  ;;  %v879_v31 = vcombine.high %v871_v21, %v871_v21  ;;  %v895_v33 = vrot.slane %v881_v13, %v836_v10 }
  0xf4   : > { %v880_v32 = vcombine.high %v878_v22, %v878_v22  ;;  %v13754_v34 = vsub.s32 %v787_v24, %v789_v0  ;;  %v896_v35 = vcombine.high %v888_v23, %v888_v23  ;;  %v905_v36 = vrot.slane %v818_v7, %v836_v10 }
  0xf5   : > { %v929_v40 = vrot.slane %v915_v14, %v836_v10  ;;  %v9939_v52 = vpack.c.bf16 %v845_v26, %v837_v17  ;;  %v9940_v53 = vpack.c.bf16 %v846_v27, %v844_v18  ;;  %v9943_v61 = vpack.c.bf16 %v879_v31, %v871_v21 }
  0xf6   : > { %11139 = vmatpush3.bf16.xpose.msk.msra.mxu0 %vm13603_vm1, %v11137_v29  ;;  %v821_v29 = vld [vmem:[#allocation6 + $0x38] sm:$0xff]  ;;  %v913_v42 = vcombine.high %v905_v36, %v905_v36  ;;  %v9944_v0 = vpack.c.bf16 %v880_v32, %v878_v22  ;;  %v9945_v1 = vpack.c.bf16 %v896_v35, %v888_v23 }
  0xf7   : > { %11142 = vmatprep.subr.msk.bf16.mxu0 %vm13603_vm1, %v11140_v30  ;;  %v863_v30 = vcombine.high %v861_v20, %v861_v20  ;;  %v931_v47 = vcombine.high %v929_v40, %v929_v40  ;;  %v956_v49 = vrot.slane %v821_v29, %v836_v10  ;;  %v1072_v59 = vrot.slane %v9939_v52, %v13754_v34 }
  0xf8   : > { %11181 = vmatpush3.bf16.xpose.msk.msra.mxu1 %vm13603_vm1, %v11179_v37  ;;  %v912_v37 = vrot.slane %v898_v4, %v836_v10  ;;  %v1121_v5 = vrot.slane %v9943_v61, %v13754_v34  ;;  %v9947_v6 = vpack.c.bf16 %v913_v42, %v905_v36  ;;  %v1135_v9 = vrot.slane %v9945_v1, %v13754_v34 }
  0xf9   : > { %v964_v55 = vcombine.high %v956_v49, %v956_v49  ;;  %v9950_v4 = vpack.c.bf16 %v931_v47, %v929_v40 }
  0xfa   : > { %v914_v43 = vcombine.high %v912_v37, %v912_v37  ;;  %v1170_v16 = vrot.slane %v9947_v6, %v13754_v34 }
  0xfe   : > { %11145 = vmatpush3.bf16.xpose.msk.msra.mxu0 %vm13603_vm1, %v11143_v38  ;;  %v897_v38 = vcombine.high %v895_v33, %v895_v33 }
  0xff   : > { %11148 = vmatprep.subr.msk.bf16.mxu0 %vm13603_vm1, %v11146_v39  ;;  %11120 = vmatmul.mubr.msk.f32.vlgmr.msra.gmra.mrb[0].mxu1 %vm519_vm0, %v480_v25  ;;  %v922_v39 = vrot.slane %v819_v8, %v836_v10  ;;  %v1128_v8 = vrot.slane %v9944_v0, %v13754_v34 }
 0x100   : > { %v9946_v3 = vpack.c.bf16 %v897_v38, %v895_v33 }
 0x101   : > { %v930_v46 = vcombine.high %v922_v39, %v922_v39  ;;  %v1143_v15 = vcombine.low %v1121_v5, %v1128_v8 }
 0x102   : > { %v1142_v12 = vrot.slane %v9946_v3, %v13754_v34 }
 0x103   : > { %v9949_v13 = vpack.c.bf16 %v930_v46, %v922_v39  ;;  %v1151_v23 = vrot.slane %v1143_v15, %v13754_v34 }
 0x104   : > { %v1144_v18 = vcombine.low %v1135_v9, %v1142_v12 }
 0x106   : > { %11151 = vmatpush3.bf16.xpose.msk.msra.mxu0 %vm13603_vm1, %v11149_v44  ;;  %v1158_v26 = vrot.slane %v1144_v18, %v13754_v34 }
 0x107   : > { %11154 = vmatprep.subr.msk.bf16.mxu0 %vm13603_vm1, %v11152_v45  ;;  %v949_v45 = vcombine.high %v821_v29, %v821_v29 }
 0x108   : > { %v1159_v33 = vcombine.low %v1151_v23, %v1158_v26 }
 0x10a   : > { %1263 = vst [vmem:[#allocation2 + $0x8] sm:$0xff] %v1159_v33 }
 0x10e   : > { %11157 = vmatpush3.bf16.xpose.msk.msra.mxu0 %vm13603_vm1, %v11155_v50 }
 0x10f   : > { %11160 = vmatprep.subr.msk.bf16.mxu0 %vm13603_vm1, %v11158_v51  ;;  %v963_v51 = vrot.slane %v949_v45, %v836_v10 }
 0x111   : > { %v965_v58 = vcombine.high %v963_v51, %v963_v51 }
 0x113   : > { %v9954_v29 = vpack.c.bf16 %v965_v58, %v963_v51 }
 0x116   : > { %11163 = vmatpush3.bf16.xpose.msk.msra.mxu0 %vm13603_vm1, %v11161_v56  ;;  %v9941_v56 = vpack.c.bf16 %v862_v28, %v854_v19  ;;  %v1184_v19 = vrot.slane %v9949_v13, %v13754_v34  ;;  %v9953_v28 = vpack.c.bf16 %v964_v55, %v956_v49 }
 0x117   : > { %11166 = vmatprep.subr.msk.bf16.mxu0 %vm13603_vm1, %v11164_v57  ;;  %v9942_v57 = vpack.c.bf16 %v863_v30, %v861_v20  ;;  %v1191_v20 = vrot.slane %v9950_v4, %v13754_v34 }
 0x118   : > { %v1086_v62 = vrot.slane %v9941_v56, %v13754_v34  ;;  %v1233_v36 = vrot.slane %v9953_v28, %v13754_v34 }
 0x119   : > { %v1093_v63 = vrot.slane %v9942_v57, %v13754_v34  ;;  %v1193_v27 = vcombine.low %v1184_v19, %v1191_v20 }
 0x11b   : > { %v1095_v7 = vcombine.low %v1086_v62, %v1093_v63  ;;  %v1207_v35 = vrot.slane %v1193_v27, %v13754_v34 }
 0x11d   : > { %v1109_v14 = vrot.slane %v1095_v7, %v13754_v34 }
 0x11e   : > { %11169 = vmatpush3.bf16.xpose.msk.msra.mxu0 %vm13603_vm1, %v11167_v60  ;;  %v1079_v60 = vrot.slane %v9940_v53, %v13754_v34 }
 0x120   : > { %v1094_v2 = vcombine.low %v1072_v59, %v1079_v60 }
 0x122   : > { %v1102_v11 = vrot.slane %v1094_v2, %v13754_v34 }
 0x124   : > { %v1110_v22 = vcombine.low %v1102_v11, %v1109_v14 }
 0x125   : > { %11099 = vmatmul.mubr.msk.f32.vlgmr.msra.gmra.mrb[0].mxu0 %vm519_vm0, %v480_v25  ;;  %v820_v25 = vld [vmem:[#allocation6 + $0x30] sm:$0xff] }
 0x126   : > { %v932_v41 = vcombine.high %v820_v25, %v820_v25  ;;  %v939_v44 = vrot.slane %v820_v25, %v836_v10  ;;  %1262 = vst [vmem:[#allocation2] sm:$0xff] %v1110_v22 }
 0x128   : > { %v946_v48 = vrot.slane %v932_v41, %v836_v10  ;;  %v947_v50 = vcombine.high %v939_v44, %v939_v44  ;;  %v9948_v10 = vpack.c.bf16 %v914_v43, %v912_v37  ;;  %v1240_v37 = vrot.slane %v9954_v29, %v13754_v34 }
 0x12a   : > { %v948_v54 = vcombine.high %v946_v48, %v946_v48  ;;  %v1177_v17 = vrot.slane %v9948_v10, %v13754_v34  ;;  %v9951_v21 = vpack.c.bf16 %v947_v50, %v939_v44  ;;  %v1242_v40 = vcombine.low %v1233_v36, %v1240_v37 }
 0x12c   : > { %v1192_v24 = vcombine.low %v1170_v16, %v1177_v17  ;;  %v9952_v25 = vpack.c.bf16 %v948_v54, %v946_v48  ;;  %v1219_v31 = vrot.slane %v9951_v21, %v13754_v34  ;;  %v1256_v42 = vrot.slane %v1242_v40, %v13754_v34 }
 0x12e   : > { %v1200_v30 = vrot.slane %v1192_v24, %v13754_v34  ;;  %v1226_v32 = vrot.slane %v9952_v25, %v13754_v34 }
 0x130   : > { %v1241_v38 = vcombine.low %v1219_v31, %v1226_v32  ;;  %v1208_v39 = vcombine.low %v1200_v30, %v1207_v35 }
 0x132   : > { %v1249_v41 = vrot.slane %v1241_v38, %v13754_v34  ;;  %1264 = vst [vmem:[#allocation2 + $0x10] sm:$0xff] %v1208_v39 }
 0x134   : > { %v1257_v43 = vcombine.low %v1249_v41, %v1256_v42 }
 0x136   : > { %1265 = vst [vmem:[#allocation2 + $0x18] sm:$0xff] %v1257_v43 }
 0x1d2   : > { %v774_v44 = vpop.f32.mrb[0].mxu1 }
 0x1d3   : > { %v11121_v45 = vpop.f32.mrb[1].mxu1  ;;  %v780_v46 = vpack.c.bf16 %v774_v44, %v774_v44 }
 0x1d5   : > { %v798_v49 = vrot.slane %v780_v46, %v13754_v34 }
 0x1f8   : > { %v703_v47 = vpop.f32.mrb[0].mxu0 }
 0x1f9   : > { %v705_v48 = vpop.f32.mrb[1].mxu0 }
 0x1fa   : > { %v9938_v50 = vpack.c.bf16 %v705_v48, %v703_v47 }
 0x1fc   : > { %v791_v51 = vrot.slane %v9938_v50, %v13754_v34 }
 0x1fe   : > { %v799_v52 = vcombine.low %v791_v51, %v798_v49 }
 0x200   : > { %v806_v53 = vrot.slane %v799_v52, %v13754_v34 }
 0x202   : > { %813 = vst.msk [vmem:[#allocation3] sm:$0x7] %vm812_vm8, %v806_v53 }
 0x203 PF: > { %v11309_v54 = vld [vmem:[%s13585_s0 + $0x4] ss:$16 sps:$4 sm:$0xff]   ;;  %v2385_v55 = vlaneseq  ;;  %v13231_v57 = vmov 0   ;;  %v11313_v58 = vld [vmem:[%s13585_s0] ss:$16 sps:$4 sm:$0xff]   ;;  %vm2779_vm9 = vcmask 1045504  }
 0x204   : > { %v11311_v56 = vld [vmem:[%s13585_s0 + $0x204] ss:$16 sps:$4 sm:$0xff]   ;;  %2865 = vmatprep.mubr.bf16.mxu1 %v13231_v57  ;;  %2792 = vmatprep.subr.bf16.mxu0 %v11309_v54  ;;  %v11314_v34 = vld [vmem:[%s13585_s0 + $0x200] ss:$16 sps:$4 sm:$0xff]   ;;  %v13232_v59 = vmov 1966171168  }
 0x205   : > { %v2383_v60 = vunpack.c.l.s4 %v13232_v59  ;;  %v13788_v61 = vshrl.u32 %v2385_v55, 7  ;;  %2833 = vmatprep.subr.bf16.mxu1 %v11311_v56  ;;  %v11315_v62 = vld [vmem:[%s13585_s0 + $0x24] ss:$16 sps:$4 sm:$0xff]   ;;  %2793 = vmatpush1.bf16.msra.mxu0 %v11313_v58  ;;  %v11319_v0 = vld [vmem:[%s13585_s0 + $0x20] ss:$16 sps:$4 sm:$0xff]   ;;  %vm2775_vm10 = vcmask 359424  }
 0x206   : > { %2834 = vmatpush1.bf16.msra.mxu1 %v11314_v34  ;;  %v11317_v63 = vld [vmem:[%s13585_s0 + $0x224] ss:$16 sps:$4 sm:$0xff]   ;;  %2794 = vmatprep.subr.bf16.mxu0 %v11315_v62  ;;  %v11320_v2 = vld [vmem:[%s13585_s0 + $0x220] ss:$16 sps:$4 sm:$0xff]   ;;  %v11331_v13 = vld [vmem:[%s13585_s0 + $0xc] ss:$16 sps:$4 sm:$0xff]  }
 0x207   : > { %v2384_v1 = vunpack.c.0.s8 %v2383_v60  ;;  %2835 = vmatprep.subr.bf16.mxu1 %v11317_v63  ;;  %v11321_v3 = vld [vmem:[%s13585_s0 + $0x44] ss:$16 sps:$4 sm:$0xff]   ;;  %v11325_v7 = vld [vmem:[%s13585_s0 + $0x40] ss:$16 sps:$4 sm:$0xff]   ;;  %v11329_v14 = vld [vmem:[%s13585_s0 + $0x8] ss:$16 sps:$4 sm:$0xff]  }
 0x208   : > { %v11323_v6 = vld [vmem:[%s13585_s0 + $0x244] ss:$16 sps:$4 sm:$0x3f]   ;;  %v11326_v8 = vld [vmem:[%s13585_s0 + $0x240] ss:$16 sps:$4 sm:$0x3f]  }
 0x209   : > { %v13796_v5 = vsub.s32 %v2384_v1, %v13788_v61  ;;  %2795 = vmatpush1.bf16.msra.mxu0 %v11319_v0  ;;  %v11327_v9 = vld [vmem:[%s13585_s0 + $0x64] ss:$16 sps:$4 sm:$0xff]   ;;  %v9955_v10 = vld.sshfl [vmem:[#allocation3] sm:$0x13 pattern:$0x75316420] }
 0x20a   : > { %2836 = vmatpush1.bf16.msra.mxu1 %v11320_v2  ;;  %2796 = vmatprep.subr.bf16.mxu0 %v11321_v3  ;;  %v2781_v11 = vsel %vm2779_vm9, %v11326_v8, 0  ;;  %v2381_v4 = vcombine.high %v9955_v10, %v9955_v10  ;;  %v11332_v16 = vld [vmem:[%s13585_s0 + $0x60] ss:$16 sps:$4 sm:$0xff]   ;;  %v11333_v18 = vld [vmem:[%s13585_s0 + $0x84] ss:$16 sps:$4 sm:$0xff]   ;;  %vm9685_vm13 = vcmask 1041408  }
 0x20b   : > { %10032 = vmatprep.subr.msk.bf16.mxu1 %vm2779_vm9, %v11323_v6  ;;  %v13805_v12 = vrot.slane %v9955_v10, %v13796_v5  ;;  %v11337_v19 = vld [vmem:[%s13585_s0 + $0x2c] ss:$16 sps:$4 sm:$0xff]   ;;  %v11335_v20 = vld [vmem:[%s13585_s0 + $0x28] ss:$16 sps:$4 sm:$0xff]   ;;  %v11338_v21 = vld [vmem:[%s13585_s0 + $0x80] ss:$16 sps:$4 sm:$0xff]  }
 0x20c   : > { %v2395_v17 = vrot.slane %v2381_v4, %v13796_v5  ;;  %v11339_v22 = vld [vmem:[%s13585_s0 + $0xa4] ss:$16 sps:$4 sm:$0xff]   ;;  %v11343_v23 = vld [vmem:[%s13585_s0 + $0x4c] ss:$16 sps:$4 sm:$0xff]   ;;  %v11341_v24 = vld [vmem:[%s13585_s0 + $0x48] ss:$16 sps:$4 sm:$0xff]  }
 0x20d   : > { %2797 = vmatpush1.bf16.msra.mxu0 %v11325_v7  ;;  %v13811_v15 = vcombine.high %v13805_v12, %v13805_v12  ;;  %v11344_v25 = vld [vmem:[%s13585_s0 + $0xa0] ss:$16 sps:$4 sm:$0xff]   ;;  %v11345_v26 = vld [vmem:[%s13585_s0 + $0xc4] ss:$16 sps:$4 sm:$0xff]   ;;  %v11349_v27 = vld [vmem:[%s13585_s0 + $0x6c] ss:$16 sps:$4 sm:$0xff]  }
 0x20e   : > { %2838 = vmatpush1.bf16.msra.mxu1 %v2781_v11  ;;  %2798 = vmatprep.subr.bf16.mxu0 %v11327_v9  ;;  %v11347_v28 = vld [vmem:[%s13585_s0 + $0x68] ss:$16 sps:$4 sm:$0xff]   ;;  %v11350_v29 = vld [vmem:[%s13585_s0 + $0xc0] ss:$16 sps:$4 sm:$0xff]   ;;  %v11351_v30 = vld [vmem:[%s13585_s0 + $0xe4] ss:$16 sps:$4 sm:$0xff]  }
 0x20f   : > { %2874 = vmatprep.subr.bf16.mxu1 %v11331_v13  ;;  %2824 = vmatprep.mubr.bf16.mxu0 %v2395_v17  ;;  %v11355_v31 = vld [vmem:[%s13585_s0 + $0x8c] ss:$16 sps:$4 sm:$0xff]   ;;  %v11353_v32 = vld [vmem:[%s13585_s0 + $0x88] ss:$16 sps:$4 sm:$0xff]   ;;  %v11356_v33 = vld [vmem:[%s13585_s0 + $0xe0] ss:$16 sps:$4 sm:$0xff]  }
 0x210   : > { %v11357_v35 = vld [vmem:[%s13585_s0 + $0x104] ss:$16 sps:$4 sm:$0xff]   ;;  %v11361_v36 = vld [vmem:[%s13585_s0 + $0xac] ss:$16 sps:$4 sm:$0xff]   ;;  %v11359_v37 = vld [vmem:[%s13585_s0 + $0xa8] ss:$16 sps:$4 sm:$0xff]  }
 0x211   : > { %10033 = vmatmul.mubr.msk.bf16.vlgmr.msra.gmra.mrb[0].mxu1 %vm2775_vm10, %v13811_v15  ;;  %2799 = vmatpush1.bf16.msra.mxu0 %v11332_v16  ;;  %v11362_v38 = vld [vmem:[%s13585_s0 + $0x100] ss:$16 sps:$4 sm:$0xff]   ;;  %v11363_v39 = vld [vmem:[%s13585_s0 + $0x124] ss:$16 sps:$4 sm:$0xff]   ;;  %v11367_v40 = vld [vmem:[%s13585_s0 + $0xcc] ss:$16 sps:$4 sm:$0xff]  }
 0x212   : > { %2875 = vmatpush1.bf16.msra.mxu1 %v11329_v14  ;;  %2800 = vmatprep.subr.bf16.mxu0 %v11333_v18  ;;  %v11365_v41 = vld [vmem:[%s13585_s0 + $0xc8] ss:$16 sps:$4 sm:$0xff]   ;;  %v11368_v42 = vld [vmem:[%s13585_s0 + $0x120] ss:$16 sps:$4 sm:$0xff]   ;;  %v11369_v43 = vld [vmem:[%s13585_s0 + $0x144] ss:$16 sps:$4 sm:$0xff]  }
 0x213   : > { %2876 = vmatprep.subr.bf16.mxu1 %v11337_v19  ;;  %2906 = vmatprep.mubr.bf16.mxu1 %v2395_v17  ;;  %v11373_v44 = vld [vmem:[%s13585_s0 + $0xec] ss:$16 sps:$4 sm:$0xff]   ;;  %v11371_v45 = vld [vmem:[%s13585_s0 + $0xe8] ss:$16 sps:$4 sm:$0xff]   ;;  %v11374_v46 = vld [vmem:[%s13585_s0 + $0x140] ss:$16 sps:$4 sm:$0xff]  }
 0x214   : > { %v11375_v47 = vld [vmem:[%s13585_s0 + $0x164] ss:$16 sps:$4 sm:$0xff]   ;;  %v11379_v48 = vld [vmem:[%s13585_s0 + $0x10c] ss:$16 sps:$4 sm:$0xff]   ;;  %v11377_v49 = vld [vmem:[%s13585_s0 + $0x108] ss:$16 sps:$4 sm:$0xff]  }
 0x215   : > { %2801 = vmatpush1.bf16.msra.mxu0 %v11338_v21  ;;  %v11380_v50 = vld [vmem:[%s13585_s0 + $0x160] ss:$16 sps:$4 sm:$0xff]   ;;  %v11381_v51 = vld [vmem:[%s13585_s0 + $0x184] ss:$16 sps:$4 sm:$0xff]   ;;  %v11385_v52 = vld [vmem:[%s13585_s0 + $0x12c] ss:$16 sps:$4 sm:$0xff]  }
 0x216   : > { %2877 = vmatpush1.bf16.msra.mxu1 %v11335_v20  ;;  %2802 = vmatprep.subr.bf16.mxu0 %v11339_v22  ;;  %v11383_v53 = vld [vmem:[%s13585_s0 + $0x128] ss:$16 sps:$4 sm:$0xff]   ;;  %v11386_v54 = vld [vmem:[%s13585_s0 + $0x180] ss:$16 sps:$4 sm:$0xff]   ;;  %v11387_v55 = vld [vmem:[%s13585_s0 + $0x1a4] ss:$16 sps:$4 sm:$0xff]  }
 0x217   : > { %2878 = vmatprep.subr.bf16.mxu1 %v11343_v23  ;;  %v11391_v56 = vld [vmem:[%s13585_s0 + $0x14c] ss:$16 sps:$4 sm:$0xff]   ;;  %v11389_v58 = vld [vmem:[%s13585_s0 + $0x148] ss:$16 sps:$4 sm:$0xff]   ;;  %v11392_v34 = vld [vmem:[%s13585_s0 + $0x1a0] ss:$16 sps:$4 sm:$0xff]  }
 0x218   : > { %v11393_v59 = vld [vmem:[%s13585_s0 + $0x1c4] ss:$16 sps:$4 sm:$0xff]   ;;  %v11397_v60 = vld [vmem:[%s13585_s0 + $0x16c] ss:$16 sps:$4 sm:$0xff]   ;;  %v11395_v62 = vld [vmem:[%s13585_s0 + $0x168] ss:$16 sps:$4 sm:$0xff]  }
 0x219   : > { %2803 = vmatpush1.bf16.msra.mxu0 %v11344_v25  ;;  %v11398_v63 = vld [vmem:[%s13585_s0 + $0x1c0] ss:$16 sps:$4 sm:$0xff]   ;;  %v11399_v0 = vld [vmem:[%s13585_s0 + $0x1e4] ss:$16 sps:$4 sm:$0xff]   ;;  %v11403_v1 = vld [vmem:[%s13585_s0 + $0x18c] ss:$16 sps:$4 sm:$0xff]  }
 0x21a   : > { %2879 = vmatpush1.bf16.msra.mxu1 %v11341_v24  ;;  %2804 = vmatprep.subr.bf16.mxu0 %v11345_v26  ;;  %v11401_v2 = vld [vmem:[%s13585_s0 + $0x188] ss:$16 sps:$4 sm:$0xff]   ;;  %v11404_v3 = vld [vmem:[%s13585_s0 + $0x1e0] ss:$16 sps:$4 sm:$0xff]   ;;  %v11407_v6 = vld [vmem:[%s13585_s0 + $0x1ac] ss:$16 sps:$4 sm:$0xff]  }
 0x21b   : > { %2880 = vmatprep.subr.bf16.mxu1 %v11349_v27  ;;  %v11410_v7 = vld [vmem:[%s13585_s0 + $0x20c] ss:$16 sps:$4 sm:$0xff]   ;;  %v11405_v8 = vld [vmem:[%s13585_s0 + $0x1a8] ss:$16 sps:$4 sm:$0xff]   ;;  %v11425_v20 = vld [vmem:[%s13572_s18 + $0x4] ss:$16 sps:$4 sm:$0xff]  }
 0x21c   : > { %v11408_v9 = vld [vmem:[%s13585_s0 + $0x208] ss:$16 sps:$4 sm:$0xff]   ;;  %v11413_v10 = vld [vmem:[%s13585_s0 + $0x1cc] ss:$16 sps:$4 sm:$0xff]   ;;  %v11428_v21 = vld [vmem:[%s13572_s18 + $0x204] ss:$16 sps:$4 sm:$0xff]  }
 0x21d   : > { %2805 = vmatpush1.bf16.msra.mxu0 %v11350_v29  ;;  %v11416_v11 = vld [vmem:[%s13585_s0 + $0x22c] ss:$16 sps:$4 sm:$0xff]   ;;  %v11411_v13 = vld [vmem:[%s13585_s0 + $0x1c8] ss:$16 sps:$4 sm:$0xff]   ;;  %v11423_v22 = vld [vmem:[%s13572_s18] ss:$16 sps:$4 sm:$0xff]  }
 0x21e   : > { %2881 = vmatpush1.bf16.msra.mxu1 %v11347_v28  ;;  %2806 = vmatprep.subr.bf16.mxu0 %v11351_v30  ;;  %v11414_v4 = vld [vmem:[%s13585_s0 + $0x228] ss:$16 sps:$4 sm:$0xff]   ;;  %v11420_v14 = vld [vmem:[%s13585_s0 + $0x24c] ss:$16 sps:$4 sm:$0x3f]   ;;  %vm9696_vm0 = vcmask 1024  }
 0x21f   : > { %2882 = vmatprep.subr.bf16.mxu1 %v11355_v31  ;;  %v11419_v16 = vld [vmem:[%s13585_s0 + $0x1ec] ss:$16 sps:$4 sm:$0xff]   ;;  %v11422_v17 = vld [vmem:[%s13585_s0 + $0x248] ss:$16 sps:$4 sm:$0x3f]  }
 0x220   : > { %v11417_v18 = vld [vmem:[%s13585_s0 + $0x1e8] ss:$16 sps:$4 sm:$0xff]   ;;  %v2787_v19 = vsel %vm2779_vm9, %v11422_v17, 0  ;;  %v11431_v23 = vld [vmem:[%s13572_s18 + $0x24] ss:$16 sps:$4 sm:$0xff]  }
 0x221   : > { %2807 = vmatpush1.bf16.msra.mxu0 %v11356_v33  ;;  %v11434_v24 = vld [vmem:[%s13572_s18 + $0x224] ss:$16 sps:$4 sm:$0xff]   ;;  %v11429_v25 = vld [vmem:[%s13572_s18 + $0x20] ss:$16 sps:$4 sm:$0xff]  }
 0x222   : > { %2883 = vmatpush1.bf16.msra.mxu1 %v11353_v32  ;;  %2808 = vmatprep.subr.bf16.mxu0 %v11357_v35  ;;  %v11432_v26 = vld [vmem:[%s13572_s18 + $0x220] ss:$16 sps:$4 sm:$0xff]   ;;  %v11437_v27 = vld [vmem:[%s13572_s18 + $0x44] ss:$16 sps:$4 sm:$0xff]  }
 0x223   : > { %2884 = vmatprep.subr.bf16.mxu1 %v11361_v36  ;;  %v11440_v28 = vld [vmem:[%s13572_s18 + $0x244] ss:$16 sps:$4 sm:$0xff]   ;;  %v11435_v29 = vld [vmem:[%s13572_s18 + $0x40] ss:$16 sps:$4 sm:$0xff]  }
 0x224   : > { %v11446_v30 = vld [vmem:[%s13572_s18 + $0x264] ss:$16 sps:$4 sm:$0xff]   ;;  %v11441_v31 = vld [vmem:[%s13572_s18 + $0x60] ss:$16 sps:$4 sm:$0xff]  }
 0x225   : > { %2809 = vmatpush1.bf16.msra.mxu0 %v11362_v38  ;;  %v11444_v32 = vld [vmem:[%s13572_s18 + $0x260] ss:$16 sps:$4 sm:$0xff]   ;;  %v11449_v33 = vld [vmem:[%s13572_s18 + $0x84] ss:$16 sps:$4 sm:$0xff]  }
 0x226   : > { %2885 = vmatpush1.bf16.msra.mxu1 %v11359_v37  ;;  %2810 = vmatprep.subr.bf16.mxu0 %v11363_v39  ;;  %v11452_v35 = vld [vmem:[%s13572_s18 + $0x284] ss:$16 sps:$4 sm:$0xff]   ;;  %v11447_v36 = vld [vmem:[%s13572_s18 + $0x80] ss:$16 sps:$4 sm:$0xff]  }
 0x227   : > { %2886 = vmatprep.subr.bf16.mxu1 %v11367_v40  ;;  %v11450_v37 = vld [vmem:[%s13572_s18 + $0x280] ss:$16 sps:$4 sm:$0xff]   ;;  %v11455_v38 = vld [vmem:[%s13572_s18 + $0xa4] ss:$16 sps:$4 sm:$0xff]  }
 0x228   : > { %v11458_v39 = vld [vmem:[%s13572_s18 + $0x2a4] ss:$16 sps:$4 sm:$0xff]   ;;  %v13906_v40 = vld [vmem:[#allocation2] sm:$0xff] }
 0x229   : > { %2811 = vmatpush1.bf16.msra.mxu0 %v11368_v42  ;;  %v11453_v42 = vld [vmem:[%s13572_s18 + $0xa0] ss:$16 sps:$4 sm:$0xff]   ;;  %v2960_v17 = vcombine.high %v13906_v40, %v13906_v40 }
 0x22a   : > { %2887 = vmatpush1.bf16.msra.mxu1 %v11365_v41  ;;  %2812 = vmatprep.subr.bf16.mxu0 %v11369_v43  ;;  %v13910_v41 = vrot.slane %v13906_v40, %v13796_v5  ;;  %v11456_v43 = vld [vmem:[%s13572_s18 + $0x2a0] ss:$16 sps:$4 sm:$0xff]   ;;  %v11533_v40 = vld [vmem:[%s13572_s18 + $0x444] ss:$16 sps:$4 sm:$0xff]  }
 0x22b   : > { %2888 = vmatprep.subr.bf16.mxu1 %v11373_v44 }
 0x22c   : > { %v2975_v44 = vcombine.high %v13910_v41, %v13910_v41 }
 0x22d   : > { %2813 = vmatpush1.bf16.msra.mxu0 %v11374_v46  ;;  %v11464_v46 = vld [vmem:[%s13572_s18 + $0x2c4] ss:$16 sps:$4 sm:$0xff]  }
 0x22e   : > { %2889 = vmatpush1.bf16.msra.mxu1 %v11371_v45  ;;  %2814 = vmatprep.subr.bf16.mxu0 %v11375_v47  ;;  %v11461_v45 = vld [vmem:[%s13572_s18 + $0xc4] ss:$16 sps:$4 sm:$0xff]   ;;  %v13919_v47 = vrot.slane %v2975_v44, %v13796_v5 }
 0x22f   : > { %2890 = vmatprep.subr.bf16.mxu1 %v11379_v48  ;;  %v11459_v48 = vld [vmem:[%s13572_s18 + $0xc0] ss:$16 sps:$4 sm:$0xff]   ;;  %v11539_v44 = vld [vmem:[%s13572_s18 + $0x464] ss:$16 sps:$4 sm:$0xff]  }
 0x231   : > { %2815 = vmatpush1.bf16.msra.mxu0 %v11380_v50  ;;  %v13925_v50 = vcombine.high %v13919_v47, %v13919_v47 }
 0x232   : > { %2891 = vmatpush1.bf16.msra.mxu1 %v11377_v49  ;;  %2816 = vmatprep.subr.bf16.mxu0 %v11381_v51  ;;  %v11462_v49 = vld [vmem:[%s13572_s18 + $0x2c0] ss:$16 sps:$4 sm:$0xff]   ;;  %v11467_v51 = vld [vmem:[%s13572_s18 + $0xe4] ss:$16 sps:$4 sm:$0xff]  }
 0x233   : > { %2892 = vmatprep.subr.bf16.mxu1 %v11385_v52  ;;  %v11470_v52 = vld [vmem:[%s13572_s18 + $0x2e4] ss:$16 sps:$4 sm:$0xff]  }
 0x235   : > { %2817 = vmatpush1.bf16.msra.mxu0 %v11386_v54  ;;  %v11468_v54 = vld [vmem:[%s13572_s18 + $0x2e0] ss:$16 sps:$4 sm:$0xff]  }
 0x236   : > { %2893 = vmatpush1.bf16.msra.mxu1 %v11383_v53  ;;  %2818 = vmatprep.subr.bf16.mxu0 %v11387_v55  ;;  %v11465_v53 = vld [vmem:[%s13572_s18 + $0xe0] ss:$16 sps:$4 sm:$0xff]   ;;  %v11473_v55 = vld [vmem:[%s13572_s18 + $0x104] ss:$16 sps:$4 sm:$0xff]  }
 0x237   : > { %2894 = vmatprep.subr.bf16.mxu1 %v11391_v56  ;;  %v11476_v56 = vld [vmem:[%s13572_s18 + $0x304] ss:$16 sps:$4 sm:$0xff]  }
 0x239   : > { %2819 = vmatpush1.bf16.msra.mxu0 %v11392_v34  ;;  %v11474_v34 = vld [vmem:[%s13572_s18 + $0x300] ss:$16 sps:$4 sm:$0xff]  }
 0x23a   : > { %2895 = vmatpush1.bf16.msra.mxu1 %v11389_v58  ;;  %2820 = vmatprep.subr.bf16.mxu0 %v11393_v59  ;;  %v11471_v58 = vld [vmem:[%s13572_s18 + $0x100] ss:$16 sps:$4 sm:$0xff]   ;;  %v11479_v59 = vld [vmem:[%s13572_s18 + $0x124] ss:$16 sps:$4 sm:$0xff]  }
 0x23b   : > { %2896 = vmatprep.subr.bf16.mxu1 %v11397_v60  ;;  %v11482_v60 = vld [vmem:[%s13572_s18 + $0x324] ss:$16 sps:$4 sm:$0xff]  }
 0x23d   : > { %2821 = vmatpush1.bf16.msra.mxu0 %v11398_v63  ;;  %v11480_v63 = vld [vmem:[%s13572_s18 + $0x320] ss:$16 sps:$4 sm:$0xff]  }
 0x23e   : > { %2897 = vmatpush1.bf16.msra.mxu1 %v11395_v62  ;;  %2822 = vmatprep.subr.bf16.mxu0 %v11399_v0  ;;  %v11477_v62 = vld [vmem:[%s13572_s18 + $0x120] ss:$16 sps:$4 sm:$0xff]   ;;  %v11485_v0 = vld [vmem:[%s13572_s18 + $0x144] ss:$16 sps:$4 sm:$0xff]  }
 0x23f   : > { %2898 = vmatprep.subr.bf16.mxu1 %v11403_v1  ;;  %v11488_v1 = vld [vmem:[%s13572_s18 + $0x344] ss:$16 sps:$4 sm:$0xff]  }
 0x241   : > { %2823 = vmatpush1.bf16.msra.mxu0 %v11404_v3  ;;  %v11486_v3 = vld [vmem:[%s13572_s18 + $0x340] ss:$16 sps:$4 sm:$0xff]  }
 0x242   : > { %2899 = vmatpush1.bf16.msra.mxu1 %v11401_v2  ;;  %2915 = vmatprep.subr.bf16.mxu0 %v11410_v7  ;;  %v11483_v2 = vld [vmem:[%s13572_s18 + $0x140] ss:$16 sps:$4 sm:$0xff]   ;;  %v11494_v7 = vld [vmem:[%s13572_s18 + $0x364] ss:$16 sps:$4 sm:$0xff]  }
 0x243   : > { %2900 = vmatprep.subr.bf16.mxu1 %v11407_v6  ;;  %v11491_v6 = vld [vmem:[%s13572_s18 + $0x164] ss:$16 sps:$4 sm:$0xff]  }
 0x244   : > { %2825 = vmatmul.mubr.bf16.vlgmr.msra.gmra.mrb[0].mxu0 %v13805_v12 }
 0x245   : > { %2916 = vmatpush1.bf16.msra.mxu0 %v11408_v9  ;;  %2947 = vmatprep.mubr.bf16.mxu0 %v13231_v57  ;;  %v11426_v57 = vld [vmem:[%s13572_s18 + $0x200] ss:$16 sps:$4 sm:$0xff]  }
 0x246   : > { %2901 = vmatpush1.bf16.msra.mxu1 %v11405_v8  ;;  %2917 = vmatprep.subr.bf16.mxu0 %v11416_v11  ;;  %v11489_v8 = vld [vmem:[%s13572_s18 + $0x160] ss:$16 sps:$4 sm:$0xff]   ;;  %v11500_v11 = vld [vmem:[%s13572_s18 + $0x384] ss:$16 sps:$4 sm:$0xff]  }
 0x247   : > { %2902 = vmatprep.subr.bf16.mxu1 %v11413_v10  ;;  %v11492_v9 = vld [vmem:[%s13572_s18 + $0x360] ss:$16 sps:$4 sm:$0xff]   ;;  %v11497_v10 = vld [vmem:[%s13572_s18 + $0x184] ss:$16 sps:$4 sm:$0xff]  }
 0x249   : > { %2918 = vmatpush1.bf16.msra.mxu0 %v11414_v4  ;;  %v11498_v4 = vld [vmem:[%s13572_s18 + $0x380] ss:$16 sps:$4 sm:$0xff]  }
 0x24a   : > { %2903 = vmatpush1.bf16.msra.mxu1 %v11411_v13  ;;  %10034 = vmatprep.subr.msk.bf16.mxu0 %vm2779_vm9, %v11420_v14  ;;  %v11495_v13 = vld [vmem:[%s13572_s18 + $0x180] ss:$16 sps:$4 sm:$0xff]   ;;  %v11503_v14 = vld [vmem:[%s13572_s18 + $0x1a4] ss:$16 sps:$4 sm:$0xff]  }
 0x24b   : > { %2904 = vmatprep.subr.bf16.mxu1 %v11419_v16  ;;  %v11506_v16 = vld [vmem:[%s13572_s18 + $0x3a4] ss:$16 sps:$4 sm:$0xff]  }
 0x24d   : > { %2920 = vmatpush1.bf16.msra.mxu0 %v2787_v19  ;;  %v11504_v19 = vld [vmem:[%s13572_s18 + $0x3a0] ss:$16 sps:$4 sm:$0xff]  }
 0x24e   : > { %2905 = vmatpush1.bf16.msra.mxu1 %v11417_v18  ;;  %8308 = vmatprep.subr.bf16.mxu0 %v11425_v20  ;;  %v11501_v18 = vld [vmem:[%s13572_s18 + $0x1a0] ss:$16 sps:$4 sm:$0xff]   ;;  %v11509_v20 = vld [vmem:[%s13572_s18 + $0x1c4] ss:$16 sps:$4 sm:$0xff]  }
 0x24f   : > { %8349 = vmatprep.subr.bf16.mxu1 %v11428_v21  ;;  %v11512_v21 = vld [vmem:[%s13572_s18 + $0x3c4] ss:$16 sps:$4 sm:$0xff]  }
 0x250   : > { %10035 = vmatmul.mubr.msk.bf16.vlgmr.msra.gmra.mrb[4].mxu0 %vm2775_vm10, %v13811_v15  ;;  %v11443_v15 = vld [vmem:[%s13572_s18 + $0x64] ss:$16 sps:$4 sm:$0xff]  }
 0x251   : > { %2907 = vmatmul.mubr.bf16.vlgmr.msra.gmra.mrb[4].mxu1 %v13805_v12  ;;  %8309 = vmatpush1.bf16.msra.mxu0 %v11423_v22  ;;  %v11438_v12 = vld [vmem:[%s13572_s18 + $0x240] ss:$16 sps:$4 sm:$0xff]   ;;  %v13962_v22 = vrot.slane %v2960_v17, %v13796_v5 }
 0x252   : > { %8350 = vmatpush1.bf16.msra.mxu1 %v11426_v57  ;;  %8310 = vmatprep.subr.bf16.mxu0 %v11431_v23  ;;  %v11507_v57 = vld [vmem:[%s13572_s18 + $0x1c0] ss:$16 sps:$4 sm:$0xff]  }
 0x253   : > { %8351 = vmatprep.subr.bf16.mxu1 %v11434_v24  ;;  %8340 = vmatprep.mubr.bf16.mxu0 %v13919_v47  ;;  %v11510_v23 = vld [vmem:[%s13572_s18 + $0x3c0] ss:$16 sps:$4 sm:$0xff]   ;;  %v11515_v24 = vld [vmem:[%s13572_s18 + $0x1e4] ss:$16 sps:$4 sm:$0xff]  }
 0x254   : > { %8381 = vmatprep.mubr.bf16.mxu1 %v13925_v50  ;;  %v11582_v17 = vld [vmem:[%s13572_s18 + $0x740] ss:$16 sps:$4 sm:$0xff]  }
 0x255   : > { %8311 = vmatpush1.bf16.msra.mxu0 %v11429_v25  ;;  %v11518_v25 = vld [vmem:[%s13572_s18 + $0x3e4] ss:$16 sps:$4 sm:$0xff]  }
 0x256   : > { %8352 = vmatpush1.bf16.msra.mxu1 %v11432_v26  ;;  %8312 = vmatprep.subr.bf16.mxu0 %v11437_v27  ;;  %v2976_v26 = vcombine.high %v13962_v22, %v13962_v22  ;;  %v13972_v27 = vrot.slane %v13910_v41, %v13796_v5  ;;  %v11536_v41 = vld [vmem:[%s13572_s18 + $0x644] ss:$16 sps:$4 sm:$0xff]  }
 0x257   : > { %8353 = vmatprep.subr.bf16.mxu1 %v11440_v28  ;;  %v11513_v28 = vld [vmem:[%s13572_s18 + $0x1e0] ss:$16 sps:$4 sm:$0xff]  }
 0x259   : > { %8313 = vmatpush1.bf16.msra.mxu0 %v11435_v29  ;;  %v11516_v29 = vld [vmem:[%s13572_s18 + $0x3e0] ss:$16 sps:$4 sm:$0xff]  }
 0x25a   : > { %8354 = vmatpush1.bf16.msra.mxu1 %v11438_v12  ;;  %8314 = vmatprep.subr.bf16.mxu0 %v11443_v15  ;;  %v11521_v12 = vld [vmem:[%s13572_s18 + $0x404] ss:$16 sps:$4 sm:$0xff]  }
 0x25b   : > { %8355 = vmatprep.subr.bf16.mxu1 %v11446_v30  ;;  %v11524_v15 = vld [vmem:[%s13572_s18 + $0x604] ss:$16 sps:$4 sm:$0xff]   ;;  %v13979_v30 = vrot.slane %v2976_v26, %v13796_v5 }
 0x25c   : > { %v11599_v26 = vld [vmem:[%s13572_s18 + $0x5a4] ss:$16 sps:$4 sm:$0xff]  }
 0x25d   : > { %8315 = vmatpush1.bf16.msra.mxu0 %v11441_v31  ;;  %v13983_v31 = vcombine.high %v13972_v27, %v13972_v27 }
 0x25e   : > { %8356 = vmatpush1.bf16.msra.mxu1 %v11444_v32  ;;  %8316 = vmatprep.subr.bf16.mxu0 %v11449_v33  ;;  %v11519_v32 = vld [vmem:[%s13572_s18 + $0x400] ss:$16 sps:$4 sm:$0xff]  }
 0x25f   : > { %8357 = vmatprep.subr.bf16.mxu1 %v11452_v35  ;;  %v11522_v33 = vld [vmem:[%s13572_s18 + $0x600] ss:$16 sps:$4 sm:$0xff]   ;;  %v11527_v35 = vld [vmem:[%s13572_s18 + $0x424] ss:$16 sps:$4 sm:$0xff]  }
 0x261   : > { %8317 = vmatpush1.bf16.msra.mxu0 %v11447_v36  ;;  %v11530_v36 = vld [vmem:[%s13572_s18 + $0x624] ss:$16 sps:$4 sm:$0xff]  }
 0x262   : > { %8358 = vmatpush1.bf16.msra.mxu1 %v11450_v37  ;;  %8318 = vmatprep.subr.bf16.mxu0 %v11455_v38  ;;  %v13991_v37 = vcombine.high %v13979_v30, %v13979_v30  ;;  %v11525_v38 = vld [vmem:[%s13572_s18 + $0x420] ss:$16 sps:$4 sm:$0xff]  }
 0x263   : > { %8359 = vmatprep.subr.bf16.mxu1 %v11458_v39  ;;  %v11528_v39 = vld [vmem:[%s13572_s18 + $0x620] ss:$16 sps:$4 sm:$0xff]  }
 0x265   : > { %8319 = vmatpush1.bf16.msra.mxu0 %v11453_v42  ;;  %v11531_v42 = vld [vmem:[%s13572_s18 + $0x440] ss:$16 sps:$4 sm:$0xff]  }
 0x266   : > { %8360 = vmatpush1.bf16.msra.mxu1 %v11456_v43  ;;  %8320 = vmatprep.subr.bf16.mxu0 %v11461_v45  ;;  %v11534_v43 = vld [vmem:[%s13572_s18 + $0x640] ss:$16 sps:$4 sm:$0xff]   ;;  %v11542_v45 = vld [vmem:[%s13572_s18 + $0x664] ss:$16 sps:$4 sm:$0xff]  }
 0x267   : > { %8361 = vmatprep.subr.bf16.mxu1 %v11464_v46  ;;  %v11537_v46 = vld [vmem:[%s13572_s18 + $0x460] ss:$16 sps:$4 sm:$0xff]  }
 0x269   : > { %8321 = vmatpush1.bf16.msra.mxu0 %v11459_v48  ;;  %v11540_v48 = vld [vmem:[%s13572_s18 + $0x660] ss:$16 sps:$4 sm:$0xff]  }
 0x26a   : > { %8362 = vmatpush1.bf16.msra.mxu1 %v11462_v49  ;;  %8322 = vmatprep.subr.bf16.mxu0 %v11467_v51  ;;  %v11545_v49 = vld [vmem:[%s13572_s18 + $0x484] ss:$16 sps:$4 sm:$0xff]  }
 0x26b   : > { %8363 = vmatprep.subr.bf16.mxu1 %v11470_v52  ;;  %v11548_v51 = vld [vmem:[%s13572_s18 + $0x684] ss:$16 sps:$4 sm:$0xff]   ;;  %v11543_v52 = vld [vmem:[%s13572_s18 + $0x480] ss:$16 sps:$4 sm:$0xff]  }
 0x26d   : > { %8323 = vmatpush1.bf16.msra.mxu0 %v11465_v53  ;;  %v11546_v53 = vld [vmem:[%s13572_s18 + $0x680] ss:$16 sps:$4 sm:$0xff]  }
 0x26e   : > { %8364 = vmatpush1.bf16.msra.mxu1 %v11468_v54  ;;  %8324 = vmatprep.subr.bf16.mxu0 %v11473_v55  ;;  %v11551_v54 = vld [vmem:[%s13572_s18 + $0x4a4] ss:$16 sps:$4 sm:$0xff]  }
 0x26f   : > { %8365 = vmatprep.subr.bf16.mxu1 %v11476_v56  ;;  %v11554_v55 = vld [vmem:[%s13572_s18 + $0x6a4] ss:$16 sps:$4 sm:$0xff]   ;;  %v11549_v56 = vld [vmem:[%s13572_s18 + $0x4a0] ss:$16 sps:$4 sm:$0xff]  }
 0x271   : > { %8325 = vmatpush1.bf16.msra.mxu0 %v11471_v58  ;;  %v11552_v58 = vld [vmem:[%s13572_s18 + $0x6a0] ss:$16 sps:$4 sm:$0xff]  }
 0x272   : > { %8366 = vmatpush1.bf16.msra.mxu1 %v11474_v34  ;;  %8326 = vmatprep.subr.bf16.mxu0 %v11479_v59  ;;  %v11557_v34 = vld [vmem:[%s13572_s18 + $0x4c4] ss:$16 sps:$4 sm:$0xff]  }
 0x273   : > { %8367 = vmatprep.subr.bf16.mxu1 %v11482_v60  ;;  %v11560_v59 = vld [vmem:[%s13572_s18 + $0x6c4] ss:$16 sps:$4 sm:$0xff]   ;;  %v11555_v60 = vld [vmem:[%s13572_s18 + $0x4c0] ss:$16 sps:$4 sm:$0xff]  }
 0x275   : > { %8327 = vmatpush1.bf16.msra.mxu0 %v11477_v62  ;;  %v11558_v62 = vld [vmem:[%s13572_s18 + $0x6c0] ss:$16 sps:$4 sm:$0xff]  }
 0x276   : > { %8368 = vmatpush1.bf16.msra.mxu1 %v11480_v63  ;;  %8328 = vmatprep.subr.bf16.mxu0 %v11485_v0  ;;  %v11563_v63 = vld [vmem:[%s13572_s18 + $0x4e4] ss:$16 sps:$4 sm:$0xff]  }
 0x277   : > { %8369 = vmatprep.subr.bf16.mxu1 %v11488_v1  ;;  %v11566_v0 = vld [vmem:[%s13572_s18 + $0x6e4] ss:$16 sps:$4 sm:$0xff]   ;;  %v11561_v1 = vld [vmem:[%s13572_s18 + $0x4e0] ss:$16 sps:$4 sm:$0xff]  }
 0x279   : > { %8329 = vmatpush1.bf16.msra.mxu0 %v11483_v2  ;;  %v11564_v2 = vld [vmem:[%s13572_s18 + $0x6e0] ss:$16 sps:$4 sm:$0xff]  }
 0x27a   : > { %8370 = vmatpush1.bf16.msra.mxu1 %v11486_v3  ;;  %8330 = vmatprep.subr.bf16.mxu0 %v11491_v6  ;;  %v11569_v3 = vld [vmem:[%s13572_s18 + $0x504] ss:$16 sps:$4 sm:$0xff]  }
 0x27b   : > { %8371 = vmatprep.subr.bf16.mxu1 %v11494_v7  ;;  %v11572_v6 = vld [vmem:[%s13572_s18 + $0x704] ss:$16 sps:$4 sm:$0xff]   ;;  %v11567_v7 = vld [vmem:[%s13572_s18 + $0x500] ss:$16 sps:$4 sm:$0xff]  }
 0x27d   : > { %8331 = vmatpush1.bf16.msra.mxu0 %v11489_v8  ;;  %v11570_v8 = vld [vmem:[%s13572_s18 + $0x700] ss:$16 sps:$4 sm:$0xff]  }
 0x27e   : > { %8372 = vmatpush1.bf16.msra.mxu1 %v11492_v9  ;;  %8332 = vmatprep.subr.bf16.mxu0 %v11497_v10  ;;  %v11575_v9 = vld [vmem:[%s13572_s18 + $0x524] ss:$16 sps:$4 sm:$0xff]  }
 0x27f   : > { %8373 = vmatprep.subr.bf16.mxu1 %v11500_v11  ;;  %v11578_v10 = vld [vmem:[%s13572_s18 + $0x724] ss:$16 sps:$4 sm:$0xff]   ;;  %v11573_v11 = vld [vmem:[%s13572_s18 + $0x520] ss:$16 sps:$4 sm:$0xff]  }
 0x281   : > { %8333 = vmatpush1.bf16.msra.mxu0 %v11495_v13  ;;  %v11576_v13 = vld [vmem:[%s13572_s18 + $0x720] ss:$16 sps:$4 sm:$0xff]  }
 0x282   : > { %8374 = vmatpush1.bf16.msra.mxu1 %v11498_v4  ;;  %8334 = vmatprep.subr.bf16.mxu0 %v11503_v14  ;;  %v11581_v4 = vld [vmem:[%s13572_s18 + $0x544] ss:$16 sps:$4 sm:$0xff]  }
 0x283   : > { %8375 = vmatprep.subr.bf16.mxu1 %v11506_v16  ;;  %v11584_v14 = vld [vmem:[%s13572_s18 + $0x744] ss:$16 sps:$4 sm:$0xff]   ;;  %v11579_v16 = vld [vmem:[%s13572_s18 + $0x540] ss:$16 sps:$4 sm:$0xff]  }
 0x285   : > { %8335 = vmatpush1.bf16.msra.mxu0 %v11501_v18  ;;  %v11587_v18 = vld [vmem:[%s13572_s18 + $0x564] ss:$16 sps:$4 sm:$0xff]  }
 0x286   : > { %8376 = vmatpush1.bf16.msra.mxu1 %v11504_v19  ;;  %8336 = vmatprep.subr.bf16.mxu0 %v11509_v20  ;;  %v11590_v19 = vld [vmem:[%s13572_s18 + $0x764] ss:$16 sps:$4 sm:$0xff]   ;;  %v11585_v20 = vld [vmem:[%s13572_s18 + $0x560] ss:$16 sps:$4 sm:$0xff]  }
 0x287   : > { %8377 = vmatprep.subr.bf16.mxu1 %v11512_v21  ;;  %v11588_v21 = vld [vmem:[%s13572_s18 + $0x760] ss:$16 sps:$4 sm:$0xff]  }
 0x289   : > { %8337 = vmatpush1.bf16.msra.mxu0 %v11507_v57  ;;  %v11593_v57 = vld [vmem:[%s13572_s18 + $0x584] ss:$16 sps:$4 sm:$0xff]  }
 0x28a   : > { %8378 = vmatpush1.bf16.msra.mxu1 %v11510_v23  ;;  %8338 = vmatprep.subr.bf16.mxu0 %v11515_v24  ;;  %v11596_v23 = vld [vmem:[%s13572_s18 + $0x784] ss:$16 sps:$4 sm:$0xff]   ;;  %v11591_v24 = vld [vmem:[%s13572_s18 + $0x580] ss:$16 sps:$4 sm:$0xff]  }
 0x28b   : > { %8379 = vmatprep.subr.bf16.mxu1 %v11518_v25  ;;  %v11594_v25 = vld [vmem:[%s13572_s18 + $0x780] ss:$16 sps:$4 sm:$0xff]  }
 0x28d   : > { %8339 = vmatpush1.bf16.msra.mxu0 %v11513_v28  ;;  %v11602_v28 = vld [vmem:[%s13572_s18 + $0x7a4] ss:$16 sps:$4 sm:$0xff]  }
 0x28e   : > { %8380 = vmatpush1.bf16.msra.mxu1 %v11516_v29  ;;  %8390 = vmatprep.subr.bf16.mxu0 %v11521_v12  ;;  %v11597_v29 = vld [vmem:[%s13572_s18 + $0x5a0] ss:$16 sps:$4 sm:$0xff]  }
 0x28f   : > { %8431 = vmatprep.subr.bf16.mxu1 %v11524_v15  ;;  %v14046_v12 = vld [vmem:[#allocation2 + $0x8] sm:$0xff] }
 0x290   : > { %8341 = vmatmul.mubr.bf16.vlgmr.msra.gmra.mrb[8].mxu0 %v13972_v27  ;;  %v11600_v15 = vld [vmem:[%s13572_s18 + $0x7a0] ss:$16 sps:$4 sm:$0xff]  }
 0x291   : > { %8382 = vmatmul.mubr.bf16.vlgmr.msra.gmra.mrb[8].mxu1 %v13983_v31  ;;  %8391 = vmatpush1.bf16.msra.mxu0 %v11519_v32  ;;  %v11605_v32 = vld [vmem:[%s13572_s18 + $0x5c4] ss:$16 sps:$4 sm:$0xff]  }
 0x292   : > { %8432 = vmatpush1.bf16.msra.mxu1 %v11522_v33  ;;  %8392 = vmatprep.subr.bf16.mxu0 %v11527_v35  ;;  %v11608_v33 = vld [vmem:[%s13572_s18 + $0x7c4] ss:$16 sps:$4 sm:$0xff]   ;;  %v14053_v35 = vrot.slane %v14046_v12, %v13796_v5 }
 0x293   : > { %8433 = vmatprep.subr.bf16.mxu1 %v11530_v36  ;;  %8422 = vmatprep.mubr.bf16.mxu0 %v13979_v30  ;;  %v11603_v36 = vld [vmem:[%s13572_s18 + $0x5c0] ss:$16 sps:$4 sm:$0xff]  }
 0x294   : > { %8463 = vmatprep.mubr.bf16.mxu1 %v13991_v37 }
 0x295   : > { %8393 = vmatpush1.bf16.msra.mxu0 %v11525_v38  ;;  %v11606_v38 = vld [vmem:[%s13572_s18 + $0x7c0] ss:$16 sps:$4 sm:$0xff]  }
 0x296   : > { %8434 = vmatpush1.bf16.msra.mxu1 %v11528_v39  ;;  %8394 = vmatprep.subr.bf16.mxu0 %v11533_v40  ;;  %v11611_v39 = vld [vmem:[%s13572_s18 + $0x5e4] ss:$16 sps:$4 sm:$0xff]  }
 0x297   : > { %8435 = vmatprep.subr.bf16.mxu1 %v11536_v41  ;;  %v11614_v40 = vld [vmem:[%s13572_s18 + $0x7e4] ss:$16 sps:$4 sm:$0xff]   ;;  %v3024_v41 = vcombine.high %v14053_v35, %v14053_v35 }
 0x299   : > { %8395 = vmatpush1.bf16.msra.mxu0 %v11531_v42  ;;  %v11609_v42 = vld [vmem:[%s13572_s18 + $0x5e0] ss:$16 sps:$4 sm:$0xff]  }
 0x29a   : > { %8436 = vmatpush1.bf16.msra.mxu1 %v11534_v43  ;;  %8396 = vmatprep.subr.bf16.mxu0 %v11539_v44  ;;  %v14064_v43 = vrot.slane %v13962_v22, %v13796_v5  ;;  %v11612_v44 = vld [vmem:[%s13572_s18 + $0x7e0] ss:$16 sps:$4 sm:$0xff]  }
 0x29b   : > { %8437 = vmatprep.subr.bf16.mxu1 %v11542_v45  ;;  %v11618_v45 = vld [vmem:[%s13572_s18 + $0x804] ss:$16 sps:$4 sm:$0xff]   ;;  %v11616_v22 = vld [vmem:[%s13572_s18 + $0x800] ss:$16 sps:$4 sm:$0xff]  }
 0x29d   : > { %8397 = vmatpush1.bf16.msra.mxu0 %v11537_v46  ;;  %v11621_v46 = vld [vmem:[%s13572_s18 + $0xa04] ss:$16 sps:$4 sm:$0xff]  }
 0x29e   : > { %8438 = vmatpush1.bf16.msra.mxu1 %v11540_v48  ;;  %8398 = vmatprep.subr.bf16.mxu0 %v11545_v49  ;;  %v14070_v48 = vrot.slane %v3024_v41, %v13796_v5  ;;  %v14074_v49 = vcombine.high %v14064_v43, %v14064_v43  ;;  %v11679_v41 = vld [vmem:[%s13572_s18 + $0xb40] ss:$16 sps:$4 sm:$0xff]  }
 0x29f   : > { %8439 = vmatprep.subr.bf16.mxu1 %v11548_v51  ;;  %v11619_v51 = vld [vmem:[%s13572_s18 + $0xa00] ss:$16 sps:$4 sm:$0xff]  }
 0x2a1   : > { %8399 = vmatpush1.bf16.msra.mxu0 %v11543_v52  ;;  %v11624_v52 = vld [vmem:[%s13572_s18 + $0x824] ss:$16 sps:$4 sm:$0xff]  }
 0x2a2   : > { %8440 = vmatpush1.bf16.msra.mxu1 %v11546_v53  ;;  %8400 = vmatprep.subr.bf16.mxu0 %v11551_v54  ;;  %v11627_v53 = vld [vmem:[%s13572_s18 + $0xa24] ss:$16 sps:$4 sm:$0xff]   ;;  %v14082_v54 = vcombine.high %v14070_v48, %v14070_v48 }
 0x2a3   : > { %8441 = vmatprep.subr.bf16.mxu1 %v11554_v55  ;;  %v11622_v55 = vld [vmem:[%s13572_s18 + $0x820] ss:$16 sps:$4 sm:$0xff]  }
 0x2a5   : > { %8401 = vmatpush1.bf16.msra.mxu0 %v11549_v56  ;;  %v11625_v56 = vld [vmem:[%s13572_s18 + $0xa20] ss:$16 sps:$4 sm:$0xff]  }
 0x2a6   : > { %8442 = vmatpush1.bf16.msra.mxu1 %v11552_v58  ;;  %8402 = vmatprep.subr.bf16.mxu0 %v11557_v34  ;;  %v11630_v58 = vld [vmem:[%s13572_s18 + $0x844] ss:$16 sps:$4 sm:$0xff]  }
 0x2a7   : > { %8443 = vmatprep.subr.bf16.mxu1 %v11560_v59  ;;  %v11633_v34 = vld [vmem:[%s13572_s18 + $0xa44] ss:$16 sps:$4 sm:$0xff]   ;;  %v11628_v59 = vld [vmem:[%s13572_s18 + $0x840] ss:$16 sps:$4 sm:$0xff]  }
 0x2a9   : > { %8403 = vmatpush1.bf16.msra.mxu0 %v11555_v60  ;;  %v11631_v60 = vld [vmem:[%s13572_s18 + $0xa40] ss:$16 sps:$4 sm:$0xff]  }
 0x2aa   : > { %8444 = vmatpush1.bf16.msra.mxu1 %v11558_v62  ;;  %8404 = vmatprep.subr.bf16.mxu0 %v11563_v63  ;;  %v11636_v62 = vld [vmem:[%s13572_s18 + $0x864] ss:$16 sps:$4 sm:$0xff]  }
 0x2ab   : > { %8445 = vmatprep.subr.bf16.mxu1 %v11566_v0  ;;  %v11639_v63 = vld [vmem:[%s13572_s18 + $0xa64] ss:$16 sps:$4 sm:$0xff]   ;;  %v11634_v0 = vld [vmem:[%s13572_s18 + $0x860] ss:$16 sps:$4 sm:$0xff]  }
 0x2ad   : > { %8405 = vmatpush1.bf16.msra.mxu0 %v11561_v1  ;;  %v11637_v1 = vld [vmem:[%s13572_s18 + $0xa60] ss:$16 sps:$4 sm:$0xff]  }
 0x2ae   : > { %8446 = vmatpush1.bf16.msra.mxu1 %v11564_v2  ;;  %8406 = vmatprep.subr.bf16.mxu0 %v11569_v3  ;;  %v11642_v2 = vld [vmem:[%s13572_s18 + $0x884] ss:$16 sps:$4 sm:$0xff]  }
 0x2af   : > { %8447 = vmatprep.subr.bf16.mxu1 %v11572_v6  ;;  %v11645_v3 = vld [vmem:[%s13572_s18 + $0xa84] ss:$16 sps:$4 sm:$0xff]   ;;  %v11640_v6 = vld [vmem:[%s13572_s18 + $0x880] ss:$16 sps:$4 sm:$0xff]  }
 0x2b1   : > { %8407 = vmatpush1.bf16.msra.mxu0 %v11567_v7  ;;  %v11643_v7 = vld [vmem:[%s13572_s18 + $0xa80] ss:$16 sps:$4 sm:$0xff]  }
 0x2b2   : > { %8448 = vmatpush1.bf16.msra.mxu1 %v11570_v8  ;;  %8408 = vmatprep.subr.bf16.mxu0 %v11575_v9  ;;  %v11648_v8 = vld [vmem:[%s13572_s18 + $0x8a4] ss:$16 sps:$4 sm:$0xff]  }
 0x2b3   : > { %8449 = vmatprep.subr.bf16.mxu1 %v11578_v10  ;;  %v11651_v9 = vld [vmem:[%s13572_s18 + $0xaa4] ss:$16 sps:$4 sm:$0xff]   ;;  %v11646_v10 = vld [vmem:[%s13572_s18 + $0x8a0] ss:$16 sps:$4 sm:$0xff]  }
 0x2b5   : > { %8409 = vmatpush1.bf16.msra.mxu0 %v11573_v11  ;;  %v11649_v11 = vld [vmem:[%s13572_s18 + $0xaa0] ss:$16 sps:$4 sm:$0xff]  }
 0x2b6   : > { %8450 = vmatpush1.bf16.msra.mxu1 %v11576_v13  ;;  %8410 = vmatprep.subr.bf16.mxu0 %v11581_v4  ;;  %v11654_v13 = vld [vmem:[%s13572_s18 + $0x8c4] ss:$16 sps:$4 sm:$0xff]  }
 0x2b7   : > { %8451 = vmatprep.subr.bf16.mxu1 %v11584_v14  ;;  %v11657_v4 = vld [vmem:[%s13572_s18 + $0xac4] ss:$16 sps:$4 sm:$0xff]  }
 0x2b9   : > { %8411 = vmatpush1.bf16.msra.mxu0 %v11579_v16 }
 0x2ba   : > { %8452 = vmatpush1.bf16.msra.mxu1 %v11582_v17  ;;  %8412 = vmatprep.subr.bf16.mxu0 %v11587_v18  ;;  %v11652_v17 = vld [vmem:[%s13572_s18 + $0x8c0] ss:$16 sps:$4 sm:$0xff]  }
 0x2bb   : > { %8453 = vmatprep.subr.bf16.mxu1 %v11590_v19  ;;  %v11655_v19 = vld [vmem:[%s13572_s18 + $0xac0] ss:$16 sps:$4 sm:$0xff]  }
 0x2bd   : > { %8413 = vmatpush1.bf16.msra.mxu0 %v11585_v20  ;;  %v11660_v20 = vld [vmem:[%s13572_s18 + $0x8e4] ss:$16 sps:$4 sm:$0xff]  }
 0x2be   : > { %8454 = vmatpush1.bf16.msra.mxu1 %v11588_v21  ;;  %8414 = vmatprep.subr.bf16.mxu0 %v11593_v57  ;;  %v11663_v57 = vld [vmem:[%s13572_s18 + $0xae4] ss:$16 sps:$4 sm:$0xff]  }
 0x2bf   : > { %8455 = vmatprep.subr.bf16.mxu1 %v11596_v23  ;;  %v11658_v23 = vld [vmem:[%s13572_s18 + $0x8e0] ss:$16 sps:$4 sm:$0xff]  }
 0x2c1   : > { %8415 = vmatpush1.bf16.msra.mxu0 %v11591_v24  ;;  %v11661_v24 = vld [vmem:[%s13572_s18 + $0xae0] ss:$16 sps:$4 sm:$0xff]  }
 0x2c2   : > { %8456 = vmatpush1.bf16.msra.mxu1 %v11594_v25  ;;  %8416 = vmatprep.subr.bf16.mxu0 %v11599_v26  ;;  %v11666_v25 = vld [vmem:[%s13572_s18 + $0x904] ss:$16 sps:$4 sm:$0xff]  }
 0x2c3   : > { %8457 = vmatprep.subr.bf16.mxu1 %v11602_v28  ;;  %v11669_v26 = vld [vmem:[%s13572_s18 + $0xb04] ss:$16 sps:$4 sm:$0xff]   ;;  %v11664_v28 = vld [vmem:[%s13572_s18 + $0x900] ss:$16 sps:$4 sm:$0xff]  }
 0x2c5   : > { %8417 = vmatpush1.bf16.msra.mxu0 %v11597_v29  ;;  %v11667_v29 = vld [vmem:[%s13572_s18 + $0xb00] ss:$16 sps:$4 sm:$0xff]  }
 0x2c6   : > { %8458 = vmatpush1.bf16.msra.mxu1 %v11600_v15  ;;  %8418 = vmatprep.subr.bf16.mxu0 %v11605_v32  ;;  %v11672_v15 = vld [vmem:[%s13572_s18 + $0x924] ss:$16 sps:$4 sm:$0xff]  }
 0x2c7   : > { %8459 = vmatprep.subr.bf16.mxu1 %v11608_v33  ;;  %v11675_v32 = vld [vmem:[%s13572_s18 + $0xb24] ss:$16 sps:$4 sm:$0xff]   ;;  %v11670_v33 = vld [vmem:[%s13572_s18 + $0x920] ss:$16 sps:$4 sm:$0xff]  }
 0x2c9   : > { %8419 = vmatpush1.bf16.msra.mxu0 %v11603_v36  ;;  %v11673_v36 = vld [vmem:[%s13572_s18 + $0xb20] ss:$16 sps:$4 sm:$0xff]  }
 0x2ca   : > { %8460 = vmatpush1.bf16.msra.mxu1 %v11606_v38  ;;  %8420 = vmatprep.subr.bf16.mxu0 %v11611_v39  ;;  %v11678_v38 = vld [vmem:[%s13572_s18 + $0x944] ss:$16 sps:$4 sm:$0xff]  }
 0x2cb   : > { %8461 = vmatprep.subr.bf16.mxu1 %v11614_v40  ;;  %v11681_v39 = vld [vmem:[%s13572_s18 + $0xb44] ss:$16 sps:$4 sm:$0xff]   ;;  %v11676_v40 = vld [vmem:[%s13572_s18 + $0x940] ss:$16 sps:$4 sm:$0xff]  }
 0x2cd   : > { %8421 = vmatpush1.bf16.msra.mxu0 %v11609_v42  ;;  %v11684_v42 = vld [vmem:[%s13572_s18 + $0x964] ss:$16 sps:$4 sm:$0xff]  }
 0x2ce   : > { %8462 = vmatpush1.bf16.msra.mxu1 %v11612_v44  ;;  %8472 = vmatprep.subr.bf16.mxu0 %v11618_v45  ;;  %v11687_v44 = vld [vmem:[%s13572_s18 + $0xb64] ss:$16 sps:$4 sm:$0xff]   ;;  %v11682_v45 = vld [vmem:[%s13572_s18 + $0x960] ss:$16 sps:$4 sm:$0xff]  }
 0x2cf   : > { %8513 = vmatprep.subr.bf16.mxu1 %v11621_v46  ;;  %v11685_v46 = vld [vmem:[%s13572_s18 + $0xb60] ss:$16 sps:$4 sm:$0xff]  }
 0x2d0   : > { %8423 = vmatmul.mubr.bf16.vlgmr.msra.gmra.mrb[12].mxu0 %v14064_v43 }
 0x2d1   : > { %8464 = vmatmul.mubr.bf16.vlgmr.msra.gmra.mrb[12].mxu1 %v14074_v49  ;;  %8473 = vmatpush1.bf16.msra.mxu0 %v11616_v22  ;;  %v11690_v22 = vld [vmem:[%s13572_s18 + $0x984] ss:$16 sps:$4 sm:$0xff]  }
 0x2d2   : > { %8514 = vmatpush1.bf16.msra.mxu1 %v11619_v51  ;;  %8474 = vmatprep.subr.bf16.mxu0 %v11624_v52  ;;  %v11693_v51 = vld [vmem:[%s13572_s18 + $0xb84] ss:$16 sps:$4 sm:$0xff]   ;;  %v11688_v52 = vld [vmem:[%s13572_s18 + $0x980] ss:$16 sps:$4 sm:$0xff]  }
 0x2d3   : > { %8515 = vmatprep.subr.bf16.mxu1 %v11627_v53  ;;  %8504 = vmatprep.mubr.bf16.mxu0 %v14070_v48  ;;  %v11691_v53 = vld [vmem:[%s13572_s18 + $0xb80] ss:$16 sps:$4 sm:$0xff]  }
 0x2d4   : > { %8545 = vmatprep.mubr.bf16.mxu1 %v14082_v54 }
 0x2d5   : > { %8475 = vmatpush1.bf16.msra.mxu0 %v11622_v55  ;;  %v11696_v55 = vld [vmem:[%s13572_s18 + $0x9a4] ss:$16 sps:$4 sm:$0xff]  }
 0x2d6   : > { %8516 = vmatpush1.bf16.msra.mxu1 %v11625_v56  ;;  %8476 = vmatprep.subr.bf16.mxu0 %v11630_v58  ;;  %v11699_v56 = vld [vmem:[%s13572_s18 + $0xba4] ss:$16 sps:$4 sm:$0xff]   ;;  %v3009_v58 = vcombine.high %v14046_v12, %v14046_v12  ;;  %v11703_v12 = vld [vmem:[%s13572_s18 + $0xbc0] ss:$16 sps:$4 sm:$0xff]  }
 0x2d7   : > { %8517 = vmatprep.subr.bf16.mxu1 %v11633_v34  ;;  %v11694_v34 = vld [vmem:[%s13572_s18 + $0x9a0] ss:$16 sps:$4 sm:$0xff]  }
 0x2d9   : > { %8477 = vmatpush1.bf16.msra.mxu0 %v11628_v59  ;;  %v11697_v59 = vld [vmem:[%s13572_s18 + $0xba0] ss:$16 sps:$4 sm:$0xff]  }
 0x2da   : > { %8518 = vmatpush1.bf16.msra.mxu1 %v11631_v60  ;;  %8478 = vmatprep.subr.bf16.mxu0 %v11636_v62  ;;  %v11702_v60 = vld [vmem:[%s13572_s18 + $0x9c4] ss:$16 sps:$4 sm:$0xff]  }
 0x2db   : > { %8519 = vmatprep.subr.bf16.mxu1 %v11639_v63  ;;  %v11705_v62 = vld [vmem:[%s13572_s18 + $0xbc4] ss:$16 sps:$4 sm:$0xff]   ;;  %v14147_v63 = vrot.slane %v3009_v58, %v13796_v5  ;;  %v11751_v58 = vld [vmem:[%s13572_s18 + $0xec0] ss:$16 sps:$4 sm:$0xff]  }
 0x2dd   : > { %8479 = vmatpush1.bf16.msra.mxu0 %v11634_v0  ;;  %v11700_v0 = vld [vmem:[%s13572_s18 + $0x9c0] ss:$16 sps:$4 sm:$0xff]  }
 0x2de   : > { %8520 = vmatpush1.bf16.msra.mxu1 %v11637_v1  ;;  %8480 = vmatprep.subr.bf16.mxu0 %v11642_v2  ;;  %v11708_v1 = vld [vmem:[%s13572_s18 + $0x9e4] ss:$16 sps:$4 sm:$0xff]  }
 0x2df   : > { %8521 = vmatprep.subr.bf16.mxu1 %v11645_v3  ;;  %v11711_v2 = vld [vmem:[%s13572_s18 + $0xbe4] ss:$16 sps:$4 sm:$0xff]   ;;  %v3025_v3 = vcombine.high %v14147_v63, %v14147_v63 }
 0x2e1   : > { %8481 = vmatpush1.bf16.msra.mxu0 %v11640_v6  ;;  %v14157_v6 = vrot.slane %v14053_v35, %v13796_v5 }
 0x2e2   : > { %8522 = vmatpush1.bf16.msra.mxu1 %v11643_v7  ;;  %8482 = vmatprep.subr.bf16.mxu0 %v11648_v8  ;;  %v11706_v7 = vld [vmem:[%s13572_s18 + $0x9e0] ss:$16 sps:$4 sm:$0xff]  }
 0x2e3   : > { %8523 = vmatprep.subr.bf16.mxu1 %v11651_v9  ;;  %v11709_v8 = vld [vmem:[%s13572_s18 + $0xbe0] ss:$16 sps:$4 sm:$0xff]   ;;  %v11714_v9 = vld [vmem:[%s13572_s18 + $0xc04] ss:$16 sps:$4 sm:$0xff]   ;;  %v14170_v35 = vcombine.high %v14157_v6, %v14157_v6 }
 0x2e4   : > { %v14108_v14 = vpop.f32.mrb[0].mxu1 }
 0x2e5   : > { %v14110_v16 = vpop.f32.mrb[1].mxu1  ;;  %8483 = vmatpush1.bf16.msra.mxu0 %v11646_v10  ;;  %v11717_v10 = vld [vmem:[%s13572_s18 + $0xe04] ss:$16 sps:$4 sm:$0xff]  }
 0x2e6   : > { %v2871_v18 = vpop.f32.mrb[2].mxu1  ;;  %8524 = vmatpush1.bf16.msra.mxu1 %v11649_v11  ;;  %8484 = vmatprep.subr.bf16.mxu0 %v11654_v13  ;;  %v11712_v11 = vld [vmem:[%s13572_s18 + $0xc00] ss:$16 sps:$4 sm:$0xff]  }
 0x2e7   : > { %v2872_v21 = vpop.f32.mrb[3].mxu1  ;;  %8525 = vmatprep.subr.bf16.mxu1 %v11657_v4  ;;  %v11715_v13 = vld [vmem:[%s13572_s18 + $0xe00] ss:$16 sps:$4 sm:$0xff]   ;;  %v14166_v4 = vrot.slane %v3025_v3, %v13796_v5  ;;  %v11723_v18 = vld [vmem:[%s13572_s18 + $0xe24] ss:$16 sps:$4 sm:$0xff]  }
 0x2e8   : > { %v11721_v21 = vld [vmem:[%s13572_s18 + $0xe20] ss:$16 sps:$4 sm:$0xff]   ;;  %v11756_v3 = vld [vmem:[%s13572_s18 + $0xce4] ss:$16 sps:$4 sm:$0xff]  }
 0x2e9   : > { %8485 = vmatpush1.bf16.msra.mxu0 %v11652_v17  ;;  %v11720_v17 = vld [vmem:[%s13572_s18 + $0xc24] ss:$16 sps:$4 sm:$0xff]  }
 0x2ea   : > { %8526 = vmatpush1.bf16.msra.mxu1 %v11655_v19  ;;  %8486 = vmatprep.subr.bf16.mxu0 %v11660_v20  ;;  %v14176_v19 = vcombine.high %v14166_v4, %v14166_v4  ;;  %v11718_v20 = vld [vmem:[%s13572_s18 + $0xc20] ss:$16 sps:$4 sm:$0xff]  }
 0x2eb   : > { %8527 = vmatprep.subr.bf16.mxu1 %v11663_v57  ;;  %v11726_v57 = vld [vmem:[%s13572_s18 + $0xc44] ss:$16 sps:$4 sm:$0xff]  }
 0x2ed   : > { %8487 = vmatpush1.bf16.msra.mxu0 %v11658_v23  ;;  %v11729_v23 = vld [vmem:[%s13572_s18 + $0xe44] ss:$16 sps:$4 sm:$0xff]  }
 0x2ee   : > { %8528 = vmatpush1.bf16.msra.mxu1 %v11661_v24  ;;  %8488 = vmatprep.subr.bf16.mxu0 %v11666_v25  ;;  %v11724_v24 = vld [vmem:[%s13572_s18 + $0xc40] ss:$16 sps:$4 sm:$0xff]  }
 0x2ef   : > { %8529 = vmatprep.subr.bf16.mxu1 %v11669_v26  ;;  %v11727_v25 = vld [vmem:[%s13572_s18 + $0xe40] ss:$16 sps:$4 sm:$0xff]   ;;  %v11732_v26 = vld [vmem:[%s13572_s18 + $0xc64] ss:$16 sps:$4 sm:$0xff]  }
 0x2f1   : > { %8489 = vmatpush1.bf16.msra.mxu0 %v11664_v28  ;;  %v11735_v28 = vld [vmem:[%s13572_s18 + $0xe64] ss:$16 sps:$4 sm:$0xff]  }
 0x2f2   : > { %8530 = vmatpush1.bf16.msra.mxu1 %v11667_v29  ;;  %8490 = vmatprep.subr.bf16.mxu0 %v11672_v15 }
 0x2f3   : > { %8531 = vmatprep.subr.bf16.mxu1 %v11675_v32 }
 0x2f5   : > { %8491 = vmatpush1.bf16.msra.mxu0 %v11670_v33 }
 0x2f6   : > { %8532 = vmatpush1.bf16.msra.mxu1 %v11673_v36  ;;  %8492 = vmatprep.subr.bf16.mxu0 %v11678_v38  ;;  %v11730_v38 = vld [vmem:[%s13572_s18 + $0xc60] ss:$16 sps:$4 sm:$0xff]  }
 0x2f7   : > { %8533 = vmatprep.subr.bf16.mxu1 %v11681_v39  ;;  %v11733_v39 = vld [vmem:[%s13572_s18 + $0xe60] ss:$16 sps:$4 sm:$0xff]  }
 0x2f9   : > { %8493 = vmatpush1.bf16.msra.mxu0 %v11676_v40 }
 0x2fa   : > { %8534 = vmatpush1.bf16.msra.mxu1 %v11679_v41  ;;  %8494 = vmatprep.subr.bf16.mxu0 %v11684_v42  ;;  %v11738_v41 = vld [vmem:[%s13572_s18 + $0xc84] ss:$16 sps:$4 sm:$0xff]   ;;  %v11739_v42 = vld [vmem:[%s13572_s18 + $0xe80] ss:$16 sps:$4 sm:$0xff]  }
 0x2fb   : > { %8535 = vmatprep.subr.bf16.mxu1 %v11687_v44  ;;  %v11744_v44 = vld [vmem:[%s13572_s18 + $0xca4] ss:$16 sps:$4 sm:$0xff]  }
 0x2fd   : > { %8495 = vmatpush1.bf16.msra.mxu0 %v11682_v45  ;;  %v11747_v45 = vld [vmem:[%s13572_s18 + $0xea4] ss:$16 sps:$4 sm:$0xff]  }
 0x2fe   : > { %8536 = vmatpush1.bf16.msra.mxu1 %v11685_v46  ;;  %8496 = vmatprep.subr.bf16.mxu0 %v11690_v22  ;;  %v11742_v46 = vld [vmem:[%s13572_s18 + $0xca0] ss:$16 sps:$4 sm:$0xff]  }
 0x2ff   : > { %8537 = vmatprep.subr.bf16.mxu1 %v11693_v51  ;;  %v11745_v22 = vld [vmem:[%s13572_s18 + $0xea0] ss:$16 sps:$4 sm:$0xff]   ;;  %v11750_v51 = vld [vmem:[%s13572_s18 + $0xcc4] ss:$16 sps:$4 sm:$0xff]  }
 0x301   : > { %8497 = vmatpush1.bf16.msra.mxu0 %v11688_v52  ;;  %v11753_v52 = vld [vmem:[%s13572_s18 + $0xec4] ss:$16 sps:$4 sm:$0xff]  }
 0x302   : > { %8538 = vmatpush1.bf16.msra.mxu1 %v11691_v53  ;;  %8498 = vmatprep.subr.bf16.mxu0 %v11696_v55 }
 0x303   : > { %8539 = vmatprep.subr.bf16.mxu1 %v11699_v56  ;;  %v11748_v56 = vld [vmem:[%s13572_s18 + $0xcc0] ss:$16 sps:$4 sm:$0xff]  }
 0x305   : > { %8499 = vmatpush1.bf16.msra.mxu0 %v11694_v34 }
 0x306   : > { %8540 = vmatpush1.bf16.msra.mxu1 %v11697_v59  ;;  %8500 = vmatprep.subr.bf16.mxu0 %v11702_v60 }
 0x307   : > { %8541 = vmatprep.subr.bf16.mxu1 %v11705_v62 }
 0x309   : > { %8501 = vmatpush1.bf16.msra.mxu0 %v11700_v0 }
 0x30a   : > { %8542 = vmatpush1.bf16.msra.mxu1 %v11703_v12  ;;  %8502 = vmatprep.subr.bf16.mxu0 %v11708_v1 }
 0x30b   : > { %8543 = vmatprep.subr.bf16.mxu1 %v11711_v2 }
 0x30d   : > { %8503 = vmatpush1.bf16.msra.mxu0 %v11706_v7  ;;  %v11759_v7 = vld [vmem:[%s13572_s18 + $0xee4] ss:$16 sps:$4 sm:$0xff]  }
 0x30e   : > { %8544 = vmatpush1.bf16.msra.mxu1 %v11709_v8  ;;  %8554 = vmatprep.subr.bf16.mxu0 %v11714_v9  ;;  %v11754_v8 = vld [vmem:[%s13572_s18 + $0xce0] ss:$16 sps:$4 sm:$0xff]  }
 0x30f   : > { %8595 = vmatprep.subr.bf16.mxu1 %v11717_v10  ;;  %v11757_v9 = vld [vmem:[%s13572_s18 + $0xee0] ss:$16 sps:$4 sm:$0xff]   ;;  %v11762_v10 = vld [vmem:[%s13572_s18 + $0xd04] ss:$16 sps:$4 sm:$0xff]  }
 0x310   : > { %8505 = vmatmul.mubr.bf16.vlgmr.msra.gmra.mrb[16].mxu0 %v14157_v6 }
 0x311   : > { %8546 = vmatmul.mubr.bf16.vlgmr.msra.gmra.mrb[16].mxu1 %v14170_v35  ;;  %8555 = vmatpush1.bf16.msra.mxu0 %v11712_v11  ;;  %v11765_v11 = vld [vmem:[%s13572_s18 + $0xf04] ss:$16 sps:$4 sm:$0xff]  }
 0x312   : > { %8596 = vmatpush1.bf16.msra.mxu1 %v11715_v13  ;;  %8556 = vmatprep.subr.bf16.mxu0 %v11720_v17  ;;  %v11760_v13 = vld [vmem:[%s13572_s18 + $0xd00] ss:$16 sps:$4 sm:$0xff]  }
 0x313   : > { %8597 = vmatprep.subr.bf16.mxu1 %v11723_v18  ;;  %8586 = vmatprep.mubr.bf16.mxu0 %v14166_v4  ;;  %v11763_v17 = vld [vmem:[%s13572_s18 + $0xf00] ss:$16 sps:$4 sm:$0xff]   ;;  %v11768_v18 = vld [vmem:[%s13572_s18 + $0xd24] ss:$16 sps:$4 sm:$0xff]  }
 0x314   : > { %8627 = vmatprep.mubr.bf16.mxu1 %v14176_v19 }
 0x315   : > { %8557 = vmatpush1.bf16.msra.mxu0 %v11718_v20  ;;  %v11771_v20 = vld [vmem:[%s13572_s18 + $0xf24] ss:$16 sps:$4 sm:$0xff]  }
 0x316   : > { %8598 = vmatpush1.bf16.msra.mxu1 %v11721_v21  ;;  %8558 = vmatprep.subr.bf16.mxu0 %v11726_v57  ;;  %v11766_v21 = vld [vmem:[%s13572_s18 + $0xd20] ss:$16 sps:$4 sm:$0xff]  }
 0x317   : > { %8599 = vmatprep.subr.bf16.mxu1 %v11729_v23  ;;  %v2826_v29 = vpop.f32.mrb[0].mxu0  ;;  %v11769_v57 = vld [vmem:[%s13572_s18 + $0xf20] ss:$16 sps:$4 sm:$0xff]   ;;  %v11774_v23 = vld [vmem:[%s13572_s18 + $0xd44] ss:$16 sps:$4 sm:$0xff]  }
 0x318   : > { %v14191_v15 = vadd.f32 %v14108_v14, %v2826_v29  ;;  %v2828_v32 = vpop.f32.mrb[1].mxu0  ;;  %v11741_v14 = vld [vmem:[%s13572_s18 + $0xe84] ss:$16 sps:$4 sm:$0xff]  }
 0x319   : > { %v14194_v33 = vadd.f32 %v14110_v16, %v2828_v32  ;;  %v2830_v36 = vpop.f32.mrb[2].mxu0  ;;  %8559 = vmatpush1.bf16.msra.mxu0 %v11724_v24  ;;  %v11736_v16 = vld [vmem:[%s13572_s18 + $0xc80] ss:$16 sps:$4 sm:$0xff]   ;;  %v11777_v24 = vld [vmem:[%s13572_s18 + $0xf44] ss:$16 sps:$4 sm:$0xff]  }
 0x31a   : > { %8600 = vmatpush1.bf16.msra.mxu1 %v11727_v25  ;;  %v2831_v40 = vpop.f32.mrb[3].mxu0  ;;  %8560 = vmatprep.subr.bf16.mxu0 %v11732_v26  ;;  %v11772_v25 = vld [vmem:[%s13572_s18 + $0xd40] ss:$16 sps:$4 sm:$0xff]   ;;  %v11783_v29 = vld [vmem:[%s13572_s18 + $0xf64] ss:$16 sps:$4 sm:$0xff]  }
 0x31b   : > { %8601 = vmatprep.subr.bf16.mxu1 %v11735_v28  ;;  %v11775_v26 = vld [vmem:[%s13572_s18 + $0xf40] ss:$16 sps:$4 sm:$0xff]   ;;  %v11780_v28 = vld [vmem:[%s13572_s18 + $0xd64] ss:$16 sps:$4 sm:$0xff]  }
 0x31c   : > { %v11778_v32 = vld [vmem:[%s13572_s18 + $0xd60] ss:$16 sps:$4 sm:$0xff]  }
 0x31d   : > { %8561 = vmatpush1.bf16.msra.mxu0 %v11730_v38  ;;  %v11781_v36 = vld [vmem:[%s13572_s18 + $0xf60] ss:$16 sps:$4 sm:$0xff]   ;;  %v11786_v38 = vld [vmem:[%s13572_s18 + $0xd84] ss:$16 sps:$4 sm:$0xff]  }
 0x31e   : > { %8602 = vmatpush1.bf16.msra.mxu1 %v11733_v39  ;;  %8562 = vmatprep.subr.bf16.mxu0 %v11738_v41  ;;  %v11789_v39 = vld [vmem:[%s13572_s18 + $0xf84] ss:$16 sps:$4 sm:$0xff]   ;;  %v11784_v40 = vld [vmem:[%s13572_s18 + $0xd80] ss:$16 sps:$4 sm:$0xff]  }
 0x31f   : > { %8603 = vmatprep.subr.bf16.mxu1 %v11741_v14  ;;  %v11787_v41 = vld [vmem:[%s13572_s18 + $0xf80] ss:$16 sps:$4 sm:$0xff]   ;;  %v11792_v14 = vld [vmem:[%s13572_s18 + $0xda4] ss:$16 sps:$4 sm:$0xff]  }
 0x321   : > { %8563 = vmatpush1.bf16.msra.mxu0 %v11736_v16  ;;  %v11795_v16 = vld [vmem:[%s13572_s18 + $0xfa4] ss:$16 sps:$4 sm:$0xff]  }
 0x322   : > { %8604 = vmatpush1.bf16.msra.mxu1 %v11739_v42  ;;  %8564 = vmatprep.subr.bf16.mxu0 %v11744_v44  ;;  %v14240_v42 = vld [vmem:[#allocation2 + $0x10] sm:$0xff] }
 0x323   : > { %8605 = vmatprep.subr.bf16.mxu1 %v11747_v45  ;;  %v2949_v55 = vpop.f32.mrb[4].mxu0  ;;  %v11790_v44 = vld [vmem:[%s13572_s18 + $0xda0] ss:$16 sps:$4 sm:$0xff]  }
 0x324   : > { %v2908_v53 = vpop.f32.mrb[4].mxu1  ;;  %v2951_v60 = vpop.f32.mrb[5].mxu0  ;;  %v11793_v45 = vld [vmem:[%s13572_s18 + $0xfa0] ss:$16 sps:$4 sm:$0xff]  }
 0x325   : > { %v14210_v34 = vadd.f32 %v2949_v55, %v2908_v53  ;;  %v2910_v59 = vpop.f32.mrb[5].mxu1  ;;  %v2953_v12 = vpop.f32.mrb[6].mxu0  ;;  %8565 = vmatpush1.bf16.msra.mxu0 %v11742_v46  ;;  %v11798_v46 = vld [vmem:[%s13572_s18 + $0xdc4] ss:$16 sps:$4 sm:$0xff]   ;;  %v11799_v53 = vld [vmem:[%s13572_s18 + $0xfc0] ss:$16 sps:$4 sm:$0xff]  }
 0x326   : > { %v14212_v62 = vadd.f32 %v2951_v60, %v2910_v59  ;;  %v2912_v0 = vpop.f32.mrb[6].mxu1  ;;  %8606 = vmatpush1.bf16.msra.mxu1 %v11745_v22  ;;  %v2954_v2 = vpop.f32.mrb[7].mxu0  ;;  %8566 = vmatprep.subr.bf16.mxu0 %v11750_v51  ;;  %v11801_v22 = vld [vmem:[%s13572_s18 + $0xfc4] ss:$16 sps:$4 sm:$0xff]   ;;  %v14248_v51 = vrot.slane %v14240_v42, %v13796_v5  ;;  %v14258_v59 = vrot.slane %v14147_v63, %v13796_v5  ;;  %v11802_v60 = vld [vmem:[%s13572_s18 + $0xde0] ss:$16 sps:$4 sm:$0xff]  }
 0x327   : > { %v2913_v1 = vpop.f32.mrb[7].mxu1  ;;  %8607 = vmatprep.subr.bf16.mxu1 %v11753_v52  ;;  %v11796_v52 = vld [vmem:[%s13572_s18 + $0xdc0] ss:$16 sps:$4 sm:$0xff]   ;;  %v11804_v55 = vld [vmem:[%s13572_s18 + $0xde4] ss:$16 sps:$4 sm:$0xff]  }
 0x328   : > { %v11805_v0 = vld [vmem:[%s13572_s18 + $0xfe0] ss:$16 sps:$4 sm:$0xff]   ;;  %v11811_v12 = vld [vmem:[%s13572_s18 + $0x1004] ss:$16 sps:$4 sm:$0xff]   ;;  %v14271_v63 = vcombine.high %v14258_v59, %v14258_v59 }
 0x329   : > { %8567 = vmatpush1.bf16.msra.mxu0 %v11748_v56  ;;  %v11807_v56 = vld [vmem:[%s13572_s18 + $0xfe4] ss:$16 sps:$4 sm:$0xff]   ;;  %v11809_v2 = vld [vmem:[%s13572_s18 + $0x1000] ss:$16 sps:$4 sm:$0xff]  }
 0x32a   : > { %8608 = vmatpush1.bf16.msra.mxu1 %v11751_v58  ;;  %8568 = vmatprep.subr.bf16.mxu0 %v11756_v3  ;;  %v3073_v58 = vcombine.high %v14248_v51, %v14248_v51  ;;  %v11814_v1 = vld [vmem:[%s13572_s18 + $0x1204] ss:$16 sps:$4 sm:$0xff]   ;;  %v11812_v3 = vld [vmem:[%s13572_s18 + $0x1200] ss:$16 sps:$4 sm:$0xff]  }
 0x32b   : > { %8609 = vmatprep.subr.bf16.mxu1 %v11759_v7 }
 0x32c   : > { %v14267_v7 = vrot.slane %v3073_v58, %v13796_v5 }
 0x32d   : > { %8569 = vmatpush1.bf16.msra.mxu0 %v11754_v8  ;;  %v11817_v8 = vld [vmem:[%s13572_s18 + $0x1024] ss:$16 sps:$4 sm:$0xff]  }
 0x32e   : > { %8610 = vmatpush1.bf16.msra.mxu1 %v11757_v9  ;;  %8570 = vmatprep.subr.bf16.mxu0 %v11762_v10  ;;  %v11820_v9 = vld [vmem:[%s13572_s18 + $0x1224] ss:$16 sps:$4 sm:$0xff]   ;;  %v14277_v10 = vcombine.high %v14267_v7, %v14267_v7 }
 0x32f   : > { %8611 = vmatprep.subr.bf16.mxu1 %v11765_v11  ;;  %v11815_v11 = vld [vmem:[%s13572_s18 + $0x1020] ss:$16 sps:$4 sm:$0xff]  }
 0x331   : > { %8571 = vmatpush1.bf16.msra.mxu0 %v11760_v13  ;;  %v11818_v13 = vld [vmem:[%s13572_s18 + $0x1220] ss:$16 sps:$4 sm:$0xff]  }
 0x332   : > { %8612 = vmatpush1.bf16.msra.mxu1 %v11763_v17  ;;  %8572 = vmatprep.subr.bf16.mxu0 %v11768_v18  ;;  %v11823_v17 = vld [vmem:[%s13572_s18 + $0x1044] ss:$16 sps:$4 sm:$0xff]  }
 0x333   : > { %8613 = vmatprep.subr.bf16.mxu1 %v11771_v20  ;;  %v11826_v18 = vld [vmem:[%s13572_s18 + $0x1244] ss:$16 sps:$4 sm:$0xff]   ;;  %v11821_v20 = vld [vmem:[%s13572_s18 + $0x1040] ss:$16 sps:$4 sm:$0xff]  }
 0x335   : > { %8573 = vmatpush1.bf16.msra.mxu0 %v11766_v21  ;;  %v11824_v21 = vld [vmem:[%s13572_s18 + $0x1240] ss:$16 sps:$4 sm:$0xff]  }
 0x336   : > { %8614 = vmatpush1.bf16.msra.mxu1 %v11769_v57  ;;  %8574 = vmatprep.subr.bf16.mxu0 %v11774_v23  ;;  %v11829_v57 = vld [vmem:[%s13572_s18 + $0x1064] ss:$16 sps:$4 sm:$0xff]  }
 0x337   : > { %8615 = vmatprep.subr.bf16.mxu1 %v11777_v24  ;;  %v11832_v23 = vld [vmem:[%s13572_s18 + $0x1264] ss:$16 sps:$4 sm:$0xff]   ;;  %v11827_v24 = vld [vmem:[%s13572_s18 + $0x1060] ss:$16 sps:$4 sm:$0xff]  }
 0x339   : > { %8575 = vmatpush1.bf16.msra.mxu0 %v11772_v25  ;;  %v11830_v25 = vld [vmem:[%s13572_s18 + $0x1260] ss:$16 sps:$4 sm:$0xff]  }
 0x33a   : > { %8616 = vmatpush1.bf16.msra.mxu1 %v11775_v26  ;;  %8576 = vmatprep.subr.bf16.mxu0 %v11780_v28  ;;  %v11835_v26 = vld [vmem:[%s13572_s18 + $0x1084] ss:$16 sps:$4 sm:$0xff]  }
 0x33b   : > { %8617 = vmatprep.subr.bf16.mxu1 %v11783_v29  ;;  %v11838_v28 = vld [vmem:[%s13572_s18 + $0x1284] ss:$16 sps:$4 sm:$0xff]   ;;  %v11833_v29 = vld [vmem:[%s13572_s18 + $0x1080] ss:$16 sps:$4 sm:$0xff]  }
 0x33d   : > { %8577 = vmatpush1.bf16.msra.mxu0 %v11778_v32  ;;  %v11836_v32 = vld [vmem:[%s13572_s18 + $0x1280] ss:$16 sps:$4 sm:$0xff]  }
 0x33e   : > { %8618 = vmatpush1.bf16.msra.mxu1 %v11781_v36  ;;  %8578 = vmatprep.subr.bf16.mxu0 %v11786_v38  ;;  %v11841_v36 = vld [vmem:[%s13572_s18 + $0x10a4] ss:$16 sps:$4 sm:$0xff]  }
 0x33f   : > { %8619 = vmatprep.subr.bf16.mxu1 %v11789_v39  ;;  %v11844_v38 = vld [vmem:[%s13572_s18 + $0x12a4] ss:$16 sps:$4 sm:$0xff]   ;;  %v11839_v39 = vld [vmem:[%s13572_s18 + $0x10a0] ss:$16 sps:$4 sm:$0xff]  }
 0x341   : > { %8579 = vmatpush1.bf16.msra.mxu0 %v11784_v40  ;;  %v11842_v40 = vld [vmem:[%s13572_s18 + $0x12a0] ss:$16 sps:$4 sm:$0xff]  }
 0x342   : > { %8620 = vmatpush1.bf16.msra.mxu1 %v11787_v41  ;;  %8580 = vmatprep.subr.bf16.mxu0 %v11792_v14  ;;  %v11847_v41 = vld [vmem:[%s13572_s18 + $0x10c4] ss:$16 sps:$4 sm:$0xff]  }
 0x343   : > { %8621 = vmatprep.subr.bf16.mxu1 %v11795_v16  ;;  %v11850_v14 = vld [vmem:[%s13572_s18 + $0x12c4] ss:$16 sps:$4 sm:$0xff]  }
 0x345   : > { %8581 = vmatpush1.bf16.msra.mxu0 %v11790_v44 }
 0x346   : > { %8622 = vmatpush1.bf16.msra.mxu1 %v11793_v45  ;;  %8582 = vmatprep.subr.bf16.mxu0 %v11798_v46  ;;  %v11845_v45 = vld [vmem:[%s13572_s18 + $0x10c0] ss:$16 sps:$4 sm:$0xff]  }
 0x347   : > { %8623 = vmatprep.subr.bf16.mxu1 %v11801_v22  ;;  %v11848_v46 = vld [vmem:[%s13572_s18 + $0x12c0] ss:$16 sps:$4 sm:$0xff]  }
 0x349   : > { %8583 = vmatpush1.bf16.msra.mxu0 %v11796_v52 }
 0x34a   : > { %8624 = vmatpush1.bf16.msra.mxu1 %v11799_v53  ;;  %8584 = vmatprep.subr.bf16.mxu0 %v11804_v55 }
 0x34b   : > { %8625 = vmatprep.subr.bf16.mxu1 %v11807_v56 }
 0x34d   : > { %8585 = vmatpush1.bf16.msra.mxu0 %v11802_v60 }
 0x34e   : > { %8626 = vmatpush1.bf16.msra.mxu1 %v11805_v0  ;;  %8636 = vmatprep.subr.bf16.mxu0 %v11811_v12 }
 0x34f   : > { %8677 = vmatprep.subr.bf16.mxu1 %v11814_v1  ;;  %v11856_v1 = vld [vmem:[%s13572_s18 + $0x12e4] ss:$16 sps:$4 sm:$0xff]  }
 0x350   : > { %8587 = vmatmul.mubr.bf16.vlgmr.msra.gmra.mrb[20].mxu0 %v14258_v59 }
 0x351   : > { %8628 = vmatmul.mubr.bf16.vlgmr.msra.gmra.mrb[20].mxu1 %v14271_v63  ;;  %8637 = vmatpush1.bf16.msra.mxu0 %v11809_v2 }
 0x352   : > { %8678 = vmatpush1.bf16.msra.mxu1 %v11812_v3  ;;  %8638 = vmatprep.subr.bf16.mxu0 %v11817_v8  ;;  %v11854_v3 = vld [vmem:[%s13572_s18 + $0x12e0] ss:$16 sps:$4 sm:$0xff]   ;;  %v11859_v8 = vld [vmem:[%s13572_s18 + $0x1104] ss:$16 sps:$4 sm:$0xff]  }
 0x353   : > { %8679 = vmatprep.subr.bf16.mxu1 %v11820_v9  ;;  %8668 = vmatprep.mubr.bf16.mxu0 %v14267_v7  ;;  %v11862_v9 = vld [vmem:[%s13572_s18 + $0x1304] ss:$16 sps:$4 sm:$0xff]  }
 0x354   : > { %8709 = vmatprep.mubr.bf16.mxu1 %v14277_v10 }
 0x355   : > { %8639 = vmatpush1.bf16.msra.mxu0 %v11815_v11  ;;  %v11857_v11 = vld [vmem:[%s13572_s18 + $0x1100] ss:$16 sps:$4 sm:$0xff]  }
 0x356   : > { %8680 = vmatpush1.bf16.msra.mxu1 %v11818_v13  ;;  %8640 = vmatprep.subr.bf16.mxu0 %v11823_v17  ;;  %v11860_v13 = vld [vmem:[%s13572_s18 + $0x1300] ss:$16 sps:$4 sm:$0xff]   ;;  %v11865_v17 = vld [vmem:[%s13572_s18 + $0x1124] ss:$16 sps:$4 sm:$0xff]  }
 0x357   : > { %8681 = vmatprep.subr.bf16.mxu1 %v11826_v18  ;;  %v11868_v18 = vld [vmem:[%s13572_s18 + $0x1324] ss:$16 sps:$4 sm:$0xff]  }
 0x359   : > { %8641 = vmatpush1.bf16.msra.mxu0 %v11821_v20  ;;  %v11863_v20 = vld [vmem:[%s13572_s18 + $0x1120] ss:$16 sps:$4 sm:$0xff]  }
 0x35a   : > { %8682 = vmatpush1.bf16.msra.mxu1 %v11824_v21  ;;  %8642 = vmatprep.subr.bf16.mxu0 %v11829_v57  ;;  %v11866_v21 = vld [vmem:[%s13572_s18 + $0x1320] ss:$16 sps:$4 sm:$0xff]   ;;  %v11871_v57 = vld [vmem:[%s13572_s18 + $0x1144] ss:$16 sps:$4 sm:$0xff]  }
 0x35b   : > { %8683 = vmatprep.subr.bf16.mxu1 %v11832_v23  ;;  %v11874_v23 = vld [vmem:[%s13572_s18 + $0x1344] ss:$16 sps:$4 sm:$0xff]  }
 0x35d   : > { %8643 = vmatpush1.bf16.msra.mxu0 %v11827_v24  ;;  %v11869_v24 = vld [vmem:[%s13572_s18 + $0x1140] ss:$16 sps:$4 sm:$0xff]  }
 0x35e   : > { %8684 = vmatpush1.bf16.msra.mxu1 %v11830_v25  ;;  %8644 = vmatprep.subr.bf16.mxu0 %v11835_v26  ;;  %v11872_v25 = vld [vmem:[%s13572_s18 + $0x1340] ss:$16 sps:$4 sm:$0xff]   ;;  %v11877_v26 = vld [vmem:[%s13572_s18 + $0x1164] ss:$16 sps:$4 sm:$0xff]  }
 0x35f   : > { %8685 = vmatprep.subr.bf16.mxu1 %v11838_v28  ;;  %v11880_v28 = vld [vmem:[%s13572_s18 + $0x1364] ss:$16 sps:$4 sm:$0xff]  }
 0x361   : > { %8645 = vmatpush1.bf16.msra.mxu0 %v11833_v29  ;;  %v11875_v29 = vld [vmem:[%s13572_s18 + $0x1160] ss:$16 sps:$4 sm:$0xff]  }
 0x362   : > { %8686 = vmatpush1.bf16.msra.mxu1 %v11836_v32  ;;  %8646 = vmatprep.subr.bf16.mxu0 %v11841_v36  ;;  %v11878_v32 = vld [vmem:[%s13572_s18 + $0x1360] ss:$16 sps:$4 sm:$0xff]   ;;  %v11883_v36 = vld [vmem:[%s13572_s18 + $0x1184] ss:$16 sps:$4 sm:$0xff]  }
 0x363   : > { %8687 = vmatprep.subr.bf16.mxu1 %v11844_v38  ;;  %v8342_v16 = vpop.f32.mrb[8].mxu0  ;;  %v11886_v38 = vld [vmem:[%s13572_s18 + $0x1384] ss:$16 sps:$4 sm:$0xff]  }
 0x364   : > { %v8383_v44 = vpop.f32.mrb[8].mxu1  ;;  %v8343_v22 = vadd.f32 %v8342_v16, %v14191_v15  ;;  %v8344_v52 = vpop.f32.mrb[9].mxu0  ;;  %v11853_v15 = vld [vmem:[%s13572_s18 + $0x10e4] ss:$16 sps:$4 sm:$0xff]   ;;  %v3058_v16 = vcombine.high %v14240_v42, %v14240_v42  ;;  %v11893_v42 = vld [vmem:[%s13572_s18 + $0x11c0] ss:$16 sps:$4 sm:$0xff]  }
 0x365   : > { %v8385_v53 = vpop.f32.mrb[9].mxu1  ;;  %v8345_v55 = vadd.f32 %v8344_v52, %v14194_v33  ;;  %v8346_v56 = vpop.f32.mrb[10].mxu0  ;;  %8647 = vmatpush1.bf16.msra.mxu0 %v11839_v39  ;;  %v11851_v33 = vld [vmem:[%s13572_s18 + $0x10e0] ss:$16 sps:$4 sm:$0xff]  }
 0x366   : > { %v8387_v58 = vpop.f32.mrb[10].mxu1  ;;  %8688 = vmatpush1.bf16.msra.mxu1 %v11842_v40  ;;  %v14307_v60 = vadd.f32 %v8383_v44, %v8343_v22  ;;  %v8347_v0 = vpop.f32.mrb[11].mxu0  ;;  %8648 = vmatprep.subr.bf16.mxu0 %v11847_v41  ;;  %v11881_v39 = vld [vmem:[%s13572_s18 + $0x1180] ss:$16 sps:$4 sm:$0xff]   ;;  %v11889_v41 = vld [vmem:[%s13572_s18 + $0x11a4] ss:$16 sps:$4 sm:$0xff]   ;;  %v14344_v52 = vrot.slane %v3058_v16, %v13796_v5 }
 0x367   : > { %v8388_v12 = vpop.f32.mrb[11].mxu1  ;;  %8689 = vmatprep.subr.bf16.mxu1 %v11850_v14  ;;  %v14311_v2 = vadd.f32 %v8385_v53, %v8345_v55  ;;  %v11884_v40 = vld [vmem:[%s13572_s18 + $0x1380] ss:$16 sps:$4 sm:$0xff]   ;;  %v11892_v14 = vld [vmem:[%s13572_s18 + $0x13a4] ss:$16 sps:$4 sm:$0xff]   ;;  %v14354_v0 = vrot.slane %v14248_v51, %v13796_v5 }
 0x368   : > { %v11887_v44 = vld [vmem:[%s13572_s18 + $0x11a0] ss:$16 sps:$4 sm:$0xff]   ;;  %v11898_v22 = vld [vmem:[%s13572_s18 + $0x13c4] ss:$16 sps:$4 sm:$0xff]   ;;  %v3074_v58 = vcombine.high %v14344_v52, %v14344_v52 }
 0x369   : > { %8649 = vmatpush1.bf16.msra.mxu0 %v11845_v45  ;;  %v11890_v45 = vld [vmem:[%s13572_s18 + $0x13a0] ss:$16 sps:$4 sm:$0xff]   ;;  %v11901_v55 = vld [vmem:[%s13572_s18 + $0x11e4] ss:$16 sps:$4 sm:$0xff]   ;;  %v14367_v51 = vcombine.high %v14354_v0, %v14354_v0 }
 0x36a   : > { %8690 = vmatpush1.bf16.msra.mxu1 %v11848_v46  ;;  %8650 = vmatprep.subr.bf16.mxu0 %v11853_v15  ;;  %v11895_v46 = vld [vmem:[%s13572_s18 + $0x11c4] ss:$16 sps:$4 sm:$0xff]   ;;  %v11896_v53 = vld [vmem:[%s13572_s18 + $0x13c0] ss:$16 sps:$4 sm:$0xff]  }
 0x36b   : > { %8691 = vmatprep.subr.bf16.mxu1 %v11856_v1  ;;  %v11904_v56 = vld [vmem:[%s13572_s18 + $0x13e4] ss:$16 sps:$4 sm:$0xff]   ;;  %v11899_v12 = vld [vmem:[%s13572_s18 + $0x11e0] ss:$16 sps:$4 sm:$0xff]  }
 0x36c   : > { %v11902_v15 = vld [vmem:[%s13572_s18 + $0x13e0] ss:$16 sps:$4 sm:$0xff]   ;;  %v11907_v1 = vld [vmem:[%s13572_s18 + $0x1404] ss:$16 sps:$4 sm:$0xff]  }
 0x36d   : > { %8651 = vmatpush1.bf16.msra.mxu0 %v11851_v33  ;;  %v11910_v33 = vld [vmem:[%s13572_s18 + $0x1604] ss:$16 sps:$4 sm:$0xff]   ;;  %v11938_v16 = vld [vmem:[%s13572_s18 + $0x16a0] ss:$16 sps:$4 sm:$0xff]  }
 0x36e   : > { %8692 = vmatpush1.bf16.msra.mxu1 %v11854_v3  ;;  %8652 = vmatprep.subr.bf16.mxu0 %v11859_v8  ;;  %v11905_v3 = vld [vmem:[%s13572_s18 + $0x1400] ss:$16 sps:$4 sm:$0xff]  }
 0x36f   : > { %8693 = vmatprep.subr.bf16.mxu1 %v11862_v9  ;;  %v11908_v8 = vld [vmem:[%s13572_s18 + $0x1600] ss:$16 sps:$4 sm:$0xff]   ;;  %v14363_v9 = vrot.slane %v3074_v58, %v13796_v5 }
 0x371   : > { %8653 = vmatpush1.bf16.msra.mxu0 %v11857_v11  ;;  %v11913_v11 = vld [vmem:[%s13572_s18 + $0x1424] ss:$16 sps:$4 sm:$0xff]  }
 0x372   : > { %8694 = vmatpush1.bf16.msra.mxu1 %v11860_v13  ;;  %8654 = vmatprep.subr.bf16.mxu0 %v11865_v17  ;;  %v11916_v13 = vld [vmem:[%s13572_s18 + $0x1624] ss:$16 sps:$4 sm:$0xff]   ;;  %v14373_v17 = vcombine.high %v14363_v9, %v14363_v9 }
 0x373   : > { %8695 = vmatprep.subr.bf16.mxu1 %v11868_v18  ;;  %v11911_v18 = vld [vmem:[%s13572_s18 + $0x1420] ss:$16 sps:$4 sm:$0xff]  }
 0x375   : > { %8655 = vmatpush1.bf16.msra.mxu0 %v11863_v20  ;;  %v11914_v20 = vld [vmem:[%s13572_s18 + $0x1620] ss:$16 sps:$4 sm:$0xff]  }
 0x376   : > { %8696 = vmatpush1.bf16.msra.mxu1 %v11866_v21  ;;  %8656 = vmatprep.subr.bf16.mxu0 %v11871_v57  ;;  %v11919_v21 = vld [vmem:[%s13572_s18 + $0x1444] ss:$16 sps:$4 sm:$0xff]  }
 0x377   : > { %8697 = vmatprep.subr.bf16.mxu1 %v11874_v23  ;;  %v11922_v57 = vld [vmem:[%s13572_s18 + $0x1644] ss:$16 sps:$4 sm:$0xff]   ;;  %v11917_v23 = vld [vmem:[%s13572_s18 + $0x1440] ss:$16 sps:$4 sm:$0xff]  }
 0x379   : > { %8657 = vmatpush1.bf16.msra.mxu0 %v11869_v24  ;;  %v11920_v24 = vld [vmem:[%s13572_s18 + $0x1640] ss:$16 sps:$4 sm:$0xff]  }
 0x37a   : > { %8698 = vmatpush1.bf16.msra.mxu1 %v11872_v25  ;;  %8658 = vmatprep.subr.bf16.mxu0 %v11877_v26  ;;  %v11925_v25 = vld [vmem:[%s13572_s18 + $0x1464] ss:$16 sps:$4 sm:$0xff]  }
 0x37b   : > { %8699 = vmatprep.subr.bf16.mxu1 %v11880_v28  ;;  %v11928_v26 = vld [vmem:[%s13572_s18 + $0x1664] ss:$16 sps:$4 sm:$0xff]   ;;  %v11923_v28 = vld [vmem:[%s13572_s18 + $0x1460] ss:$16 sps:$4 sm:$0xff]  }
 0x37d   : > { %8659 = vmatpush1.bf16.msra.mxu0 %v11875_v29  ;;  %v11926_v29 = vld [vmem:[%s13572_s18 + $0x1660] ss:$16 sps:$4 sm:$0xff]  }
 0x37e   : > { %8700 = vmatpush1.bf16.msra.mxu1 %v11878_v32  ;;  %8660 = vmatprep.subr.bf16.mxu0 %v11883_v36  ;;  %v11931_v32 = vld [vmem:[%s13572_s18 + $0x1484] ss:$16 sps:$4 sm:$0xff]  }
 0x37f   : > { %8701 = vmatprep.subr.bf16.mxu1 %v11886_v38  ;;  %v11934_v36 = vld [vmem:[%s13572_s18 + $0x1684] ss:$16 sps:$4 sm:$0xff]   ;;  %v11929_v38 = vld [vmem:[%s13572_s18 + $0x1480] ss:$16 sps:$4 sm:$0xff]  }
 0x381   : > { %8661 = vmatpush1.bf16.msra.mxu0 %v11881_v39  ;;  %v11932_v39 = vld [vmem:[%s13572_s18 + $0x1680] ss:$16 sps:$4 sm:$0xff]  }
 0x382   : > { %8702 = vmatpush1.bf16.msra.mxu1 %v11884_v40  ;;  %8662 = vmatprep.subr.bf16.mxu0 %v11889_v41  ;;  %v11937_v40 = vld [vmem:[%s13572_s18 + $0x14a4] ss:$16 sps:$4 sm:$0xff]  }
 0x383   : > { %8703 = vmatprep.subr.bf16.mxu1 %v11892_v14  ;;  %v11940_v41 = vld [vmem:[%s13572_s18 + $0x16a4] ss:$16 sps:$4 sm:$0xff]   ;;  %v11935_v14 = vld [vmem:[%s13572_s18 + $0x14a0] ss:$16 sps:$4 sm:$0xff]  }
 0x385   : > { %8663 = vmatpush1.bf16.msra.mxu0 %v11887_v44  ;;  %v11943_v44 = vld [vmem:[%s13572_s18 + $0x14c4] ss:$16 sps:$4 sm:$0xff]  }
 0x386   : > { %8704 = vmatpush1.bf16.msra.mxu1 %v11890_v45  ;;  %8664 = vmatprep.subr.bf16.mxu0 %v11895_v46  ;;  %v11946_v45 = vld [vmem:[%s13572_s18 + $0x16c4] ss:$16 sps:$4 sm:$0xff]  }
 0x387   : > { %8705 = vmatprep.subr.bf16.mxu1 %v11898_v22 }
 0x389   : > { %8665 = vmatpush1.bf16.msra.mxu0 %v11893_v42  ;;  %v11941_v42 = vld [vmem:[%s13572_s18 + $0x14c0] ss:$16 sps:$4 sm:$0xff]  }
 0x38a   : > { %8706 = vmatpush1.bf16.msra.mxu1 %v11896_v53  ;;  %8666 = vmatprep.subr.bf16.mxu0 %v11901_v55  ;;  %v11944_v53 = vld [vmem:[%s13572_s18 + $0x16c0] ss:$16 sps:$4 sm:$0xff]  }
 0x38b   : > { %8707 = vmatprep.subr.bf16.mxu1 %v11904_v56 }
 0x38d   : > { %8667 = vmatpush1.bf16.msra.mxu0 %v11899_v12 }
 0x38e   : > { %8708 = vmatpush1.bf16.msra.mxu1 %v11902_v15  ;;  %8718 = vmatprep.subr.bf16.mxu0 %v11907_v1 }
 0x38f   : > { %8759 = vmatprep.subr.bf16.mxu1 %v11910_v33 }
 0x390   : > { %8669 = vmatmul.mubr.bf16.vlgmr.msra.gmra.mrb[24].mxu0 %v14354_v0 }
 0x391   : > { %8710 = vmatmul.mubr.bf16.vlgmr.msra.gmra.mrb[24].mxu1 %v14367_v51  ;;  %8719 = vmatpush1.bf16.msra.mxu0 %v11905_v3 }
 0x392   : > { %8760 = vmatpush1.bf16.msra.mxu1 %v11908_v8  ;;  %8720 = vmatprep.subr.bf16.mxu0 %v11913_v11  ;;  %v11952_v11 = vld [vmem:[%s13572_s18 + $0x16e4] ss:$16 sps:$4 sm:$0xff]  }
 0x393   : > { %8761 = vmatprep.subr.bf16.mxu1 %v11916_v13  ;;  %8750 = vmatprep.mubr.bf16.mxu0 %v14363_v9 }
 0x394   : > { %8791 = vmatprep.mubr.bf16.mxu1 %v14373_v17 }
 0x395   : > { %8721 = vmatpush1.bf16.msra.mxu0 %v11911_v18  ;;  %v11950_v18 = vld [vmem:[%s13572_s18 + $0x16e0] ss:$16 sps:$4 sm:$0xff]  }
 0x396   : > { %8762 = vmatpush1.bf16.msra.mxu1 %v11914_v20  ;;  %8722 = vmatprep.subr.bf16.mxu0 %v11919_v21  ;;  %v11955_v20 = vld [vmem:[%s13572_s18 + $0x1504] ss:$16 sps:$4 sm:$0xff]  }
 0x397   : > { %8763 = vmatprep.subr.bf16.mxu1 %v11922_v57  ;;  %v11958_v21 = vld [vmem:[%s13572_s18 + $0x1704] ss:$16 sps:$4 sm:$0xff]   ;;  %v11953_v57 = vld [vmem:[%s13572_s18 + $0x1500] ss:$16 sps:$4 sm:$0xff]  }
 0x399   : > { %8723 = vmatpush1.bf16.msra.mxu0 %v11917_v23  ;;  %v11956_v23 = vld [vmem:[%s13572_s18 + $0x1700] ss:$16 sps:$4 sm:$0xff]  }
 0x39a   : > { %8764 = vmatpush1.bf16.msra.mxu1 %v11920_v24  ;;  %8724 = vmatprep.subr.bf16.mxu0 %v11925_v25  ;;  %v11961_v24 = vld [vmem:[%s13572_s18 + $0x1524] ss:$16 sps:$4 sm:$0xff]  }
 0x39b   : > { %8765 = vmatprep.subr.bf16.mxu1 %v11928_v26  ;;  %v11964_v25 = vld [vmem:[%s13572_s18 + $0x1724] ss:$16 sps:$4 sm:$0xff]   ;;  %v11959_v26 = vld [vmem:[%s13572_s18 + $0x1520] ss:$16 sps:$4 sm:$0xff]  }
 0x39d   : > { %8725 = vmatpush1.bf16.msra.mxu0 %v11923_v28  ;;  %v11962_v28 = vld [vmem:[%s13572_s18 + $0x1720] ss:$16 sps:$4 sm:$0xff]  }
 0x39e   : > { %8766 = vmatpush1.bf16.msra.mxu1 %v11926_v29  ;;  %8726 = vmatprep.subr.bf16.mxu0 %v11931_v32  ;;  %v11967_v29 = vld [vmem:[%s13572_s18 + $0x1544] ss:$16 sps:$4 sm:$0xff]  }
 0x39f   : > { %8767 = vmatprep.subr.bf16.mxu1 %v11934_v36  ;;  %v11970_v32 = vld [vmem:[%s13572_s18 + $0x1744] ss:$16 sps:$4 sm:$0xff]   ;;  %v11965_v36 = vld [vmem:[%s13572_s18 + $0x1540] ss:$16 sps:$4 sm:$0xff]  }
 0x3a1   : > { %8727 = vmatpush1.bf16.msra.mxu0 %v11929_v38  ;;  %v11968_v38 = vld [vmem:[%s13572_s18 + $0x1740] ss:$16 sps:$4 sm:$0xff]  }
 0x3a2   : > { %8768 = vmatpush1.bf16.msra.mxu1 %v11932_v39  ;;  %8728 = vmatprep.subr.bf16.mxu0 %v11937_v40  ;;  %v11973_v39 = vld [vmem:[%s13572_s18 + $0x1564] ss:$16 sps:$4 sm:$0xff]  }
 0x3a3   : > { %8769 = vmatprep.subr.bf16.mxu1 %v11940_v41  ;;  %v8424_v46 = vpop.f32.mrb[12].mxu0  ;;  %v11976_v40 = vld [vmem:[%s13572_s18 + $0x1764] ss:$16 sps:$4 sm:$0xff]   ;;  %v11971_v41 = vld [vmem:[%s13572_s18 + $0x1560] ss:$16 sps:$4 sm:$0xff]  }
 0x3a4   : > { %v8465_v22 = vpop.f32.mrb[12].mxu1  ;;  %v8425_v55 = vadd.f32 %v8424_v46, %v14307_v60  ;;  %v8426_v56 = vpop.f32.mrb[13].mxu0  ;;  %v11949_v60 = vld [vmem:[%s13572_s18 + $0x14e4] ss:$16 sps:$4 sm:$0xff]   ;;  %v11980_v46 = vld [vmem:[%s13572_s18 + $0x1780] ss:$16 sps:$4 sm:$0xff]  }
 0x3a5   : > { %v8467_v58 = vpop.f32.mrb[13].mxu1  ;;  %v8427_v12 = vadd.f32 %v8426_v56, %v14311_v2  ;;  %v8428_v15 = vpop.f32.mrb[14].mxu0  ;;  %8729 = vmatpush1.bf16.msra.mxu0 %v11935_v14  ;;  %v11947_v2 = vld [vmem:[%s13572_s18 + $0x14e0] ss:$16 sps:$4 sm:$0xff]  }
 0x3a6   : > { %v8469_v1 = vpop.f32.mrb[14].mxu1  ;;  %8770 = vmatpush1.bf16.msra.mxu1 %v11938_v16  ;;  %v14403_v33 = vadd.f32 %v8465_v22, %v8425_v55  ;;  %v8429_v3 = vpop.f32.mrb[15].mxu0  ;;  %8730 = vmatprep.subr.bf16.mxu0 %v11943_v44  ;;  %v11974_v14 = vld [vmem:[%s13572_s18 + $0x1760] ss:$16 sps:$4 sm:$0xff]   ;;  %v11979_v16 = vld [vmem:[%s13572_s18 + $0x1584] ss:$16 sps:$4 sm:$0xff]  }
 0x3a7   : > { %v8470_v8 = vpop.f32.mrb[15].mxu1  ;;  %8771 = vmatprep.subr.bf16.mxu1 %v11946_v45  ;;  %v14407_v13 = vadd.f32 %v8467_v58, %v8427_v12  ;;  %v11982_v44 = vld [vmem:[%s13572_s18 + $0x1784] ss:$16 sps:$4 sm:$0xff]   ;;  %v11977_v45 = vld [vmem:[%s13572_s18 + $0x1580] ss:$16 sps:$4 sm:$0xff]  }
 0x3a8   : > { %v11985_v22 = vld [vmem:[%s13572_s18 + $0x15a4] ss:$16 sps:$4 sm:$0xff]   ;;  %v11983_v55 = vld [vmem:[%s13572_s18 + $0x15a0] ss:$16 sps:$4 sm:$0xff]  }
 0x3a9   : > { %8731 = vmatpush1.bf16.msra.mxu0 %v11941_v42  ;;  %v11988_v42 = vld [vmem:[%s13572_s18 + $0x17a4] ss:$16 sps:$4 sm:$0xff]   ;;  %v11986_v56 = vld [vmem:[%s13572_s18 + $0x17a0] ss:$16 sps:$4 sm:$0xff]  }
 0x3aa   : > { %8772 = vmatpush1.bf16.msra.mxu1 %v11944_v53  ;;  %8732 = vmatprep.subr.bf16.mxu0 %v11949_v60  ;;  %v14433_v53 = vld [vmem:[#allocation2 + $0x18] sm:$0xff] }
 0x3ab   : > { %8773 = vmatprep.subr.bf16.mxu1 %v11952_v11  ;;  %v11991_v58 = vld [vmem:[%s13572_s18 + $0x15c4] ss:$16 sps:$4 sm:$0xff]   ;;  %v14441_v15 = vrot.slane %v14433_v53, %v13796_v5  ;;  %v11989_v1 = vld [vmem:[%s13572_s18 + $0x15c0] ss:$16 sps:$4 sm:$0xff]  }
 0x3ac   : > { %v11994_v12 = vld [vmem:[%s13572_s18 + $0x17c4] ss:$16 sps:$4 sm:$0xff]   ;;  %v11992_v3 = vld [vmem:[%s13572_s18 + $0x17c0] ss:$16 sps:$4 sm:$0xff]  }
 0x3ad   : > { %8733 = vmatpush1.bf16.msra.mxu0 %v11947_v2  ;;  %v11997_v8 = vld [vmem:[%s13572_s18 + $0x15e4] ss:$16 sps:$4 sm:$0xff]   ;;  %v3122_v11 = vcombine.high %v14441_v15, %v14441_v15  ;;  %v14451_v2 = vrot.slane %v14344_v52, %v13796_v5 }
 0x3ae   : > { %8774 = vmatpush1.bf16.msra.mxu1 %v11950_v18  ;;  %8734 = vmatprep.subr.bf16.mxu0 %v11955_v20  ;;  %v12000_v60 = vld [vmem:[%s13572_s18 + $0x17e4] ss:$16 sps:$4 sm:$0xff]   ;;  %v11995_v18 = vld [vmem:[%s13572_s18 + $0x15e0] ss:$16 sps:$4 sm:$0xff]  }
 0x3af   : > { %8775 = vmatprep.subr.bf16.mxu1 %v11958_v21  ;;  %v11998_v20 = vld [vmem:[%s13572_s18 + $0x17e0] ss:$16 sps:$4 sm:$0xff]   ;;  %v12004_v21 = vld [vmem:[%s13572_s18 + $0x1804] ss:$16 sps:$4 sm:$0xff]   ;;  %v14464_v52 = vcombine.high %v14451_v2, %v14451_v2 }
 0x3b1   : > { %8735 = vmatpush1.bf16.msra.mxu0 %v11953_v57  ;;  %v12007_v57 = vld [vmem:[%s13572_s18 + $0x1a04] ss:$16 sps:$4 sm:$0xff]  }
 0x3b2   : > { %8776 = vmatpush1.bf16.msra.mxu1 %v11956_v23  ;;  %8736 = vmatprep.subr.bf16.mxu0 %v11961_v24  ;;  %v12002_v23 = vld [vmem:[%s13572_s18 + $0x1800] ss:$16 sps:$4 sm:$0xff]  }
 0x3b3   : > { %8777 = vmatprep.subr.bf16.mxu1 %v11964_v25  ;;  %v12005_v24 = vld [vmem:[%s13572_s18 + $0x1a00] ss:$16 sps:$4 sm:$0xff]   ;;  %v14460_v25 = vrot.slane %v3122_v11, %v13796_v5 }
 0x3b5   : > { %8737 = vmatpush1.bf16.msra.mxu0 %v11959_v26  ;;  %v12010_v26 = vld [vmem:[%s13572_s18 + $0x1824] ss:$16 sps:$4 sm:$0xff]  }
 0x3b6   : > { %8778 = vmatpush1.bf16.msra.mxu1 %v11962_v28  ;;  %8738 = vmatprep.subr.bf16.mxu0 %v11967_v29  ;;  %v12013_v28 = vld [vmem:[%s13572_s18 + $0x1a24] ss:$16 sps:$4 sm:$0xff]   ;;  %v14470_v29 = vcombine.high %v14460_v25, %v14460_v25 }
 0x3b7   : > { %8779 = vmatprep.subr.bf16.mxu1 %v11970_v32  ;;  %v12008_v32 = vld [vmem:[%s13572_s18 + $0x1820] ss:$16 sps:$4 sm:$0xff]  }
 0x3b9   : > { %8739 = vmatpush1.bf16.msra.mxu0 %v11965_v36  ;;  %v12011_v36 = vld [vmem:[%s13572_s18 + $0x1a20] ss:$16 sps:$4 sm:$0xff]  }
 0x3ba   : > { %8780 = vmatpush1.bf16.msra.mxu1 %v11968_v38  ;;  %8740 = vmatprep.subr.bf16.mxu0 %v11973_v39  ;;  %v12016_v38 = vld [vmem:[%s13572_s18 + $0x1844] ss:$16 sps:$4 sm:$0xff]  }
 0x3bb   : > { %8781 = vmatprep.subr.bf16.mxu1 %v11976_v40  ;;  %v12019_v39 = vld [vmem:[%s13572_s18 + $0x1a44] ss:$16 sps:$4 sm:$0xff]   ;;  %v12014_v40 = vld [vmem:[%s13572_s18 + $0x1840] ss:$16 sps:$4 sm:$0xff]  }
 0x3bd   : > { %8741 = vmatpush1.bf16.msra.mxu0 %v11971_v41  ;;  %v12017_v41 = vld [vmem:[%s13572_s18 + $0x1a40] ss:$16 sps:$4 sm:$0xff]  }
 0x3be   : > { %8782 = vmatpush1.bf16.msra.mxu1 %v11974_v14  ;;  %8742 = vmatprep.subr.bf16.mxu0 %v11979_v16  ;;  %v12022_v14 = vld [vmem:[%s13572_s18 + $0x1864] ss:$16 sps:$4 sm:$0xff]  }
 0x3bf   : > { %8783 = vmatprep.subr.bf16.mxu1 %v11982_v44  ;;  %v12025_v16 = vld [vmem:[%s13572_s18 + $0x1a64] ss:$16 sps:$4 sm:$0xff]   ;;  %v12020_v44 = vld [vmem:[%s13572_s18 + $0x1860] ss:$16 sps:$4 sm:$0xff]  }
 0x3c1   : > { %8743 = vmatpush1.bf16.msra.mxu0 %v11977_v45  ;;  %v12023_v45 = vld [vmem:[%s13572_s18 + $0x1a60] ss:$16 sps:$4 sm:$0xff]  }
 0x3c2   : > { %8784 = vmatpush1.bf16.msra.mxu1 %v11980_v46  ;;  %8744 = vmatprep.subr.bf16.mxu0 %v11985_v22  ;;  %v12028_v46 = vld [vmem:[%s13572_s18 + $0x1884] ss:$16 sps:$4 sm:$0xff]  }
 0x3c3   : > { %8785 = vmatprep.subr.bf16.mxu1 %v11988_v42  ;;  %v12031_v22 = vld [vmem:[%s13572_s18 + $0x1a84] ss:$16 sps:$4 sm:$0xff]   ;;  %v12026_v42 = vld [vmem:[%s13572_s18 + $0x1880] ss:$16 sps:$4 sm:$0xff]  }
 0x3c5   : > { %8745 = vmatpush1.bf16.msra.mxu0 %v11983_v55  ;;  %v12029_v55 = vld [vmem:[%s13572_s18 + $0x1a80] ss:$16 sps:$4 sm:$0xff]  }
 0x3c6   : > { %8786 = vmatpush1.bf16.msra.mxu1 %v11986_v56  ;;  %8746 = vmatprep.subr.bf16.mxu0 %v11991_v58  ;;  %v12034_v56 = vld [vmem:[%s13572_s18 + $0x18a4] ss:$16 sps:$4 sm:$0xff]  }
 0x3c7   : > { %8787 = vmatprep.subr.bf16.mxu1 %v11994_v12  ;;  %v12037_v58 = vld [vmem:[%s13572_s18 + $0x1aa4] ss:$16 sps:$4 sm:$0xff]   ;;  %v12032_v12 = vld [vmem:[%s13572_s18 + $0x18a0] ss:$16 sps:$4 sm:$0xff]  }
 0x3c9   : > { %8747 = vmatpush1.bf16.msra.mxu0 %v11989_v1  ;;  %v12035_v1 = vld [vmem:[%s13572_s18 + $0x1aa0] ss:$16 sps:$4 sm:$0xff]  }
 0x3ca   : > { %8788 = vmatpush1.bf16.msra.mxu1 %v11992_v3  ;;  %8748 = vmatprep.subr.bf16.mxu0 %v11997_v8  ;;  %v12040_v3 = vld [vmem:[%s13572_s18 + $0x18c4] ss:$16 sps:$4 sm:$0xff]  }
 0x3cb   : > { %8789 = vmatprep.subr.bf16.mxu1 %v12000_v60  ;;  %v12043_v8 = vld [vmem:[%s13572_s18 + $0x1ac4] ss:$16 sps:$4 sm:$0xff]  }
 0x3cd   : > { %8749 = vmatpush1.bf16.msra.mxu0 %v11995_v18  ;;  %v12038_v18 = vld [vmem:[%s13572_s18 + $0x18c0] ss:$16 sps:$4 sm:$0xff]  }
 0x3ce   : > { %8790 = vmatpush1.bf16.msra.mxu1 %v11998_v20  ;;  %8800 = vmatprep.subr.bf16.mxu0 %v12004_v21  ;;  %v12041_v20 = vld [vmem:[%s13572_s18 + $0x1ac0] ss:$16 sps:$4 sm:$0xff]  }
 0x3cf   : > { %8841 = vmatprep.subr.bf16.mxu1 %v12007_v57 }
 0x3d0   : > { %8751 = vmatmul.mubr.bf16.vlgmr.msra.gmra.mrb[28].mxu0 %v14451_v2 }
 0x3d1   : > { %8792 = vmatmul.mubr.bf16.vlgmr.msra.gmra.mrb[28].mxu1 %v14464_v52  ;;  %8801 = vmatpush1.bf16.msra.mxu0 %v12002_v23 }
 0x3d2   : > { %8842 = vmatpush1.bf16.msra.mxu1 %v12005_v24  ;;  %8802 = vmatprep.subr.bf16.mxu0 %v12010_v26 }
 0x3d3   : > { %8843 = vmatprep.subr.bf16.mxu1 %v12013_v28  ;;  %8832 = vmatprep.mubr.bf16.mxu0 %v14460_v25 }
 0x3d4   : > { %8873 = vmatprep.mubr.bf16.mxu1 %v14470_v29 }
 0x3d5   : > { %8803 = vmatpush1.bf16.msra.mxu0 %v12008_v32 }
 0x3d6   : > { %8844 = vmatpush1.bf16.msra.mxu1 %v12011_v36  ;;  %8804 = vmatprep.subr.bf16.mxu0 %v12016_v38 }
 0x3d7   : > { %8845 = vmatprep.subr.bf16.mxu1 %v12019_v39  ;;  %v12049_v39 = vld [vmem:[%s13572_s18 + $0x1ae4] ss:$16 sps:$4 sm:$0xff]  }
 0x3d9   : > { %8805 = vmatpush1.bf16.msra.mxu0 %v12014_v40 }
 0x3da   : > { %8846 = vmatpush1.bf16.msra.mxu1 %v12017_v41  ;;  %8806 = vmatprep.subr.bf16.mxu0 %v12022_v14  ;;  %v12047_v41 = vld [vmem:[%s13572_s18 + $0x1ae0] ss:$16 sps:$4 sm:$0xff]   ;;  %v12052_v14 = vld [vmem:[%s13572_s18 + $0x1904] ss:$16 sps:$4 sm:$0xff]  }
 0x3db   : > { %8847 = vmatprep.subr.bf16.mxu1 %v12025_v16  ;;  %v12055_v16 = vld [vmem:[%s13572_s18 + $0x1b04] ss:$16 sps:$4 sm:$0xff]  }
 0x3dd   : > { %8807 = vmatpush1.bf16.msra.mxu0 %v12020_v44  ;;  %v12050_v44 = vld [vmem:[%s13572_s18 + $0x1900] ss:$16 sps:$4 sm:$0xff]  }
 0x3de   : > { %8848 = vmatpush1.bf16.msra.mxu1 %v12023_v45  ;;  %8808 = vmatprep.subr.bf16.mxu0 %v12028_v46  ;;  %v12053_v45 = vld [vmem:[%s13572_s18 + $0x1b00] ss:$16 sps:$4 sm:$0xff]   ;;  %v12058_v46 = vld [vmem:[%s13572_s18 + $0x1924] ss:$16 sps:$4 sm:$0xff]  }
 0x3df   : > { %8849 = vmatprep.subr.bf16.mxu1 %v12031_v22  ;;  %v12061_v22 = vld [vmem:[%s13572_s18 + $0x1b24] ss:$16 sps:$4 sm:$0xff]  }
 0x3e1   : > { %8809 = vmatpush1.bf16.msra.mxu0 %v12026_v42  ;;  %v12056_v42 = vld [vmem:[%s13572_s18 + $0x1920] ss:$16 sps:$4 sm:$0xff]  }
 0x3e2   : > { %8850 = vmatpush1.bf16.msra.mxu1 %v12029_v55  ;;  %8810 = vmatprep.subr.bf16.mxu0 %v12034_v56  ;;  %v12059_v55 = vld [vmem:[%s13572_s18 + $0x1b20] ss:$16 sps:$4 sm:$0xff]   ;;  %v12064_v56 = vld [vmem:[%s13572_s18 + $0x1944] ss:$16 sps:$4 sm:$0xff]  }
 0x3e3   : > { %8851 = vmatprep.subr.bf16.mxu1 %v12037_v58  ;;  %v8506_v60 = vpop.f32.mrb[16].mxu0  ;;  %v12067_v58 = vld [vmem:[%s13572_s18 + $0x1b44] ss:$16 sps:$4 sm:$0xff]  }
 0x3e4   : > { %v8547_v11 = vpop.f32.mrb[16].mxu1  ;;  %v8507_v21 = vadd.f32 %v8506_v60, %v14403_v33  ;;  %v8508_v57 = vpop.f32.mrb[17].mxu0  ;;  %v12046_v33 = vld [vmem:[%s13572_s18 + $0x18e4] ss:$16 sps:$4 sm:$0xff]   ;;  %v12068_v60 = vld [vmem:[%s13572_s18 + $0x1960] ss:$16 sps:$4 sm:$0xff]  }
 0x3e5   : > { %v8549_v23 = vpop.f32.mrb[17].mxu1  ;;  %v8509_v24 = vadd.f32 %v8508_v57, %v14407_v13  ;;  %v8510_v26 = vpop.f32.mrb[18].mxu0  ;;  %8811 = vmatpush1.bf16.msra.mxu0 %v12032_v12  ;;  %v12044_v13 = vld [vmem:[%s13572_s18 + $0x18e0] ss:$16 sps:$4 sm:$0xff]  }
 0x3e6   : > { %v8551_v28 = vpop.f32.mrb[18].mxu1  ;;  %8852 = vmatpush1.bf16.msra.mxu1 %v12035_v1  ;;  %v14500_v32 = vadd.f32 %v8547_v11, %v8507_v21  ;;  %v8511_v36 = vpop.f32.mrb[19].mxu0  ;;  %8812 = vmatprep.subr.bf16.mxu0 %v12040_v3  ;;  %v12062_v12 = vld [vmem:[%s13572_s18 + $0x1940] ss:$16 sps:$4 sm:$0xff]   ;;  %v12070_v3 = vld [vmem:[%s13572_s18 + $0x1964] ss:$16 sps:$4 sm:$0xff]   ;;  %v3107_v26 = vcombine.high %v14433_v53, %v14433_v53 }
 0x3e7   : > { %v8552_v38 = vpop.f32.mrb[19].mxu1  ;;  %8853 = vmatprep.subr.bf16.mxu1 %v12043_v8  ;;  %v14504_v40 = vadd.f32 %v8549_v23, %v8509_v24  ;;  %v12065_v1 = vld [vmem:[%s13572_s18 + $0x1b40] ss:$16 sps:$4 sm:$0xff]   ;;  %v12073_v8 = vld [vmem:[%s13572_s18 + $0x1b64] ss:$16 sps:$4 sm:$0xff]  }
 0x3e8   : > { %v12071_v11 = vld [vmem:[%s13572_s18 + $0x1b60] ss:$16 sps:$4 sm:$0xff]   ;;  %v12082_v23 = vld [vmem:[%s13572_s18 + $0x19a4] ss:$16 sps:$4 sm:$0xff]  }
 0x3e9   : > { %8813 = vmatpush1.bf16.msra.mxu0 %v12038_v18  ;;  %v12076_v18 = vld [vmem:[%s13572_s18 + $0x1984] ss:$16 sps:$4 sm:$0xff]   ;;  %v12074_v21 = vld [vmem:[%s13572_s18 + $0x1980] ss:$16 sps:$4 sm:$0xff]  }
 0x3ea   : > { %8854 = vmatpush1.bf16.msra.mxu1 %v12041_v20  ;;  %8814 = vmatprep.subr.bf16.mxu0 %v12046_v33  ;;  %v12079_v20 = vld [vmem:[%s13572_s18 + $0x1b84] ss:$16 sps:$4 sm:$0xff]   ;;  %v12077_v57 = vld [vmem:[%s13572_s18 + $0x1b80] ss:$16 sps:$4 sm:$0xff]  }
 0x3eb   : > { %8855 = vmatprep.subr.bf16.mxu1 %v12049_v39  ;;  %v12085_v24 = vld [vmem:[%s13572_s18 + $0x1ba4] ss:$16 sps:$4 sm:$0xff]   ;;  %v12080_v28 = vld [vmem:[%s13572_s18 + $0x19a0] ss:$16 sps:$4 sm:$0xff]   ;;  %v14537_v39 = vrot.slane %v3107_v26, %v13796_v5 }
 0x3ec   : > { %v12083_v36 = vld [vmem:[%s13572_s18 + $0x1ba0] ss:$16 sps:$4 sm:$0xff]   ;;  %v12088_v38 = vld [vmem:[%s13572_s18 + $0x19c4] ss:$16 sps:$4 sm:$0xff]  }
 0x3ed   : > { %8815 = vmatpush1.bf16.msra.mxu0 %v12044_v13  ;;  %v12091_v33 = vld [vmem:[%s13572_s18 + $0x1bc4] ss:$16 sps:$4 sm:$0xff]   ;;  %v12086_v53 = vld [vmem:[%s13572_s18 + $0x19c0] ss:$16 sps:$4 sm:$0xff]  }
 0x3ee   : > { %8856 = vmatpush1.bf16.msra.mxu1 %v12047_v41  ;;  %8816 = vmatprep.subr.bf16.mxu0 %v12052_v14  ;;  %v12089_v13 = vld [vmem:[%s13572_s18 + $0x1bc0] ss:$16 sps:$4 sm:$0xff]   ;;  %v12094_v41 = vld [vmem:[%s13572_s18 + $0x19e4] ss:$16 sps:$4 sm:$0xff]  }
 0x3ef   : > { %8857 = vmatprep.subr.bf16.mxu1 %v12055_v16  ;;  %v12097_v14 = vld [vmem:[%s13572_s18 + $0x1be4] ss:$16 sps:$4 sm:$0xff]   ;;  %v3123_v16 = vcombine.high %v14537_v39, %v14537_v39  ;;  %v12119_v26 = vld [vmem:[%s13572_s18 + $0x1e60] ss:$16 sps:$4 sm:$0xff]  }
 0x3f1   : > { %8817 = vmatpush1.bf16.msra.mxu0 %v12050_v44  ;;  %v14547_v44 = vrot.slane %v14441_v15, %v13796_v5 }
 0x3f2   : > { %8858 = vmatpush1.bf16.msra.mxu1 %v12053_v45  ;;  %8818 = vmatprep.subr.bf16.mxu0 %v12058_v46  ;;  %v12092_v45 = vld [vmem:[%s13572_s18 + $0x19e0] ss:$16 sps:$4 sm:$0xff]  }
 0x3f3   : > { %8859 = vmatprep.subr.bf16.mxu1 %v12061_v22  ;;  %v12095_v46 = vld [vmem:[%s13572_s18 + $0x1be0] ss:$16 sps:$4 sm:$0xff]   ;;  %v12100_v22 = vld [vmem:[%s13572_s18 + $0x1c04] ss:$16 sps:$4 sm:$0xff]   ;;  %v14560_v15 = vcombine.high %v14547_v44, %v14547_v44 }
 0x3f5   : > { %8819 = vmatpush1.bf16.msra.mxu0 %v12056_v42  ;;  %v12103_v42 = vld [vmem:[%s13572_s18 + $0x1e04] ss:$16 sps:$4 sm:$0xff]  }
 0x3f6   : > { %8860 = vmatpush1.bf16.msra.mxu1 %v12059_v55  ;;  %8820 = vmatprep.subr.bf16.mxu0 %v12064_v56  ;;  %v12098_v55 = vld [vmem:[%s13572_s18 + $0x1c00] ss:$16 sps:$4 sm:$0xff]  }
 0x3f7   : > { %8861 = vmatprep.subr.bf16.mxu1 %v12067_v58  ;;  %v12101_v56 = vld [vmem:[%s13572_s18 + $0x1e00] ss:$16 sps:$4 sm:$0xff]   ;;  %v14556_v58 = vrot.slane %v3123_v16, %v13796_v5  ;;  %v12136_v16 = vld [vmem:[%s13572_s18 + $0x1cc4] ss:$16 sps:$4 sm:$0xff]  }
 0x3f9   : > { %8821 = vmatpush1.bf16.msra.mxu0 %v12062_v12  ;;  %v12106_v12 = vld [vmem:[%s13572_s18 + $0x1c24] ss:$16 sps:$4 sm:$0xff]  }
 0x3fa   : > { %8862 = vmatpush1.bf16.msra.mxu1 %v12065_v1  ;;  %8822 = vmatprep.subr.bf16.mxu0 %v12070_v3  ;;  %v12109_v1 = vld [vmem:[%s13572_s18 + $0x1e24] ss:$16 sps:$4 sm:$0xff]   ;;  %v14566_v3 = vcombine.high %v14556_v58, %v14556_v58 }
 0x3fb   : > { %8863 = vmatprep.subr.bf16.mxu1 %v12073_v8  ;;  %v12104_v8 = vld [vmem:[%s13572_s18 + $0x1c20] ss:$16 sps:$4 sm:$0xff]  }
 0x3fd   : > { %8823 = vmatpush1.bf16.msra.mxu0 %v12068_v60  ;;  %v12107_v60 = vld [vmem:[%s13572_s18 + $0x1e20] ss:$16 sps:$4 sm:$0xff]  }
 0x3fe   : > { %8864 = vmatpush1.bf16.msra.mxu1 %v12071_v11  ;;  %8824 = vmatprep.subr.bf16.mxu0 %v12076_v18  ;;  %v12112_v11 = vld [vmem:[%s13572_s18 + $0x1c44] ss:$16 sps:$4 sm:$0xff]  }
 0x3ff   : > { %8865 = vmatprep.subr.bf16.mxu1 %v12079_v20  ;;  %v12115_v18 = vld [vmem:[%s13572_s18 + $0x1e44] ss:$16 sps:$4 sm:$0xff]   ;;  %v12110_v20 = vld [vmem:[%s13572_s18 + $0x1c40] ss:$16 sps:$4 sm:$0xff]  }
 0x401   : > { %8825 = vmatpush1.bf16.msra.mxu0 %v12074_v21  ;;  %v12113_v21 = vld [vmem:[%s13572_s18 + $0x1e40] ss:$16 sps:$4 sm:$0xff]  }
 0x402   : > { %8866 = vmatpush1.bf16.msra.mxu1 %v12077_v57  ;;  %8826 = vmatprep.subr.bf16.mxu0 %v12082_v23  ;;  %v12118_v57 = vld [vmem:[%s13572_s18 + $0x1c64] ss:$16 sps:$4 sm:$0xff]  }
 0x403   : > { %8867 = vmatprep.subr.bf16.mxu1 %v12085_v24  ;;  %v12121_v23 = vld [vmem:[%s13572_s18 + $0x1e64] ss:$16 sps:$4 sm:$0xff]   ;;  %v12116_v24 = vld [vmem:[%s13572_s18 + $0x1c60] ss:$16 sps:$4 sm:$0xff]  }
 0x405   : > { %8827 = vmatpush1.bf16.msra.mxu0 %v12080_v28  ;;  %v12124_v28 = vld [vmem:[%s13572_s18 + $0x1c84] ss:$16 sps:$4 sm:$0xff]  }
 0x406   : > { %8868 = vmatpush1.bf16.msra.mxu1 %v12083_v36  ;;  %8828 = vmatprep.subr.bf16.mxu0 %v12088_v38  ;;  %v12127_v36 = vld [vmem:[%s13572_s18 + $0x1e84] ss:$16 sps:$4 sm:$0xff]   ;;  %v12122_v38 = vld [vmem:[%s13572_s18 + $0x1c80] ss:$16 sps:$4 sm:$0xff]  }
 0x407   : > { %8869 = vmatprep.subr.bf16.mxu1 %v12091_v33  ;;  %v12125_v33 = vld [vmem:[%s13572_s18 + $0x1e80] ss:$16 sps:$4 sm:$0xff]  }
 0x409   : > { %8829 = vmatpush1.bf16.msra.mxu0 %v12086_v53  ;;  %v12130_v53 = vld [vmem:[%s13572_s18 + $0x1ca4] ss:$16 sps:$4 sm:$0xff]  }
 0x40a   : > { %8870 = vmatpush1.bf16.msra.mxu1 %v12089_v13  ;;  %8830 = vmatprep.subr.bf16.mxu0 %v12094_v41  ;;  %v12133_v13 = vld [vmem:[%s13572_s18 + $0x1ea4] ss:$16 sps:$4 sm:$0xff]   ;;  %v12128_v41 = vld [vmem:[%s13572_s18 + $0x1ca0] ss:$16 sps:$4 sm:$0xff]  }
 0x40b   : > { %8871 = vmatprep.subr.bf16.mxu1 %v12097_v14  ;;  %v12131_v14 = vld [vmem:[%s13572_s18 + $0x1ea0] ss:$16 sps:$4 sm:$0xff]  }
 0x40d   : > { %8831 = vmatpush1.bf16.msra.mxu0 %v12092_v45  ;;  %v12139_v45 = vld [vmem:[%s13572_s18 + $0x1ec4] ss:$16 sps:$4 sm:$0xff]  }
 0x40e   : > { %8872 = vmatpush1.bf16.msra.mxu1 %v12095_v46  ;;  %8882 = vmatprep.subr.bf16.mxu0 %v12100_v22 }
 0x40f   : > { %8923 = vmatprep.subr.bf16.mxu1 %v12103_v42  ;;  %v12134_v42 = vld [vmem:[%s13572_s18 + $0x1cc0] ss:$16 sps:$4 sm:$0xff]  }
 0x410   : > { %8833 = vmatmul.mubr.bf16.vlgmr.msra.gmra.mrb[32].mxu0 %v14547_v44 }
 0x411   : > { %8874 = vmatmul.mubr.bf16.vlgmr.msra.gmra.mrb[32].mxu1 %v14560_v15  ;;  %8883 = vmatpush1.bf16.msra.mxu0 %v12098_v55  ;;  %v12137_v55 = vld [vmem:[%s13572_s18 + $0x1ec0] ss:$16 sps:$4 sm:$0xff]  }
 0x412   : > { %8924 = vmatpush1.bf16.msra.mxu1 %v12101_v56  ;;  %8884 = vmatprep.subr.bf16.mxu0 %v12106_v12 }
 0x413   : > { %8925 = vmatprep.subr.bf16.mxu1 %v12109_v1  ;;  %8914 = vmatprep.mubr.bf16.mxu0 %v14556_v58 }
 0x414   : > { %8955 = vmatprep.mubr.bf16.mxu1 %v14566_v3 }
 0x415   : > { %8885 = vmatpush1.bf16.msra.mxu0 %v12104_v8 }
 0x416   : > { %8926 = vmatpush1.bf16.msra.mxu1 %v12107_v60  ;;  %8886 = vmatprep.subr.bf16.mxu0 %v12112_v11 }
 0x417   : > { %8927 = vmatprep.subr.bf16.mxu1 %v12115_v18 }
 0x419   : > { %8887 = vmatpush1.bf16.msra.mxu0 %v12110_v20 }
 0x41a   : > { %8928 = vmatpush1.bf16.msra.mxu1 %v12113_v21  ;;  %8888 = vmatprep.subr.bf16.mxu0 %v12118_v57  ;;  %v12145_v57 = vld [vmem:[%s13572_s18 + $0x1ee4] ss:$16 sps:$4 sm:$0xff]  }
 0x41b   : > { %8929 = vmatprep.subr.bf16.mxu1 %v12121_v23 }
 0x41d   : > { %8889 = vmatpush1.bf16.msra.mxu0 %v12116_v24  ;;  %v12143_v24 = vld [vmem:[%s13572_s18 + $0x1ee0] ss:$16 sps:$4 sm:$0xff]  }
 0x41e   : > { %8930 = vmatpush1.bf16.msra.mxu1 %v12119_v26  ;;  %8890 = vmatprep.subr.bf16.mxu0 %v12124_v28  ;;  %v12148_v26 = vld [vmem:[%s13572_s18 + $0x1d04] ss:$16 sps:$4 sm:$0xff]  }
 0x41f   : > { %8931 = vmatprep.subr.bf16.mxu1 %v12127_v36  ;;  %v12151_v28 = vld [vmem:[%s13572_s18 + $0x1f04] ss:$16 sps:$4 sm:$0xff]   ;;  %v12146_v36 = vld [vmem:[%s13572_s18 + $0x1d00] ss:$16 sps:$4 sm:$0xff]  }
 0x421   : > { %8891 = vmatpush1.bf16.msra.mxu0 %v12122_v38  ;;  %v12149_v38 = vld [vmem:[%s13572_s18 + $0x1f00] ss:$16 sps:$4 sm:$0xff]  }
 0x422   : > { %8932 = vmatpush1.bf16.msra.mxu1 %v12125_v33  ;;  %8892 = vmatprep.subr.bf16.mxu0 %v12130_v53  ;;  %v12154_v33 = vld [vmem:[%s13572_s18 + $0x1d24] ss:$16 sps:$4 sm:$0xff]  }
 0x423   : > { %8933 = vmatprep.subr.bf16.mxu1 %v12133_v13  ;;  %v8588_v46 = vpop.f32.mrb[20].mxu0  ;;  %v12157_v53 = vld [vmem:[%s13572_s18 + $0x1f24] ss:$16 sps:$4 sm:$0xff]   ;;  %v12152_v13 = vld [vmem:[%s13572_s18 + $0x1d20] ss:$16 sps:$4 sm:$0xff]  }
 0x424   : > { %v8629_v22 = vpop.f32.mrb[20].mxu1  ;;  %v8589_v56 = vadd.f32 %v8588_v46, %v14500_v32  ;;  %v8590_v12 = vpop.f32.mrb[21].mxu0  ;;  %v12142_v32 = vld [vmem:[%s13572_s18 + $0x1ce4] ss:$16 sps:$4 sm:$0xff]   ;;  %v12161_v46 = vld [vmem:[%s13572_s18 + $0x1f40] ss:$16 sps:$4 sm:$0xff]  }
 0x425   : > { %v8631_v1 = vpop.f32.mrb[21].mxu1  ;;  %v8591_v8 = vadd.f32 %v8590_v12, %v14504_v40  ;;  %v8592_v60 = vpop.f32.mrb[22].mxu0  ;;  %8893 = vmatpush1.bf16.msra.mxu0 %v12128_v41  ;;  %v12140_v40 = vld [vmem:[%s13572_s18 + $0x1ce0] ss:$16 sps:$4 sm:$0xff]   ;;  %v12172_v12 = vld [vmem:[%s13572_s18 + $0x1d84] ss:$16 sps:$4 sm:$0xff]  }
 0x426   : > { %v8633_v11 = vpop.f32.mrb[22].mxu1  ;;  %8934 = vmatpush1.bf16.msra.mxu1 %v12131_v14  ;;  %v14596_v18 = vadd.f32 %v8629_v22, %v8589_v56  ;;  %v8593_v20 = vpop.f32.mrb[23].mxu0  ;;  %8894 = vmatprep.subr.bf16.mxu0 %v12136_v16  ;;  %v12155_v41 = vld [vmem:[%s13572_s18 + $0x1f20] ss:$16 sps:$4 sm:$0xff]   ;;  %v12160_v14 = vld [vmem:[%s13572_s18 + $0x1d44] ss:$16 sps:$4 sm:$0xff]  }
 0x427   : > { %v8634_v21 = vpop.f32.mrb[23].mxu1  ;;  %8935 = vmatprep.subr.bf16.mxu1 %v12139_v45  ;;  %v14600_v23 = vadd.f32 %v8631_v1, %v8591_v8  ;;  %v12163_v16 = vld [vmem:[%s13572_s18 + $0x1f44] ss:$16 sps:$4 sm:$0xff]   ;;  %v12158_v45 = vld [vmem:[%s13572_s18 + $0x1d40] ss:$16 sps:$4 sm:$0xff]  }
 0x428   : > { %v12166_v22 = vld [vmem:[%s13572_s18 + $0x1d64] ss:$16 sps:$4 sm:$0xff]   ;;  %v12167_v56 = vld [vmem:[%s13572_s18 + $0x1f60] ss:$16 sps:$4 sm:$0xff]  }
 0x429   : > { %8895 = vmatpush1.bf16.msra.mxu0 %v12134_v42  ;;  %v12169_v42 = vld [vmem:[%s13572_s18 + $0x1f64] ss:$16 sps:$4 sm:$0xff]   ;;  %v12170_v8 = vld [vmem:[%s13572_s18 + $0x1d80] ss:$16 sps:$4 sm:$0xff]  }
 0x42a   : > { %8936 = vmatpush1.bf16.msra.mxu1 %v12137_v55  ;;  %8896 = vmatprep.subr.bf16.mxu0 %v12142_v32  ;;  %v12164_v55 = vld [vmem:[%s13572_s18 + $0x1d60] ss:$16 sps:$4 sm:$0xff]   ;;  %v12175_v1 = vld [vmem:[%s13572_s18 + $0x1f84] ss:$16 sps:$4 sm:$0xff]  }
 0x42b   : > { %8937 = vmatprep.subr.bf16.mxu1 %v12145_v57  ;;  %v12173_v60 = vld [vmem:[%s13572_s18 + $0x1f80] ss:$16 sps:$4 sm:$0xff]   ;;  %v12178_v11 = vld [vmem:[%s13572_s18 + $0x1da4] ss:$16 sps:$4 sm:$0xff]  }
 0x42c   : > { %v12181_v20 = vld [vmem:[%s13572_s18 + $0x1fa4] ss:$16 sps:$4 sm:$0xff]   ;;  %v12176_v21 = vld [vmem:[%s13572_s18 + $0x1da0] ss:$16 sps:$4 sm:$0xff]  }
 0x42d   : > { %8897 = vmatpush1.bf16.msra.mxu0 %v12140_v40  ;;  %v12179_v32 = vld [vmem:[%s13572_s18 + $0x1fa0] ss:$16 sps:$4 sm:$0xff]   ;;  %v12184_v57 = vld [vmem:[%s13572_s18 + $0x1dc4] ss:$16 sps:$4 sm:$0xff]  }
 0x42e   : > { %8938 = vmatpush1.bf16.msra.mxu1 %v12143_v24  ;;  %8898 = vmatprep.subr.bf16.mxu0 %v12148_v26  ;;  %v12187_v40 = vld [vmem:[%s13572_s18 + $0x1fc4] ss:$16 sps:$4 sm:$0xff]   ;;  %v12182_v24 = vld [vmem:[%s13572_s18 + $0x1dc0] ss:$16 sps:$4 sm:$0xff]  }
 0x42f   : > { %8939 = vmatprep.subr.bf16.mxu1 %v12151_v28  ;;  %v12185_v26 = vld [vmem:[%s13572_s18 + $0x1fc0] ss:$16 sps:$4 sm:$0xff]   ;;  %v12190_v28 = vld [vmem:[%s13572_s18 + $0x1de4] ss:$16 sps:$4 sm:$0xff]  }
 0x431   : > { %8899 = vmatpush1.bf16.msra.mxu0 %v12146_v36  ;;  %v12193_v36 = vld [vmem:[%s13572_s18 + $0x1fe4] ss:$16 sps:$4 sm:$0xff]  }
 0x432   : > { %8940 = vmatpush1.bf16.msra.mxu1 %v12149_v38  ;;  %8900 = vmatprep.subr.bf16.mxu0 %v12154_v33  ;;  %v14636_v38 = vrot.slane %v14537_v39, %v13796_v5  ;;  %v12188_v33 = vld [vmem:[%s13572_s18 + $0x1de0] ss:$16 sps:$4 sm:$0xff]   ;;  %v12203_v5 = vld [vmem:[%s13572_s18 + $0x2c] ss:$16 sps:$4 sm:$0xff]  }
 0x433   : > { %8941 = vmatprep.subr.bf16.mxu1 %v12157_v53  ;;  %v12191_v53 = vld [vmem:[%s13572_s18 + $0x1fe0] ss:$16 sps:$4 sm:$0xff]   ;;  %v12206_v39 = vld [vmem:[%s13572_s18 + $0x22c] ss:$16 sps:$4 sm:$0xff]  }
 0x435   : > { %8901 = vmatpush1.bf16.msra.mxu0 %v12152_v13  ;;  %v12197_v13 = vld [vmem:[%s13572_s18 + $0xc] ss:$16 sps:$4 sm:$0xff]  }
 0x436   : > { %8942 = vmatpush1.bf16.msra.mxu1 %v12155_v41  ;;  %8902 = vmatprep.subr.bf16.mxu0 %v12160_v14  ;;  %v12200_v41 = vld [vmem:[%s13572_s18 + $0x20c] ss:$16 sps:$4 sm:$0xff]   ;;  %v12195_v14 = vld [vmem:[%s13572_s18 + $0x8] ss:$16 sps:$4 sm:$0xff]  }
 0x437   : > { %8943 = vmatprep.subr.bf16.mxu1 %v12163_v16  ;;  %v12198_v16 = vld [vmem:[%s13572_s18 + $0x208] ss:$16 sps:$4 sm:$0xff]  }
 0x439   : > { %8903 = vmatpush1.bf16.msra.mxu0 %v12158_v45  ;;  %v14646_v45 = vcombine.high %v14636_v38, %v14636_v38 }
 0x43a   : > { %8944 = vmatpush1.bf16.msra.mxu1 %v12161_v46  ;;  %8904 = vmatprep.subr.bf16.mxu0 %v12166_v22  ;;  %v12201_v46 = vld [vmem:[%s13572_s18 + $0x28] ss:$16 sps:$4 sm:$0xff]  }
 0x43b   : > { %8945 = vmatprep.subr.bf16.mxu1 %v12169_v42  ;;  %v12204_v22 = vld [vmem:[%s13572_s18 + $0x228] ss:$16 sps:$4 sm:$0xff]   ;;  %v12209_v42 = vld [vmem:[%s13572_s18 + $0x4c] ss:$16 sps:$4 sm:$0xff]  }
 0x43d   : > { %8905 = vmatpush1.bf16.msra.mxu0 %v12164_v55  ;;  %v12212_v55 = vld [vmem:[%s13572_s18 + $0x24c] ss:$16 sps:$4 sm:$0xff]  }
 0x43e   : > { %8946 = vmatpush1.bf16.msra.mxu1 %v12167_v56  ;;  %8906 = vmatprep.subr.bf16.mxu0 %v12172_v12  ;;  %v12207_v56 = vld [vmem:[%s13572_s18 + $0x48] ss:$16 sps:$4 sm:$0xff]  }
 0x43f   : > { %8947 = vmatprep.subr.bf16.mxu1 %v12175_v1  ;;  %v12210_v12 = vld [vmem:[%s13572_s18 + $0x248] ss:$16 sps:$4 sm:$0xff]   ;;  %v12215_v1 = vld [vmem:[%s13572_s18 + $0x6c] ss:$16 sps:$4 sm:$0xff]  }
 0x441   : > { %8907 = vmatpush1.bf16.msra.mxu0 %v12170_v8  ;;  %v12218_v8 = vld [vmem:[%s13572_s18 + $0x26c] ss:$16 sps:$4 sm:$0xff]  }
 0x442   : > { %8948 = vmatpush1.bf16.msra.mxu1 %v12173_v60  ;;  %8908 = vmatprep.subr.bf16.mxu0 %v12178_v11  ;;  %v12216_v60 = vld [vmem:[%s13572_s18 + $0x268] ss:$16 sps:$4 sm:$0xff]   ;;  %v12224_v11 = vld [vmem:[%s13572_s18 + $0x28c] ss:$16 sps:$4 sm:$0xff]  }
 0x443   : > { %8949 = vmatprep.subr.bf16.mxu1 %v12181_v20  ;;  %v12219_v20 = vld [vmem:[%s13572_s18 + $0x88] ss:$16 sps:$4 sm:$0xff]  }
 0x445   : > { %8909 = vmatpush1.bf16.msra.mxu0 %v12176_v21  ;;  %v12222_v21 = vld [vmem:[%s13572_s18 + $0x288] ss:$16 sps:$4 sm:$0xff]  }
 0x446   : > { %8950 = vmatpush1.bf16.msra.mxu1 %v12179_v32  ;;  %8910 = vmatprep.subr.bf16.mxu0 %v12184_v57  ;;  %v12227_v32 = vld [vmem:[%s13572_s18 + $0xac] ss:$16 sps:$4 sm:$0xff]  }
 0x447   : > { %8951 = vmatprep.subr.bf16.mxu1 %v12187_v40  ;;  %v12230_v57 = vld [vmem:[%s13572_s18 + $0x2ac] ss:$16 sps:$4 sm:$0xff]   ;;  %v12225_v40 = vld [vmem:[%s13572_s18 + $0xa8] ss:$16 sps:$4 sm:$0xff]  }
 0x449   : > { %8911 = vmatpush1.bf16.msra.mxu0 %v12182_v24  ;;  %v12228_v24 = vld [vmem:[%s13572_s18 + $0x2a8] ss:$16 sps:$4 sm:$0xff]  }
 0x44a   : > { %8952 = vmatpush1.bf16.msra.mxu1 %v12185_v26  ;;  %8912 = vmatprep.subr.bf16.mxu0 %v12190_v28  ;;  %v12233_v26 = vld [vmem:[%s13572_s18 + $0xcc] ss:$16 sps:$4 sm:$0xff]  }
 0x44b   : > { %8953 = vmatprep.subr.bf16.mxu1 %v12193_v36  ;;  %v12236_v28 = vld [vmem:[%s13572_s18 + $0x2cc] ss:$16 sps:$4 sm:$0xff]  }
 0x44d   : > { %8913 = vmatpush1.bf16.msra.mxu0 %v12188_v33 }
 0x44e   : > { %8954 = vmatpush1.bf16.msra.mxu1 %v12191_v53  ;;  %8964 = vmatprep.subr.bf16.mxu0 %v12197_v13  ;;  %v12231_v53 = vld [vmem:[%s13572_s18 + $0xc8] ss:$16 sps:$4 sm:$0xff]  }
 0x44f   : > { %9005 = vmatprep.subr.bf16.mxu1 %v12200_v41  ;;  %v12234_v13 = vld [vmem:[%s13572_s18 + $0x2c8] ss:$16 sps:$4 sm:$0xff]  }
 0x450   : > { %8915 = vmatmul.mubr.bf16.vlgmr.msra.gmra.mrb[36].mxu0 %v14636_v38 }
 0x451   : > { %8956 = vmatmul.mubr.bf16.vlgmr.msra.gmra.mrb[36].mxu1 %v14646_v45  ;;  %8965 = vmatpush1.bf16.msra.mxu0 %v12195_v14 }
 0x452   : > { %9006 = vmatpush1.bf16.msra.mxu1 %v12198_v16  ;;  %8966 = vmatprep.subr.bf16.mxu0 %v12203_v5 }
 0x453   : > { %9007 = vmatprep.subr.bf16.mxu1 %v12206_v39  ;;  %8996 = vmatprep.mubr.bf16.mxu0 %v13919_v47  ;;  %v12213_v47 = vld [vmem:[%s13572_s18 + $0x68] ss:$16 sps:$4 sm:$0xff]  }
 0x454   : > { %9037 = vmatprep.mubr.bf16.mxu1 %v13925_v50  ;;  %v12221_v50 = vld [vmem:[%s13572_s18 + $0x8c] ss:$16 sps:$4 sm:$0xff]  }
 0x455   : > { %8967 = vmatpush1.bf16.msra.mxu0 %v12201_v46 }
 0x456   : > { %9008 = vmatpush1.bf16.msra.mxu1 %v12204_v22  ;;  %8968 = vmatprep.subr.bf16.mxu0 %v12209_v42 }
 0x457   : > { %9009 = vmatprep.subr.bf16.mxu1 %v12212_v55 }
 0x459   : > { %8969 = vmatpush1.bf16.msra.mxu0 %v12207_v56  ;;  %v12242_v56 = vld [vmem:[%s13572_s18 + $0x2ec] ss:$16 sps:$4 sm:$0xff]  }
 0x45a   : > { %9010 = vmatpush1.bf16.msra.mxu1 %v12210_v12  ;;  %8970 = vmatprep.subr.bf16.mxu0 %v12215_v1  ;;  %v12240_v1 = vld [vmem:[%s13572_s18 + $0x2e8] ss:$16 sps:$4 sm:$0xff]  }
 0x45b   : > { %9011 = vmatprep.subr.bf16.mxu1 %v12218_v8  ;;  %v12245_v8 = vld [vmem:[%s13572_s18 + $0x10c] ss:$16 sps:$4 sm:$0xff]  }
 0x45d   : > { %8971 = vmatpush1.bf16.msra.mxu0 %v12213_v47  ;;  %v12248_v47 = vld [vmem:[%s13572_s18 + $0x30c] ss:$16 sps:$4 sm:$0xff]  }
 0x45e   : > { %9012 = vmatpush1.bf16.msra.mxu1 %v12216_v60  ;;  %8972 = vmatprep.subr.bf16.mxu0 %v12221_v50  ;;  %v12243_v60 = vld [vmem:[%s13572_s18 + $0x108] ss:$16 sps:$4 sm:$0xff]  }
 0x45f   : > { %9013 = vmatprep.subr.bf16.mxu1 %v12224_v11  ;;  %v12246_v50 = vld [vmem:[%s13572_s18 + $0x308] ss:$16 sps:$4 sm:$0xff]   ;;  %v12251_v11 = vld [vmem:[%s13572_s18 + $0x12c] ss:$16 sps:$4 sm:$0xff]  }
 0x461   : > { %8973 = vmatpush1.bf16.msra.mxu0 %v12219_v20  ;;  %v12254_v20 = vld [vmem:[%s13572_s18 + $0x32c] ss:$16 sps:$4 sm:$0xff]  }
 0x462   : > { %9014 = vmatpush1.bf16.msra.mxu1 %v12222_v21  ;;  %8974 = vmatprep.subr.bf16.mxu0 %v12227_v32  ;;  %v12249_v21 = vld [vmem:[%s13572_s18 + $0x128] ss:$16 sps:$4 sm:$0xff]  }
 0x463   : > { %9015 = vmatprep.subr.bf16.mxu1 %v12230_v57  ;;  %v8670_v36 = vpop.f32.mrb[24].mxu0  ;;  %v12252_v32 = vld [vmem:[%s13572_s18 + $0x328] ss:$16 sps:$4 sm:$0xff]   ;;  %v12257_v57 = vld [vmem:[%s13572_s18 + $0x14c] ss:$16 sps:$4 sm:$0xff]  }
 0x464   : > { %v8711_v33 = vpop.f32.mrb[24].mxu1  ;;  %v8671_v41 = vadd.f32 %v8670_v36, %v14596_v18  ;;  %v8672_v14 = vpop.f32.mrb[25].mxu0  ;;  %v12239_v18 = vld [vmem:[%s13572_s18 + $0xec] ss:$16 sps:$4 sm:$0xff]  }
 0x465   : > { %v8713_v16 = vpop.f32.mrb[25].mxu1  ;;  %v8673_v5 = vadd.f32 %v8672_v14, %v14600_v23  ;;  %v8674_v39 = vpop.f32.mrb[26].mxu0  ;;  %8975 = vmatpush1.bf16.msra.mxu0 %v12225_v40  ;;  %v12237_v23 = vld [vmem:[%s13572_s18 + $0xe8] ss:$16 sps:$4 sm:$0xff]   ;;  %v12260_v40 = vld [vmem:[%s13572_s18 + $0x34c] ss:$16 sps:$4 sm:$0xff]  }
 0x466   : > { %v8715_v46 = vpop.f32.mrb[26].mxu1  ;;  %9016 = vmatpush1.bf16.msra.mxu1 %v12228_v24  ;;  %v14678_v22 = vadd.f32 %v8711_v33, %v8671_v41  ;;  %v8675_v42 = vpop.f32.mrb[27].mxu0  ;;  %8976 = vmatprep.subr.bf16.mxu0 %v12233_v26  ;;  %v12255_v24 = vld [vmem:[%s13572_s18 + $0x148] ss:$16 sps:$4 sm:$0xff]   ;;  %v12266_v36 = vld [vmem:[%s13572_s18 + $0x36c] ss:$16 sps:$4 sm:$0xff]  }
 0x467   : > { %v8716_v55 = vpop.f32.mrb[27].mxu1  ;;  %9017 = vmatprep.subr.bf16.mxu1 %v12236_v28  ;;  %v14682_v12 = vadd.f32 %v8713_v16, %v8673_v5  ;;  %v12258_v26 = vld [vmem:[%s13572_s18 + $0x348] ss:$16 sps:$4 sm:$0xff]   ;;  %v12263_v28 = vld [vmem:[%s13572_s18 + $0x16c] ss:$16 sps:$4 sm:$0xff]  }
 0x468   : > { %v12261_v33 = vld [vmem:[%s13572_s18 + $0x168] ss:$16 sps:$4 sm:$0xff]   ;;  %v12272_v41 = vld [vmem:[%s13572_s18 + $0x38c] ss:$16 sps:$4 sm:$0xff]  }
 0x469   : > { %8977 = vmatpush1.bf16.msra.mxu0 %v12231_v53  ;;  %v12264_v53 = vld [vmem:[%s13572_s18 + $0x368] ss:$16 sps:$4 sm:$0xff]   ;;  %v12275_v5 = vld [vmem:[%s13572_s18 + $0x1ac] ss:$16 sps:$4 sm:$0xff]  }
 0x46a   : > { %9018 = vmatpush1.bf16.msra.mxu1 %v12234_v13  ;;  %8978 = vmatprep.subr.bf16.mxu0 %v12239_v18  ;;  %v12269_v13 = vld [vmem:[%s13572_s18 + $0x18c] ss:$16 sps:$4 sm:$0xff]   ;;  %v12267_v14 = vld [vmem:[%s13572_s18 + $0x188] ss:$16 sps:$4 sm:$0xff]  }
 0x46b   : > { %9019 = vmatprep.subr.bf16.mxu1 %v12242_v56  ;;  %v12270_v16 = vld [vmem:[%s13572_s18 + $0x388] ss:$16 sps:$4 sm:$0xff]   ;;  %v12278_v39 = vld [vmem:[%s13572_s18 + $0x3ac] ss:$16 sps:$4 sm:$0xff]  }
 0x46c   : > { %v12273_v46 = vld [vmem:[%s13572_s18 + $0x1a8] ss:$16 sps:$4 sm:$0xff]   ;;  %v12281_v55 = vld [vmem:[%s13572_s18 + $0x1cc] ss:$16 sps:$4 sm:$0xff]  }
 0x46d   : > { %8979 = vmatpush1.bf16.msra.mxu0 %v12237_v23  ;;  %v12276_v42 = vld [vmem:[%s13572_s18 + $0x3a8] ss:$16 sps:$4 sm:$0xff]   ;;  %v12284_v18 = vld [vmem:[%s13572_s18 + $0x3cc] ss:$16 sps:$4 sm:$0xff]  }
 0x46e   : > { %9020 = vmatpush1.bf16.msra.mxu1 %v12240_v1  ;;  %8980 = vmatprep.subr.bf16.mxu0 %v12245_v8  ;;  %v12279_v56 = vld [vmem:[%s13572_s18 + $0x1c8] ss:$16 sps:$4 sm:$0xff]   ;;  %v12287_v1 = vld [vmem:[%s13572_s18 + $0x1ec] ss:$16 sps:$4 sm:$0xff]  }
 0x46f   : > { %9021 = vmatprep.subr.bf16.mxu1 %v12248_v47  ;;  %v12282_v23 = vld [vmem:[%s13572_s18 + $0x3c8] ss:$16 sps:$4 sm:$0xff]   ;;  %v12290_v8 = vld [vmem:[%s13572_s18 + $0x3ec] ss:$16 sps:$4 sm:$0xff]  }
 0x470   : > { %v12285_v47 = vld [vmem:[%s13572_s18 + $0x1e8] ss:$16 sps:$4 sm:$0xff]  }
 0x471   : > { %8981 = vmatpush1.bf16.msra.mxu0 %v12243_v60  ;;  %v12288_v60 = vld [vmem:[%s13572_s18 + $0x3e8] ss:$16 sps:$4 sm:$0xff]  }
 0x472   : > { %9022 = vmatpush1.bf16.msra.mxu1 %v12246_v50  ;;  %8982 = vmatprep.subr.bf16.mxu0 %v12251_v11  ;;  %v12293_v50 = vld [vmem:[%s13572_s18 + $0x40c] ss:$16 sps:$4 sm:$0xff]  }
 0x473   : > { %9023 = vmatprep.subr.bf16.mxu1 %v12254_v20  ;;  %v12296_v11 = vld [vmem:[%s13572_s18 + $0x60c] ss:$16 sps:$4 sm:$0xff]   ;;  %v12291_v20 = vld [vmem:[%s13572_s18 + $0x408] ss:$16 sps:$4 sm:$0xff]  }
 0x475   : > { %8983 = vmatpush1.bf16.msra.mxu0 %v12249_v21  ;;  %v12294_v21 = vld [vmem:[%s13572_s18 + $0x608] ss:$16 sps:$4 sm:$0xff]  }
 0x476   : > { %9024 = vmatpush1.bf16.msra.mxu1 %v12252_v32  ;;  %8984 = vmatprep.subr.bf16.mxu0 %v12257_v57  ;;  %v12299_v32 = vld [vmem:[%s13572_s18 + $0x42c] ss:$16 sps:$4 sm:$0xff]  }
 0x477   : > { %9025 = vmatprep.subr.bf16.mxu1 %v12260_v40  ;;  %v12302_v57 = vld [vmem:[%s13572_s18 + $0x62c] ss:$16 sps:$4 sm:$0xff]   ;;  %v12297_v40 = vld [vmem:[%s13572_s18 + $0x428] ss:$16 sps:$4 sm:$0xff]  }
 0x479   : > { %8985 = vmatpush1.bf16.msra.mxu0 %v12255_v24  ;;  %v12300_v24 = vld [vmem:[%s13572_s18 + $0x628] ss:$16 sps:$4 sm:$0xff]  }
 0x47a   : > { %9026 = vmatpush1.bf16.msra.mxu1 %v12258_v26  ;;  %8986 = vmatprep.subr.bf16.mxu0 %v12263_v28  ;;  %v12305_v26 = vld [vmem:[%s13572_s18 + $0x44c] ss:$16 sps:$4 sm:$0xff]  }
 0x47b   : > { %9027 = vmatprep.subr.bf16.mxu1 %v12266_v36  ;;  %v12308_v28 = vld [vmem:[%s13572_s18 + $0x64c] ss:$16 sps:$4 sm:$0xff]  }
 0x47c   : > { %v12311_v36 = vld [vmem:[%s13572_s18 + $0x46c] ss:$16 sps:$4 sm:$0xff]  }
 0x47d   : > { %8987 = vmatpush1.bf16.msra.mxu0 %v12261_v33  ;;  %v12314_v33 = vld [vmem:[%s13572_s18 + $0x66c] ss:$16 sps:$4 sm:$0xff]  }
 0x47e   : > { %9028 = vmatpush1.bf16.msra.mxu1 %v12264_v53  ;;  %8988 = vmatprep.subr.bf16.mxu0 %v12269_v13  ;;  %v12309_v53 = vld [vmem:[%s13572_s18 + $0x468] ss:$16 sps:$4 sm:$0xff]   ;;  %v12320_v13 = vld [vmem:[%s13572_s18 + $0x68c] ss:$16 sps:$4 sm:$0xff]  }
 0x47f   : > { %9029 = vmatprep.subr.bf16.mxu1 %v12272_v41  ;;  %v12315_v41 = vld [vmem:[%s13572_s18 + $0x488] ss:$16 sps:$4 sm:$0xff]  }
 0x481   : > { %8989 = vmatpush1.bf16.msra.mxu0 %v12267_v14  ;;  %v12318_v14 = vld [vmem:[%s13572_s18 + $0x688] ss:$16 sps:$4 sm:$0xff]  }
 0x482   : > { %9030 = vmatpush1.bf16.msra.mxu1 %v12270_v16  ;;  %8990 = vmatprep.subr.bf16.mxu0 %v12275_v5  ;;  %v12323_v16 = vld [vmem:[%s13572_s18 + $0x4ac] ss:$16 sps:$4 sm:$0xff]  }
 0x483   : > { %9031 = vmatprep.subr.bf16.mxu1 %v12278_v39  ;;  %v12326_v5 = vld [vmem:[%s13572_s18 + $0x6ac] ss:$16 sps:$4 sm:$0xff]   ;;  %v12321_v39 = vld [vmem:[%s13572_s18 + $0x4a8] ss:$16 sps:$4 sm:$0xff]  }
 0x485   : > { %8991 = vmatpush1.bf16.msra.mxu0 %v12273_v46  ;;  %v12324_v46 = vld [vmem:[%s13572_s18 + $0x6a8] ss:$16 sps:$4 sm:$0xff]  }
 0x486   : > { %9032 = vmatpush1.bf16.msra.mxu1 %v12276_v42  ;;  %8992 = vmatprep.subr.bf16.mxu0 %v12281_v55  ;;  %v12329_v42 = vld [vmem:[%s13572_s18 + $0x4cc] ss:$16 sps:$4 sm:$0xff]  }
 0x487   : > { %9033 = vmatprep.subr.bf16.mxu1 %v12284_v18  ;;  %v12332_v55 = vld [vmem:[%s13572_s18 + $0x6cc] ss:$16 sps:$4 sm:$0xff]  }
 0x489   : > { %8993 = vmatpush1.bf16.msra.mxu0 %v12279_v56 }
 0x48a   : > { %9034 = vmatpush1.bf16.msra.mxu1 %v12282_v23  ;;  %8994 = vmatprep.subr.bf16.mxu0 %v12287_v1 }
 0x48b   : > { %9035 = vmatprep.subr.bf16.mxu1 %v12290_v8 }
 0x48d   : > { %8995 = vmatpush1.bf16.msra.mxu0 %v12285_v47 }
 0x48e   : > { %9036 = vmatpush1.bf16.msra.mxu1 %v12288_v60  ;;  %9046 = vmatprep.subr.bf16.mxu0 %v12293_v50 }
 0x48f   : > { %9087 = vmatprep.subr.bf16.mxu1 %v12296_v11  ;;  %v12327_v11 = vld [vmem:[%s13572_s18 + $0x4c8] ss:$16 sps:$4 sm:$0xff]  }
 0x490   : > { %8997 = vmatmul.mubr.bf16.vlgmr.msra.gmra.mrb[40].mxu0 %v13972_v27  ;;  %v12303_v27 = vld [vmem:[%s13572_s18 + $0x448] ss:$16 sps:$4 sm:$0xff]  }
 0x491   : > { %9038 = vmatmul.mubr.bf16.vlgmr.msra.gmra.mrb[40].mxu1 %v13983_v31  ;;  %9047 = vmatpush1.bf16.msra.mxu0 %v12291_v20  ;;  %v12306_v31 = vld [vmem:[%s13572_s18 + $0x648] ss:$16 sps:$4 sm:$0xff]  }
 0x492   : > { %9088 = vmatpush1.bf16.msra.mxu1 %v12294_v21  ;;  %9048 = vmatprep.subr.bf16.mxu0 %v12299_v32  ;;  %v12330_v20 = vld [vmem:[%s13572_s18 + $0x6c8] ss:$16 sps:$4 sm:$0xff]  }
 0x493   : > { %9089 = vmatprep.subr.bf16.mxu1 %v12302_v57  ;;  %9078 = vmatprep.mubr.bf16.mxu0 %v13979_v30  ;;  %v12312_v30 = vld [vmem:[%s13572_s18 + $0x668] ss:$16 sps:$4 sm:$0xff]  }
 0x494   : > { %9119 = vmatprep.mubr.bf16.mxu1 %v13991_v37  ;;  %v12317_v37 = vld [vmem:[%s13572_s18 + $0x48c] ss:$16 sps:$4 sm:$0xff]  }
 0x495   : > { %9049 = vmatpush1.bf16.msra.mxu0 %v12297_v40 }
 0x496   : > { %9090 = vmatpush1.bf16.msra.mxu1 %v12300_v24  ;;  %9050 = vmatprep.subr.bf16.mxu0 %v12305_v26  ;;  %v12333_v24 = vld [vmem:[%s13572_s18 + $0x4e8] ss:$16 sps:$4 sm:$0xff]  }
 0x497   : > { %9091 = vmatprep.subr.bf16.mxu1 %v12308_v28  ;;  %v12336_v26 = vld [vmem:[%s13572_s18 + $0x6e8] ss:$16 sps:$4 sm:$0xff]   ;;  %v12341_v28 = vld [vmem:[%s13572_s18 + $0x50c] ss:$16 sps:$4 sm:$0xff]  }
 0x499   : > { %9051 = vmatpush1.bf16.msra.mxu0 %v12303_v27  ;;  %v12344_v27 = vld [vmem:[%s13572_s18 + $0x70c] ss:$16 sps:$4 sm:$0xff]  }
 0x49a   : > { %9092 = vmatpush1.bf16.msra.mxu1 %v12306_v31  ;;  %9052 = vmatprep.subr.bf16.mxu0 %v12311_v36  ;;  %v12339_v31 = vld [vmem:[%s13572_s18 + $0x508] ss:$16 sps:$4 sm:$0xff]  }
 0x49b   : > { %9093 = vmatprep.subr.bf16.mxu1 %v12314_v33  ;;  %v12342_v36 = vld [vmem:[%s13572_s18 + $0x708] ss:$16 sps:$4 sm:$0xff]   ;;  %v12347_v33 = vld [vmem:[%s13572_s18 + $0x52c] ss:$16 sps:$4 sm:$0xff]  }
 0x49d   : > { %9053 = vmatpush1.bf16.msra.mxu0 %v12309_v53  ;;  %v12350_v53 = vld [vmem:[%s13572_s18 + $0x72c] ss:$16 sps:$4 sm:$0xff]  }
 0x49e   : > { %9094 = vmatpush1.bf16.msra.mxu1 %v12312_v30  ;;  %9054 = vmatprep.subr.bf16.mxu0 %v12317_v37  ;;  %v12345_v30 = vld [vmem:[%s13572_s18 + $0x528] ss:$16 sps:$4 sm:$0xff]  }
 0x49f   : > { %9095 = vmatprep.subr.bf16.mxu1 %v12320_v13  ;;  %v12348_v37 = vld [vmem:[%s13572_s18 + $0x728] ss:$16 sps:$4 sm:$0xff]   ;;  %v12353_v13 = vld [vmem:[%s13572_s18 + $0x54c] ss:$16 sps:$4 sm:$0xff]  }
 0x4a1   : > { %9055 = vmatpush1.bf16.msra.mxu0 %v12315_v41  ;;  %v12356_v41 = vld [vmem:[%s13572_s18 + $0x74c] ss:$16 sps:$4 sm:$0xff]  }
 0x4a2   : > { %9096 = vmatpush1.bf16.msra.mxu1 %v12318_v14  ;;  %9056 = vmatprep.subr.bf16.mxu0 %v12323_v16  ;;  %v12351_v14 = vld [vmem:[%s13572_s18 + $0x548] ss:$16 sps:$4 sm:$0xff]  }
 0x4a3   : > { %9097 = vmatprep.subr.bf16.mxu1 %v12326_v5  ;;  %v8752_v18 = vpop.f32.mrb[28].mxu0  ;;  %v12354_v16 = vld [vmem:[%s13572_s18 + $0x748] ss:$16 sps:$4 sm:$0xff]   ;;  %v12359_v5 = vld [vmem:[%s13572_s18 + $0x56c] ss:$16 sps:$4 sm:$0xff]  }
 0x4a4   : > { %v8793_v56 = vpop.f32.mrb[28].mxu1  ;;  %v8753_v23 = vadd.f32 %v8752_v18, %v14678_v22  ;;  %v8754_v1 = vpop.f32.mrb[29].mxu0  ;;  %v12335_v22 = vld [vmem:[%s13572_s18 + $0x4ec] ss:$16 sps:$4 sm:$0xff]  }
 0x4a5   : > { %v8795_v8 = vpop.f32.mrb[29].mxu1  ;;  %v8755_v47 = vadd.f32 %v8754_v1, %v14682_v12  ;;  %v8756_v60 = vpop.f32.mrb[30].mxu0  ;;  %9057 = vmatpush1.bf16.msra.mxu0 %v12321_v39  ;;  %v12338_v12 = vld [vmem:[%s13572_s18 + $0x6ec] ss:$16 sps:$4 sm:$0xff]  }
 0x4a6   : > { %v8797_v50 = vpop.f32.mrb[30].mxu1  ;;  %9098 = vmatpush1.bf16.msra.mxu1 %v12324_v46  ;;  %v14752_v21 = vadd.f32 %v8793_v56, %v8753_v23  ;;  %v8757_v32 = vpop.f32.mrb[31].mxu0  ;;  %9058 = vmatprep.subr.bf16.mxu0 %v12329_v42  ;;  %v12362_v39 = vld [vmem:[%s13572_s18 + $0x76c] ss:$16 sps:$4 sm:$0xff]   ;;  %v12357_v46 = vld [vmem:[%s13572_s18 + $0x568] ss:$16 sps:$4 sm:$0xff]  }
 0x4a7   : > { %v8798_v57 = vpop.f32.mrb[31].mxu1  ;;  %9099 = vmatprep.subr.bf16.mxu1 %v12332_v55  ;;  %v14756_v40 = vadd.f32 %v8795_v8, %v8755_v47  ;;  %v12360_v42 = vld [vmem:[%s13572_s18 + $0x768] ss:$16 sps:$4 sm:$0xff]   ;;  %v12365_v55 = vld [vmem:[%s13572_s18 + $0x58c] ss:$16 sps:$4 sm:$0xff]  }
 0x4a8   : > { %v12368_v18 = vld [vmem:[%s13572_s18 + $0x78c] ss:$16 sps:$4 sm:$0xff]   ;;  %v12363_v56 = vld [vmem:[%s13572_s18 + $0x588] ss:$16 sps:$4 sm:$0xff]  }
 0x4a9   : > { %9059 = vmatpush1.bf16.msra.mxu0 %v12327_v11  ;;  %v12366_v23 = vld [vmem:[%s13572_s18 + $0x788] ss:$16 sps:$4 sm:$0xff]   ;;  %v12371_v1 = vld [vmem:[%s13572_s18 + $0x5ac] ss:$16 sps:$4 sm:$0xff]  }
 0x4aa   : > { %9100 = vmatpush1.bf16.msra.mxu1 %v12330_v20  ;;  %9060 = vmatprep.subr.bf16.mxu0 %v12335_v22  ;;  %v12374_v8 = vld [vmem:[%s13572_s18 + $0x7ac] ss:$16 sps:$4 sm:$0xff]   ;;  %v12369_v47 = vld [vmem:[%s13572_s18 + $0x5a8] ss:$16 sps:$4 sm:$0xff]  }
 0x4ab   : > { %9101 = vmatprep.subr.bf16.mxu1 %v12338_v12  ;;  %v12372_v60 = vld [vmem:[%s13572_s18 + $0x7a8] ss:$16 sps:$4 sm:$0xff]   ;;  %v12377_v50 = vld [vmem:[%s13572_s18 + $0x5cc] ss:$16 sps:$4 sm:$0xff]  }
 0x4ac   : > { %v12380_v11 = vld [vmem:[%s13572_s18 + $0x7cc] ss:$16 sps:$4 sm:$0xff]   ;;  %v12375_v20 = vld [vmem:[%s13572_s18 + $0x5c8] ss:$16 sps:$4 sm:$0xff]  }
 0x4ad   : > { %9061 = vmatpush1.bf16.msra.mxu0 %v12333_v24  ;;  %v12378_v32 = vld [vmem:[%s13572_s18 + $0x7c8] ss:$16 sps:$4 sm:$0xff]   ;;  %v12383_v57 = vld [vmem:[%s13572_s18 + $0x5ec] ss:$16 sps:$4 sm:$0xff]  }
 0x4ae   : > { %9102 = vmatpush1.bf16.msra.mxu1 %v12336_v26  ;;  %9062 = vmatprep.subr.bf16.mxu0 %v12341_v28  ;;  %v12386_v22 = vld [vmem:[%s13572_s18 + $0x7ec] ss:$16 sps:$4 sm:$0xff]   ;;  %v12381_v12 = vld [vmem:[%s13572_s18 + $0x5e8] ss:$16 sps:$4 sm:$0xff]  }
 0x4af   : > { %9103 = vmatprep.subr.bf16.mxu1 %v12344_v27  ;;  %v12384_v24 = vld [vmem:[%s13572_s18 + $0x7e8] ss:$16 sps:$4 sm:$0xff]   ;;  %v12389_v26 = vld [vmem:[%s13572_s18 + $0x80c] ss:$16 sps:$4 sm:$0xff]  }
 0x4b0   : > { %v12392_v28 = vld [vmem:[%s13572_s18 + $0xa0c] ss:$16 sps:$4 sm:$0xff]   ;;  %v12387_v27 = vld [vmem:[%s13572_s18 + $0x808] ss:$16 sps:$4 sm:$0xff]  }
 0x4b1   : > { %9063 = vmatpush1.bf16.msra.mxu0 %v12339_v31  ;;  %v12390_v31 = vld [vmem:[%s13572_s18 + $0xa08] ss:$16 sps:$4 sm:$0xff]  }
 0x4b2   : > { %9104 = vmatpush1.bf16.msra.mxu1 %v12342_v36  ;;  %9064 = vmatprep.subr.bf16.mxu0 %v12347_v33  ;;  %v12395_v36 = vld [vmem:[%s13572_s18 + $0x82c] ss:$16 sps:$4 sm:$0xff]  }
 0x4b3   : > { %9105 = vmatprep.subr.bf16.mxu1 %v12350_v53  ;;  %v12398_v33 = vld [vmem:[%s13572_s18 + $0xa2c] ss:$16 sps:$4 sm:$0xff]   ;;  %v12393_v53 = vld [vmem:[%s13572_s18 + $0x828] ss:$16 sps:$4 sm:$0xff]  }
 0x4b5   : > { %9065 = vmatpush1.bf16.msra.mxu0 %v12345_v30  ;;  %v12396_v30 = vld [vmem:[%s13572_s18 + $0xa28] ss:$16 sps:$4 sm:$0xff]  }
 0x4b6   : > { %9106 = vmatpush1.bf16.msra.mxu1 %v12348_v37  ;;  %9066 = vmatprep.subr.bf16.mxu0 %v12353_v13  ;;  %v12401_v37 = vld [vmem:[%s13572_s18 + $0x84c] ss:$16 sps:$4 sm:$0xff]  }
 0x4b7   : > { %9107 = vmatprep.subr.bf16.mxu1 %v12356_v41  ;;  %v12404_v13 = vld [vmem:[%s13572_s18 + $0xa4c] ss:$16 sps:$4 sm:$0xff]  }
 0x4b8   : > { %v12407_v41 = vld [vmem:[%s13572_s18 + $0x86c] ss:$16 sps:$4 sm:$0xff]  }
 0x4b9   : > { %9067 = vmatpush1.bf16.msra.mxu0 %v12351_v14  ;;  %v12410_v14 = vld [vmem:[%s13572_s18 + $0xa6c] ss:$16 sps:$4 sm:$0xff]  }
 0x4ba   : > { %9108 = vmatpush1.bf16.msra.mxu1 %v12354_v16  ;;  %9068 = vmatprep.subr.bf16.mxu0 %v12359_v5  ;;  %v12405_v16 = vld [vmem:[%s13572_s18 + $0x868] ss:$16 sps:$4 sm:$0xff]   ;;  %v12416_v5 = vld [vmem:[%s13572_s18 + $0xa8c] ss:$16 sps:$4 sm:$0xff]  }
 0x4bb   : > { %9109 = vmatprep.subr.bf16.mxu1 %v12362_v39  ;;  %v12411_v39 = vld [vmem:[%s13572_s18 + $0x888] ss:$16 sps:$4 sm:$0xff]  }
 0x4bd   : > { %9069 = vmatpush1.bf16.msra.mxu0 %v12357_v46  ;;  %v12414_v46 = vld [vmem:[%s13572_s18 + $0xa88] ss:$16 sps:$4 sm:$0xff]  }
 0x4be   : > { %9110 = vmatpush1.bf16.msra.mxu1 %v12360_v42  ;;  %9070 = vmatprep.subr.bf16.mxu0 %v12365_v55  ;;  %v12419_v42 = vld [vmem:[%s13572_s18 + $0x8ac] ss:$16 sps:$4 sm:$0xff]  }
 0x4bf   : > { %9111 = vmatprep.subr.bf16.mxu1 %v12368_v18  ;;  %v12422_v55 = vld [vmem:[%s13572_s18 + $0xaac] ss:$16 sps:$4 sm:$0xff]   ;;  %v12417_v18 = vld [vmem:[%s13572_s18 + $0x8a8] ss:$16 sps:$4 sm:$0xff]  }
 0x4c1   : > { %9071 = vmatpush1.bf16.msra.mxu0 %v12363_v56  ;;  %v12420_v56 = vld [vmem:[%s13572_s18 + $0xaa8] ss:$16 sps:$4 sm:$0xff]  }
 0x4c2   : > { %9112 = vmatpush1.bf16.msra.mxu1 %v12366_v23  ;;  %9072 = vmatprep.subr.bf16.mxu0 %v12371_v1  ;;  %v12425_v23 = vld [vmem:[%s13572_s18 + $0x8cc] ss:$16 sps:$4 sm:$0xff]  }
 0x4c3   : > { %9113 = vmatprep.subr.bf16.mxu1 %v12374_v8  ;;  %v12428_v1 = vld [vmem:[%s13572_s18 + $0xacc] ss:$16 sps:$4 sm:$0xff]  }
 0x4c5   : > { %9073 = vmatpush1.bf16.msra.mxu0 %v12369_v47 }
 0x4c6   : > { %9114 = vmatpush1.bf16.msra.mxu1 %v12372_v60  ;;  %9074 = vmatprep.subr.bf16.mxu0 %v12377_v50 }
 0x4c7   : > { %9115 = vmatprep.subr.bf16.mxu1 %v12380_v11 }
 0x4c9   : > { %9075 = vmatpush1.bf16.msra.mxu0 %v12375_v20 }
 0x4ca   : > { %9116 = vmatpush1.bf16.msra.mxu1 %v12378_v32  ;;  %9076 = vmatprep.subr.bf16.mxu0 %v12383_v57 }
 0x4cb   : > { %9117 = vmatprep.subr.bf16.mxu1 %v12386_v22  ;;  %v12423_v22 = vld [vmem:[%s13572_s18 + $0x8c8] ss:$16 sps:$4 sm:$0xff]  }
 0x4cd   : > { %9077 = vmatpush1.bf16.msra.mxu0 %v12381_v12  ;;  %v12426_v12 = vld [vmem:[%s13572_s18 + $0xac8] ss:$16 sps:$4 sm:$0xff]  }
 0x4ce   : > { %9118 = vmatpush1.bf16.msra.mxu1 %v12384_v24  ;;  %9128 = vmatprep.subr.bf16.mxu0 %v12389_v26 }
 0x4cf   : > { %9169 = vmatprep.subr.bf16.mxu1 %v12392_v28 }
 0x4d0   : > { %9079 = vmatmul.mubr.bf16.vlgmr.msra.gmra.mrb[44].mxu0 %v14064_v43  ;;  %v12399_v43 = vld [vmem:[%s13572_s18 + $0x848] ss:$16 sps:$4 sm:$0xff]  }
 0x4d1   : > { %9120 = vmatmul.mubr.bf16.vlgmr.msra.gmra.mrb[44].mxu1 %v14074_v49  ;;  %9129 = vmatpush1.bf16.msra.mxu0 %v12387_v27  ;;  %v12402_v49 = vld [vmem:[%s13572_s18 + $0xa48] ss:$16 sps:$4 sm:$0xff]  }
 0x4d2   : > { %9170 = vmatpush1.bf16.msra.mxu1 %v12390_v31  ;;  %9130 = vmatprep.subr.bf16.mxu0 %v12395_v36  ;;  %v12429_v31 = vld [vmem:[%s13572_s18 + $0x8e8] ss:$16 sps:$4 sm:$0xff]  }
 0x4d3   : > { %9171 = vmatprep.subr.bf16.mxu1 %v12398_v33  ;;  %9160 = vmatprep.mubr.bf16.mxu0 %v14070_v48  ;;  %v12408_v48 = vld [vmem:[%s13572_s18 + $0xa68] ss:$16 sps:$4 sm:$0xff]   ;;  %v12437_v33 = vld [vmem:[%s13572_s18 + $0x90c] ss:$16 sps:$4 sm:$0xff]  }
 0x4d4   : > { %9201 = vmatprep.mubr.bf16.mxu1 %v14082_v54  ;;  %v12413_v54 = vld [vmem:[%s13572_s18 + $0x88c] ss:$16 sps:$4 sm:$0xff]   ;;  %v12432_v36 = vld [vmem:[%s13572_s18 + $0xae8] ss:$16 sps:$4 sm:$0xff]  }
 0x4d5   : > { %9131 = vmatpush1.bf16.msra.mxu0 %v12393_v53  ;;  %v12440_v53 = vld [vmem:[%s13572_s18 + $0xb0c] ss:$16 sps:$4 sm:$0xff]  }
 0x4d6   : > { %9172 = vmatpush1.bf16.msra.mxu1 %v12396_v30  ;;  %9132 = vmatprep.subr.bf16.mxu0 %v12401_v37  ;;  %v12435_v30 = vld [vmem:[%s13572_s18 + $0x908] ss:$16 sps:$4 sm:$0xff]  }
 0x4d7   : > { %9173 = vmatprep.subr.bf16.mxu1 %v12404_v13  ;;  %v12438_v37 = vld [vmem:[%s13572_s18 + $0xb08] ss:$16 sps:$4 sm:$0xff]   ;;  %v12443_v13 = vld [vmem:[%s13572_s18 + $0x92c] ss:$16 sps:$4 sm:$0xff]  }
 0x4d9   : > { %9133 = vmatpush1.bf16.msra.mxu0 %v12399_v43  ;;  %v12446_v43 = vld [vmem:[%s13572_s18 + $0xb2c] ss:$16 sps:$4 sm:$0xff]  }
 0x4da   : > { %9174 = vmatpush1.bf16.msra.mxu1 %v12402_v49  ;;  %9134 = vmatprep.subr.bf16.mxu0 %v12407_v41  ;;  %v12441_v49 = vld [vmem:[%s13572_s18 + $0x928] ss:$16 sps:$4 sm:$0xff]  }
 0x4db   : > { %9175 = vmatprep.subr.bf16.mxu1 %v12410_v14  ;;  %v12444_v41 = vld [vmem:[%s13572_s18 + $0xb28] ss:$16 sps:$4 sm:$0xff]   ;;  %v12449_v14 = vld [vmem:[%s13572_s18 + $0x94c] ss:$16 sps:$4 sm:$0xff]  }
 0x4dd   : > { %9135 = vmatpush1.bf16.msra.mxu0 %v12405_v16  ;;  %v12452_v16 = vld [vmem:[%s13572_s18 + $0xb4c] ss:$16 sps:$4 sm:$0xff]  }
 0x4de   : > { %9176 = vmatpush1.bf16.msra.mxu1 %v12408_v48  ;;  %9136 = vmatprep.subr.bf16.mxu0 %v12413_v54  ;;  %v12447_v48 = vld [vmem:[%s13572_s18 + $0x948] ss:$16 sps:$4 sm:$0xff]  }
 0x4df   : > { %9177 = vmatprep.subr.bf16.mxu1 %v12416_v5  ;;  %v12450_v54 = vld [vmem:[%s13572_s18 + $0xb48] ss:$16 sps:$4 sm:$0xff]   ;;  %v12455_v5 = vld [vmem:[%s13572_s18 + $0x96c] ss:$16 sps:$4 sm:$0xff]  }
 0x4e1   : > { %9137 = vmatpush1.bf16.msra.mxu0 %v12411_v39  ;;  %v12458_v39 = vld [vmem:[%s13572_s18 + $0xb6c] ss:$16 sps:$4 sm:$0xff]  }
 0x4e2   : > { %9178 = vmatpush1.bf16.msra.mxu1 %v12414_v46  ;;  %9138 = vmatprep.subr.bf16.mxu0 %v12419_v42  ;;  %v12453_v46 = vld [vmem:[%s13572_s18 + $0x968] ss:$16 sps:$4 sm:$0xff]  }
 0x4e3   : > { %9179 = vmatprep.subr.bf16.mxu1 %v12422_v55  ;;  %v8834_v8 = vpop.f32.mrb[32].mxu0  ;;  %v12456_v42 = vld [vmem:[%s13572_s18 + $0xb68] ss:$16 sps:$4 sm:$0xff]   ;;  %v12461_v55 = vld [vmem:[%s13572_s18 + $0x98c] ss:$16 sps:$4 sm:$0xff]  }
 0x4e4   : > { %v8875_v47 = vpop.f32.mrb[32].mxu1  ;;  %v8835_v60 = vadd.f32 %v8834_v8, %v14752_v21  ;;  %v8836_v50 = vpop.f32.mrb[33].mxu0  ;;  %v12431_v21 = vld [vmem:[%s13572_s18 + $0x8ec] ss:$16 sps:$4 sm:$0xff]  }
 0x4e5   : > { %v8877_v11 = vpop.f32.mrb[33].mxu1  ;;  %v8837_v20 = vadd.f32 %v8836_v50, %v14756_v40  ;;  %v8838_v32 = vpop.f32.mrb[34].mxu0  ;;  %9139 = vmatpush1.bf16.msra.mxu0 %v12417_v18  ;;  %v12434_v40 = vld [vmem:[%s13572_s18 + $0xaec] ss:$16 sps:$4 sm:$0xff]  }
 0x4e6   : > { %v8879_v57 = vpop.f32.mrb[34].mxu1  ;;  %9180 = vmatpush1.bf16.msra.mxu1 %v12420_v56  ;;  %v14826_v24 = vadd.f32 %v8875_v47, %v8835_v60  ;;  %v8839_v26 = vpop.f32.mrb[35].mxu0  ;;  %9140 = vmatprep.subr.bf16.mxu0 %v12425_v23  ;;  %v12464_v18 = vld [vmem:[%s13572_s18 + $0xb8c] ss:$16 sps:$4 sm:$0xff]   ;;  %v12459_v56 = vld [vmem:[%s13572_s18 + $0x988] ss:$16 sps:$4 sm:$0xff]  }
 0x4e7   : > { %v8880_v28 = vpop.f32.mrb[35].mxu1  ;;  %9181 = vmatprep.subr.bf16.mxu1 %v12428_v1  ;;  %v14830_v27 = vadd.f32 %v8877_v11, %v8837_v20  ;;  %v12462_v23 = vld [vmem:[%s13572_s18 + $0xb88] ss:$16 sps:$4 sm:$0xff]   ;;  %v12467_v1 = vld [vmem:[%s13572_s18 + $0x9ac] ss:$16 sps:$4 sm:$0xff]  }
 0x4e8   : > { %v12470_v8 = vld [vmem:[%s13572_s18 + $0xbac] ss:$16 sps:$4 sm:$0xff]   ;;  %v12465_v47 = vld [vmem:[%s13572_s18 + $0x9a8] ss:$16 sps:$4 sm:$0xff]  }
 0x4e9   : > { %9141 = vmatpush1.bf16.msra.mxu0 %v12423_v22  ;;  %v12468_v60 = vld [vmem:[%s13572_s18 + $0xba8] ss:$16 sps:$4 sm:$0xff]   ;;  %v12473_v50 = vld [vmem:[%s13572_s18 + $0x9cc] ss:$16 sps:$4 sm:$0xff]  }
 0x4ea   : > { %9182 = vmatpush1.bf16.msra.mxu1 %v12426_v12  ;;  %9142 = vmatprep.subr.bf16.mxu0 %v12431_v21  ;;  %v12476_v11 = vld [vmem:[%s13572_s18 + $0xbcc] ss:$16 sps:$4 sm:$0xff]   ;;  %v12471_v20 = vld [vmem:[%s13572_s18 + $0x9c8] ss:$16 sps:$4 sm:$0xff]  }
 0x4eb   : > { %9183 = vmatprep.subr.bf16.mxu1 %v12434_v40  ;;  %v12474_v32 = vld [vmem:[%s13572_s18 + $0xbc8] ss:$16 sps:$4 sm:$0xff]   ;;  %v12479_v57 = vld [vmem:[%s13572_s18 + $0x9ec] ss:$16 sps:$4 sm:$0xff]  }
 0x4ec   : > { %v12482_v22 = vld [vmem:[%s13572_s18 + $0xbec] ss:$16 sps:$4 sm:$0xff]   ;;  %v12477_v12 = vld [vmem:[%s13572_s18 + $0x9e8] ss:$16 sps:$4 sm:$0xff]  }
 0x4ed   : > { %9143 = vmatpush1.bf16.msra.mxu0 %v12429_v31  ;;  %v12480_v26 = vld [vmem:[%s13572_s18 + $0xbe8] ss:$16 sps:$4 sm:$0xff]   ;;  %v12485_v28 = vld [vmem:[%s13572_s18 + $0xc0c] ss:$16 sps:$4 sm:$0xff]  }
 0x4ee   : > { %9184 = vmatpush1.bf16.msra.mxu1 %v12432_v36  ;;  %9144 = vmatprep.subr.bf16.mxu0 %v12437_v33  ;;  %v12488_v21 = vld [vmem:[%s13572_s18 + $0xe0c] ss:$16 sps:$4 sm:$0xff]   ;;  %v12483_v40 = vld [vmem:[%s13572_s18 + $0xc08] ss:$16 sps:$4 sm:$0xff]  }
 0x4ef   : > { %9185 = vmatprep.subr.bf16.mxu1 %v12440_v53  ;;  %v12486_v31 = vld [vmem:[%s13572_s18 + $0xe08] ss:$16 sps:$4 sm:$0xff]   ;;  %v12491_v36 = vld [vmem:[%s13572_s18 + $0xc2c] ss:$16 sps:$4 sm:$0xff]  }
 0x4f0   : > { %v12494_v33 = vld [vmem:[%s13572_s18 + $0xe2c] ss:$16 sps:$4 sm:$0xff]   ;;  %v12489_v53 = vld [vmem:[%s13572_s18 + $0xc28] ss:$16 sps:$4 sm:$0xff]  }
 0x4f1   : > { %9145 = vmatpush1.bf16.msra.mxu0 %v12435_v30  ;;  %v12492_v30 = vld [vmem:[%s13572_s18 + $0xe28] ss:$16 sps:$4 sm:$0xff]  }
 0x4f2   : > { %9186 = vmatpush1.bf16.msra.mxu1 %v12438_v37  ;;  %9146 = vmatprep.subr.bf16.mxu0 %v12443_v13  ;;  %v12497_v37 = vld [vmem:[%s13572_s18 + $0xc4c] ss:$16 sps:$4 sm:$0xff]  }
 0x4f3   : > { %9187 = vmatprep.subr.bf16.mxu1 %v12446_v43  ;;  %v12500_v13 = vld [vmem:[%s13572_s18 + $0xe4c] ss:$16 sps:$4 sm:$0xff]  }
 0x4f4   : > { %v12503_v43 = vld [vmem:[%s13572_s18 + $0xc6c] ss:$16 sps:$4 sm:$0xff]  }
 0x4f5   : > { %9147 = vmatpush1.bf16.msra.mxu0 %v12441_v49  ;;  %v12506_v49 = vld [vmem:[%s13572_s18 + $0xe6c] ss:$16 sps:$4 sm:$0xff]  }
 0x4f6   : > { %9188 = vmatpush1.bf16.msra.mxu1 %v12444_v41  ;;  %9148 = vmatprep.subr.bf16.mxu0 %v12449_v14  ;;  %v12504_v41 = vld [vmem:[%s13572_s18 + $0xe68] ss:$16 sps:$4 sm:$0xff]   ;;  %v12512_v14 = vld [vmem:[%s13572_s18 + $0xe8c] ss:$16 sps:$4 sm:$0xff]  }
 0x4f7   : > { %9189 = vmatprep.subr.bf16.mxu1 %v12452_v16  ;;  %v12507_v16 = vld [vmem:[%s13572_s18 + $0xc88] ss:$16 sps:$4 sm:$0xff]  }
 0x4f9   : > { %9149 = vmatpush1.bf16.msra.mxu0 %v12447_v48  ;;  %v12510_v48 = vld [vmem:[%s13572_s18 + $0xe88] ss:$16 sps:$4 sm:$0xff]  }
 0x4fa   : > { %9190 = vmatpush1.bf16.msra.mxu1 %v12450_v54  ;;  %9150 = vmatprep.subr.bf16.mxu0 %v12455_v5  ;;  %v12515_v54 = vld [vmem:[%s13572_s18 + $0xcac] ss:$16 sps:$4 sm:$0xff]  }
 0x4fb   : > { %9191 = vmatprep.subr.bf16.mxu1 %v12458_v39  ;;  %v12518_v5 = vld [vmem:[%s13572_s18 + $0xeac] ss:$16 sps:$4 sm:$0xff]   ;;  %v9624_v39 = vsub.s32 0, %v13788_v61 }
 0x4fd   : > { %9151 = vmatpush1.bf16.msra.mxu0 %v12453_v46  ;;  %v12513_v46 = vld [vmem:[%s13572_s18 + $0xca8] ss:$16 sps:$4 sm:$0xff]  }
 0x4fe   : > { %9192 = vmatpush1.bf16.msra.mxu1 %v12456_v42  ;;  %9152 = vmatprep.subr.bf16.mxu0 %v12461_v55  ;;  %v9620_v42 = vld [vmem:[%s13587_s30] sm:$0xf]  ;;  %v9628_v55 = vsub.s32 1, %v13788_v61 }
 0x4ff   : > { %9193 = vmatprep.subr.bf16.mxu1 %v12464_v18  ;;  %v12516_v18 = vld [vmem:[%s13572_s18 + $0xea8] ss:$16 sps:$4 sm:$0xff]  }
 0x501   : > { %9153 = vmatpush1.bf16.msra.mxu0 %v12459_v56  ;;  %v12521_v56 = vld [vmem:[%s13572_s18 + $0xccc] ss:$16 sps:$4 sm:$0xff]  }
 0x502   : > { %9194 = vmatpush1.bf16.msra.mxu1 %v12462_v23  ;;  %9154 = vmatprep.subr.bf16.mxu0 %v12467_v1  ;;  %v12524_v23 = vld [vmem:[%s13572_s18 + $0xecc] ss:$16 sps:$4 sm:$0xff]  }
 0x503   : > { %9195 = vmatprep.subr.bf16.mxu1 %v12470_v8 }
 0x505   : > { %9155 = vmatpush1.bf16.msra.mxu0 %v12465_v47 }
 0x506   : > { %9196 = vmatpush1.bf16.msra.mxu1 %v12468_v60  ;;  %9156 = vmatprep.subr.bf16.mxu0 %v12473_v50  ;;  %v9625_v60 = vrot.slane %v9620_v42, %v9624_v39 }
 0x507   : > { %9197 = vmatprep.subr.bf16.mxu1 %v12476_v11 }
 0x509   : > { %9157 = vmatpush1.bf16.msra.mxu0 %v12471_v20  ;;  %v12519_v20 = vld [vmem:[%s13572_s18 + $0xcc8] ss:$16 sps:$4 sm:$0xff]  }
 0x50a   : > { %9198 = vmatpush1.bf16.msra.mxu1 %v12474_v32  ;;  %9158 = vmatprep.subr.bf16.mxu0 %v12479_v57  ;;  %v9659_v32 = vld [vmem:[%s13589_s12] sm:$0xf] }
 0x50b   : > { %9199 = vmatprep.subr.bf16.mxu1 %v12482_v22  ;;  %v9629_v22 = vrot.slane %v9620_v42, %v9628_v55 }
 0x50d   : > { %9159 = vmatpush1.bf16.msra.mxu0 %v12477_v12 }
 0x50e   : > { %9200 = vmatpush1.bf16.msra.mxu1 %v12480_v26  ;;  %9210 = vmatprep.subr.bf16.mxu0 %v12485_v28  ;;  %v12522_v28 = vld [vmem:[%s13572_s18 + $0xec8] ss:$16 sps:$4 sm:$0xff]  }
 0x50f   : > { %9251 = vmatprep.subr.bf16.mxu1 %v12488_v21 }
 0x510   : > { %9161 = vmatmul.mubr.bf16.vlgmr.msra.gmra.mrb[48].mxu0 %v14157_v6  ;;  %v12495_v6 = vld [vmem:[%s13572_s18 + $0xc48] ss:$16 sps:$4 sm:$0xff]  }
 0x511   : > { %9202 = vmatmul.mubr.bf16.vlgmr.msra.gmra.mrb[48].mxu1 %v14170_v35  ;;  %9211 = vmatpush1.bf16.msra.mxu0 %v12483_v40  ;;  %v12498_v35 = vld [vmem:[%s13572_s18 + $0xe48] ss:$16 sps:$4 sm:$0xff]  }
 0x512   : > { %9252 = vmatpush1.bf16.msra.mxu1 %v12486_v31  ;;  %9212 = vmatprep.subr.bf16.mxu0 %v12491_v36  ;;  %v12527_v31 = vld [vmem:[%s13572_s18 + $0xcec] ss:$16 sps:$4 sm:$0xff]  }
 0x513   : > { %9253 = vmatprep.subr.bf16.mxu1 %v12494_v33  ;;  %9242 = vmatprep.mubr.bf16.mxu0 %v14166_v4  ;;  %v12501_v4 = vld [vmem:[%s13572_s18 + $0xc68] ss:$16 sps:$4 sm:$0xff]   ;;  %v12530_v36 = vld [vmem:[%s13572_s18 + $0xeec] ss:$16 sps:$4 sm:$0xff]  }
 0x514   : > { %9283 = vmatprep.mubr.bf16.mxu1 %v14176_v19  ;;  %v12509_v19 = vld [vmem:[%s13572_s18 + $0xc8c] ss:$16 sps:$4 sm:$0xff]  }
 0x515   : > { %9213 = vmatpush1.bf16.msra.mxu0 %v12489_v53 }
 0x516   : > { %9254 = vmatpush1.bf16.msra.mxu1 %v12492_v30  ;;  %9214 = vmatprep.subr.bf16.mxu0 %v12497_v37  ;;  %v12525_v37 = vld [vmem:[%s13572_s18 + $0xce8] ss:$16 sps:$4 sm:$0xff]  }
 0x517   : > { %9255 = vmatprep.subr.bf16.mxu1 %v12500_v13  ;;  %v12528_v13 = vld [vmem:[%s13572_s18 + $0xee8] ss:$16 sps:$4 sm:$0xff]  }
 0x519   : > { %9215 = vmatpush1.bf16.msra.mxu0 %v12495_v6  ;;  %v12533_v6 = vld [vmem:[%s13572_s18 + $0xd0c] ss:$16 sps:$4 sm:$0xff]  }
 0x51a   : > { %9256 = vmatpush1.bf16.msra.mxu1 %v12498_v35  ;;  %9216 = vmatprep.subr.bf16.mxu0 %v12503_v43  ;;  %v9668_v43 = vrot.slane %v9659_v32, %v9628_v55  ;;  %v12537_v55 = vld [vmem:[%s13572_s18 + $0xd28] ss:$16 sps:$4 sm:$0xff]  }
 0x51b   : > { %9257 = vmatprep.subr.bf16.mxu1 %v12506_v49  ;;  %v12536_v49 = vld [vmem:[%s13572_s18 + $0xf0c] ss:$16 sps:$4 sm:$0xff]  }
 0x51d   : > { %9217 = vmatpush1.bf16.msra.mxu0 %v12501_v4 }
 0x51e   : > { %9258 = vmatpush1.bf16.msra.mxu1 %v12504_v41  ;;  %9218 = vmatprep.subr.bf16.mxu0 %v12509_v19 }
 0x51f   : > { %9259 = vmatprep.subr.bf16.mxu1 %v12512_v14  ;;  %v12531_v14 = vld [vmem:[%s13572_s18 + $0xd08] ss:$16 sps:$4 sm:$0xff]  }
 0x521   : > { %9219 = vmatpush1.bf16.msra.mxu0 %v12507_v16  ;;  %v12534_v16 = vld [vmem:[%s13572_s18 + $0xf08] ss:$16 sps:$4 sm:$0xff]  }
 0x522   : > { %9260 = vmatpush1.bf16.msra.mxu1 %v12510_v48  ;;  %9220 = vmatprep.subr.bf16.mxu0 %v12515_v54  ;;  %v12539_v54 = vld [vmem:[%s13572_s18 + $0xd2c] ss:$16 sps:$4 sm:$0xff]  }
 0x523   : > { %9261 = vmatprep.subr.bf16.mxu1 %v12518_v5  ;;  %v8916_v1 = vpop.f32.mrb[36].mxu0  ;;  %v12542_v5 = vld [vmem:[%s13572_s18 + $0xf2c] ss:$16 sps:$4 sm:$0xff]  }
 0x524   : > { %v8957_v8 = vpop.f32.mrb[36].mxu1  ;;  %v8917_v47 = vadd.f32 %v8916_v1, %v14826_v24  ;;  %v8918_v50 = vpop.f32.mrb[37].mxu0  ;;  %v12548_v1 = vld [vmem:[%s13572_s18 + $0xf4c] ss:$16 sps:$4 sm:$0xff]  }
 0x525   : > { %v8959_v11 = vpop.f32.mrb[37].mxu1  ;;  %v8919_v57 = vadd.f32 %v8918_v50, %v14830_v27  ;;  %v8920_v12 = vpop.f32.mrb[38].mxu0  ;;  %9221 = vmatpush1.bf16.msra.mxu0 %v12513_v46  ;;  %v9664_v27 = vrot.slane %v9659_v32, %v9624_v39  ;;  %v12554_v50 = vld [vmem:[%s13572_s18 + $0xf6c] ss:$16 sps:$4 sm:$0xff]  }
 0x526   : > { %v8961_v26 = vpop.f32.mrb[38].mxu1  ;;  %9262 = vmatpush1.bf16.msra.mxu1 %v12516_v18  ;;  %v8958_v21 = vadd.f32 %v8957_v8, %v8917_v47  ;;  %v8921_v24 = vpop.f32.mrb[39].mxu0  ;;  %9222 = vmatprep.subr.bf16.mxu0 %v12521_v56  ;;  %v12540_v18 = vld [vmem:[%s13572_s18 + $0xf28] ss:$16 sps:$4 sm:$0xff]   ;;  %v12557_v32 = vld [vmem:[%s13572_s18 + $0xd8c] ss:$16 sps:$4 sm:$0xff]  }
 0x527   : > { %v8962_v40 = vpop.f32.mrb[39].mxu1  ;;  %9263 = vmatprep.subr.bf16.mxu1 %v12524_v23  ;;  %v8960_v33 = vadd.f32 %v8959_v11, %v8919_v57  ;;  %v12545_v23 = vld [vmem:[%s13572_s18 + $0xd4c] ss:$16 sps:$4 sm:$0xff]   ;;  %v12543_v8 = vld [vmem:[%s13572_s18 + $0xd48] ss:$16 sps:$4 sm:$0xff]  }
 0x528   : > { %v9642_v53 = vadd.f32 %v9625_v60, %v8958_v21  ;;  %v12546_v47 = vld [vmem:[%s13572_s18 + $0xf48] ss:$16 sps:$4 sm:$0xff]   ;;  %v12551_v60 = vld [vmem:[%s13572_s18 + $0xd6c] ss:$16 sps:$4 sm:$0xff]  }
 0x529   : > { %v9643_v30 = vadd.f32 %v9629_v22, %v8960_v33  ;;  %9223 = vmatpush1.bf16.msra.mxu0 %v12519_v20  ;;  %v12549_v11 = vld [vmem:[%s13572_s18 + $0xd68] ss:$16 sps:$4 sm:$0xff]   ;;  %v12560_v57 = vld [vmem:[%s13572_s18 + $0xf8c] ss:$16 sps:$4 sm:$0xff]  }
 0x52a   : > { %9264 = vmatpush1.bf16.msra.mxu1 %v12522_v28  ;;  %vm9646_vm11 = vcmp.gt.f32.partialorder %v9642_v53, 0.0  ;;  %v9650_v35 = vmul.f32 0.01, %v9642_v53  ;;  %9224 = vmatprep.subr.bf16.mxu0 %v12527_v31  ;;  %v12552_v20 = vld [vmem:[%s13572_s18 + $0xf68] ss:$16 sps:$4 sm:$0xff]  }
 0x52b   : > { %9265 = vmatprep.subr.bf16.mxu1 %v12530_v36  ;;  %vm9647_vm12 = vcmp.gt.f32.partialorder %v9643_v30, 0.0  ;;  %v9651_v4 = vmul.f32 0.01, %v9643_v30  ;;  %v12555_v22 = vld [vmem:[%s13572_s18 + $0xd88] ss:$16 sps:$4 sm:$0xff]  }
 0x52c   : > { %v9654_v41 = vsel %vm9646_vm11, %v9642_v53, %v9650_v35  ;;  %v12558_v12 = vld [vmem:[%s13572_s18 + $0xf88] ss:$16 sps:$4 sm:$0xff]   ;;  %v12563_v26 = vld [vmem:[%s13572_s18 + $0xdac] ss:$16 sps:$4 sm:$0xff]  }
 0x52d   : > { %v9655_v19 = vsel %vm9647_vm12, %v9643_v30, %v9651_v4  ;;  %9225 = vmatpush1.bf16.msra.mxu0 %v12525_v37  ;;  %v9681_v48 = vmul.f32 %v9664_v27, %v9654_v41  ;;  %v12566_v28 = vld [vmem:[%s13572_s18 + $0xfac] ss:$16 sps:$4 sm:$0xff]   ;;  %v12561_v21 = vld [vmem:[%s13572_s18 + $0xda8] ss:$16 sps:$4 sm:$0xff]  }
 0x52e   : > { %9266 = vmatpush1.bf16.msra.mxu1 %v12528_v13  ;;  %9226 = vmatprep.subr.bf16.mxu0 %v12533_v6  ;;  %v9682_v39 = vmul.f32 %v9668_v43, %v9655_v19  ;;  %v12564_v24 = vld [vmem:[%s13572_s18 + $0xfa8] ss:$16 sps:$4 sm:$0xff]   ;;  %v12569_v40 = vld [vmem:[%s13572_s18 + $0xdcc] ss:$16 sps:$4 sm:$0xff]  }
 0x52f   : > { %9267 = vmatprep.subr.bf16.mxu1 %v12536_v49  ;;  %v9686_v46 = vsel %vm9685_vm13, %v9681_v48, 0.0  ;;  %v12572_v31 = vld [vmem:[%s13572_s18 + $0xfcc] ss:$16 sps:$4 sm:$0xff]   ;;  %v12567_v36 = vld [vmem:[%s13572_s18 + $0xdc8] ss:$16 sps:$4 sm:$0xff]  }
 0x530   : > { %v9687_v42 = vsel %vm9685_vm13, %v9682_v39, 0.0  ;;  %v12570_v33 = vld [vmem:[%s13572_s18 + $0xfc8] ss:$16 sps:$4 sm:$0xff]   ;;  %v12575_v53 = vld [vmem:[%s13572_s18 + $0xdec] ss:$16 sps:$4 sm:$0xff]  }
 0x531   : > { %9227 = vmatpush1.bf16.msra.mxu0 %v12531_v14  ;;  %v14918_v56 = vadd.f32 %v9687_v42, %v9686_v46  ;;  %v12578_v27 = vld [vmem:[%s13572_s18 + $0xfec] ss:$16 sps:$4 sm:$0xff]   ;;  %v12573_v30 = vld [vmem:[%s13572_s18 + $0xde8] ss:$16 sps:$4 sm:$0xff]  }
 0x532   : > { %9268 = vmatpush1.bf16.msra.mxu1 %v12534_v16  ;;  %9228 = vmatprep.subr.bf16.mxu0 %v12539_v54  ;;  %v12576_v37 = vld [vmem:[%s13572_s18 + $0xfe8] ss:$16 sps:$4 sm:$0xff]   ;;  %v12581_v13 = vld [vmem:[%s13572_s18 + $0x100c] ss:$16 sps:$4 sm:$0xff]  }
 0x533   : > { %9269 = vmatprep.subr.bf16.mxu1 %v12542_v5  ;;  %v12584_v6 = vld [vmem:[%s13572_s18 + $0x120c] ss:$16 sps:$4 sm:$0xff]   ;;  %v12579_v35 = vld [vmem:[%s13572_s18 + $0x1008] ss:$16 sps:$4 sm:$0xff]  }
 0x534   : > { %v12582_v43 = vld [vmem:[%s13572_s18 + $0x1208] ss:$16 sps:$4 sm:$0xff]   ;;  %v12587_v49 = vld [vmem:[%s13572_s18 + $0x102c] ss:$16 sps:$4 sm:$0xff]  }
 0x535   : > { %9229 = vmatpush1.bf16.msra.mxu0 %v12537_v55  ;;  %v12590_v4 = vld [vmem:[%s13572_s18 + $0x122c] ss:$16 sps:$4 sm:$0xff]   ;;  %v12585_v41 = vld [vmem:[%s13572_s18 + $0x1028] ss:$16 sps:$4 sm:$0xff]  }
 0x536   : > { %9270 = vmatpush1.bf16.msra.mxu1 %v12540_v18  ;;  %9230 = vmatprep.subr.bf16.mxu0 %v12545_v23  ;;  %v12588_v19 = vld [vmem:[%s13572_s18 + $0x1228] ss:$16 sps:$4 sm:$0xff]   ;;  %v12593_v14 = vld [vmem:[%s13572_s18 + $0x104c] ss:$16 sps:$4 sm:$0xff]  }
 0x537   : > { %9271 = vmatprep.subr.bf16.mxu1 %v12548_v1  ;;  %v12596_v16 = vld [vmem:[%s13572_s18 + $0x124c] ss:$16 sps:$4 sm:$0xff]   ;;  %v12597_v5 = vld [vmem:[%s13572_s18 + $0x1068] ss:$16 sps:$4 sm:$0xff]  }
 0x538   : > { %v12599_v48 = vld [vmem:[%s13572_s18 + $0x106c] ss:$16 sps:$4 sm:$0xff]   ;;  %v12603_v46 = vld [vmem:[%s13572_s18 + $0x1088] ss:$16 sps:$4 sm:$0xff]  }
 0x539   : > { %9231 = vmatpush1.bf16.msra.mxu0 %v12543_v8  ;;  %v12602_v54 = vld [vmem:[%s13572_s18 + $0x126c] ss:$16 sps:$4 sm:$0xff]   ;;  %v12606_v42 = vld [vmem:[%s13572_s18 + $0x1288] ss:$16 sps:$4 sm:$0xff]  }
 0x53a   : > { %9272 = vmatpush1.bf16.msra.mxu1 %v12546_v47  ;;  %9232 = vmatprep.subr.bf16.mxu0 %v12551_v60  ;;  %v12608_v39 = vld [vmem:[%s13572_s18 + $0x128c] ss:$16 sps:$4 sm:$0xff]   ;;  %v12609_v23 = vld [vmem:[%s13572_s18 + $0x10a8] ss:$16 sps:$4 sm:$0xff]  }
 0x53b   : > { %9273 = vmatprep.subr.bf16.mxu1 %v12554_v50  ;;  %v12611_v55 = vld [vmem:[%s13572_s18 + $0x10ac] ss:$16 sps:$4 sm:$0xff]   ;;  %v12612_v1 = vld [vmem:[%s13572_s18 + $0x12a8] ss:$16 sps:$4 sm:$0xff]  }
 0x53c   : > { %v12614_v18 = vld [vmem:[%s13572_s18 + $0x12ac] ss:$16 sps:$4 sm:$0xff]  }
 0x53d   : > { %9233 = vmatpush1.bf16.msra.mxu0 %v12549_v11  ;;  %v12617_v8 = vld [vmem:[%s13572_s18 + $0x10cc] ss:$16 sps:$4 sm:$0xff]  }
 0x53e   : > { %9274 = vmatpush1.bf16.msra.mxu1 %v12552_v20  ;;  %9234 = vmatprep.subr.bf16.mxu0 %v12557_v32  ;;  %v12620_v47 = vld [vmem:[%s13572_s18 + $0x12cc] ss:$16 sps:$4 sm:$0xff]  }
 0x53f   : > { %9275 = vmatprep.subr.bf16.mxu1 %v12560_v57 }
 0x541   : > { %9235 = vmatpush1.bf16.msra.mxu0 %v12555_v22 }
 0x542   : > { %9276 = vmatpush1.bf16.msra.mxu1 %v12558_v12  ;;  %9236 = vmatprep.subr.bf16.mxu0 %v12563_v26  ;;  %v12615_v26 = vld [vmem:[%s13572_s18 + $0x10c8] ss:$16 sps:$4 sm:$0xff]  }
 0x543   : > { %9277 = vmatprep.subr.bf16.mxu1 %v12566_v28  ;;  %v12618_v28 = vld [vmem:[%s13572_s18 + $0x12c8] ss:$16 sps:$4 sm:$0xff]  }
 0x545   : > { %9237 = vmatpush1.bf16.msra.mxu0 %v12561_v21 }
 0x546   : > { %9278 = vmatpush1.bf16.msra.mxu1 %v12564_v24  ;;  %9238 = vmatprep.subr.bf16.mxu0 %v12569_v40 }
 0x547   : > { %9279 = vmatprep.subr.bf16.mxu1 %v12572_v31 }
 0x549   : > { %9239 = vmatpush1.bf16.msra.mxu0 %v12567_v36  ;;  %v12621_v36 = vld [vmem:[%s13572_s18 + $0x10e8] ss:$16 sps:$4 sm:$0xff]  }
 0x54a   : > { %9280 = vmatpush1.bf16.msra.mxu1 %v12570_v33  ;;  %9240 = vmatprep.subr.bf16.mxu0 %v12575_v53  ;;  %v12624_v33 = vld [vmem:[%s13572_s18 + $0x12e8] ss:$16 sps:$4 sm:$0xff]   ;;  %v12629_v53 = vld [vmem:[%s13572_s18 + $0x110c] ss:$16 sps:$4 sm:$0xff]  }
 0x54b   : > { %9281 = vmatprep.subr.bf16.mxu1 %v12578_v27  ;;  %v12632_v27 = vld [vmem:[%s13572_s18 + $0x130c] ss:$16 sps:$4 sm:$0xff]  }
 0x54d   : > { %9241 = vmatpush1.bf16.msra.mxu0 %v12573_v30  ;;  %v12627_v30 = vld [vmem:[%s13572_s18 + $0x1108] ss:$16 sps:$4 sm:$0xff]  }
 0x54e   : > { %9282 = vmatpush1.bf16.msra.mxu1 %v12576_v37  ;;  %9292 = vmatprep.subr.bf16.mxu0 %v12581_v13  ;;  %v12630_v37 = vld [vmem:[%s13572_s18 + $0x1308] ss:$16 sps:$4 sm:$0xff]   ;;  %v12635_v13 = vld [vmem:[%s13572_s18 + $0x112c] ss:$16 sps:$4 sm:$0xff]  }
 0x54f   : > { %9333 = vmatprep.subr.bf16.mxu1 %v12584_v6  ;;  %v12638_v6 = vld [vmem:[%s13572_s18 + $0x132c] ss:$16 sps:$4 sm:$0xff]  }
 0x550   : > { %9243 = vmatmul.mubr.bf16.vlgmr.msra.gmra.mrb[52].mxu0 %v14258_v59  ;;  %v12591_v59 = vld [vmem:[%s13572_s18 + $0x1048] ss:$16 sps:$4 sm:$0xff]  }
 0x551   : > { %9284 = vmatmul.mubr.bf16.vlgmr.msra.gmra.mrb[52].mxu1 %v14271_v63  ;;  %9293 = vmatpush1.bf16.msra.mxu0 %v12579_v35  ;;  %v12594_v63 = vld [vmem:[%s13572_s18 + $0x1248] ss:$16 sps:$4 sm:$0xff]  }
 0x552   : > { %9334 = vmatpush1.bf16.msra.mxu1 %v12582_v43  ;;  %9294 = vmatprep.subr.bf16.mxu0 %v12587_v49  ;;  %v12633_v35 = vld [vmem:[%s13572_s18 + $0x1128] ss:$16 sps:$4 sm:$0xff]   ;;  %v12641_v49 = vld [vmem:[%s13572_s18 + $0x114c] ss:$16 sps:$4 sm:$0xff]  }
 0x553   : > { %9335 = vmatprep.subr.bf16.mxu1 %v12590_v4  ;;  %9324 = vmatprep.mubr.bf16.mxu0 %v14267_v7  ;;  %v12600_v7 = vld [vmem:[%s13572_s18 + $0x1268] ss:$16 sps:$4 sm:$0xff]   ;;  %v12644_v4 = vld [vmem:[%s13572_s18 + $0x134c] ss:$16 sps:$4 sm:$0xff]  }
 0x554   : > { %9365 = vmatprep.mubr.bf16.mxu1 %v14277_v10  ;;  %v12605_v10 = vld [vmem:[%s13572_s18 + $0x108c] ss:$16 sps:$4 sm:$0xff]   ;;  %v12636_v43 = vld [vmem:[%s13572_s18 + $0x1328] ss:$16 sps:$4 sm:$0xff]  }
 0x555   : > { %9295 = vmatpush1.bf16.msra.mxu0 %v12585_v41  ;;  %v12639_v41 = vld [vmem:[%s13572_s18 + $0x1148] ss:$16 sps:$4 sm:$0xff]  }
 0x556   : > { %9336 = vmatpush1.bf16.msra.mxu1 %v12588_v19  ;;  %9296 = vmatprep.subr.bf16.mxu0 %v12593_v14  ;;  %v12642_v19 = vld [vmem:[%s13572_s18 + $0x1348] ss:$16 sps:$4 sm:$0xff]   ;;  %v12647_v14 = vld [vmem:[%s13572_s18 + $0x116c] ss:$16 sps:$4 sm:$0xff]  }
 0x557   : > { %9337 = vmatprep.subr.bf16.mxu1 %v12596_v16  ;;  %v12650_v16 = vld [vmem:[%s13572_s18 + $0x136c] ss:$16 sps:$4 sm:$0xff]  }
 0x559   : > { %9297 = vmatpush1.bf16.msra.mxu0 %v12591_v59  ;;  %v12645_v59 = vld [vmem:[%s13572_s18 + $0x1168] ss:$16 sps:$4 sm:$0xff]  }
 0x55a   : > { %9338 = vmatpush1.bf16.msra.mxu1 %v12594_v63  ;;  %9298 = vmatprep.subr.bf16.mxu0 %v12599_v48  ;;  %v12648_v63 = vld [vmem:[%s13572_s18 + $0x1368] ss:$16 sps:$4 sm:$0xff]   ;;  %v12653_v48 = vld [vmem:[%s13572_s18 + $0x118c] ss:$16 sps:$4 sm:$0xff]  }
 0x55b   : > { %9339 = vmatprep.subr.bf16.mxu1 %v12602_v54  ;;  %v12656_v54 = vld [vmem:[%s13572_s18 + $0x138c] ss:$16 sps:$4 sm:$0xff]  }
 0x55d   : > { %9299 = vmatpush1.bf16.msra.mxu0 %v12597_v5  ;;  %v12651_v5 = vld [vmem:[%s13572_s18 + $0x1188] ss:$16 sps:$4 sm:$0xff]  }
 0x55e   : > { %9340 = vmatpush1.bf16.msra.mxu1 %v12600_v7  ;;  %9300 = vmatprep.subr.bf16.mxu0 %v12605_v10  ;;  %v12654_v7 = vld [vmem:[%s13572_s18 + $0x1388] ss:$16 sps:$4 sm:$0xff]   ;;  %v12659_v10 = vld [vmem:[%s13572_s18 + $0x11ac] ss:$16 sps:$4 sm:$0xff]  }
 0x55f   : > { %9341 = vmatprep.subr.bf16.mxu1 %v12608_v39  ;;  %v12662_v39 = vld [vmem:[%s13572_s18 + $0x13ac] ss:$16 sps:$4 sm:$0xff]  }
 0x561   : > { %9301 = vmatpush1.bf16.msra.mxu0 %v12603_v46  ;;  %v12657_v46 = vld [vmem:[%s13572_s18 + $0x11a8] ss:$16 sps:$4 sm:$0xff]  }
 0x562   : > { %9342 = vmatpush1.bf16.msra.mxu1 %v12606_v42  ;;  %9302 = vmatprep.subr.bf16.mxu0 %v12611_v55  ;;  %v12660_v42 = vld [vmem:[%s13572_s18 + $0x13a8] ss:$16 sps:$4 sm:$0xff]   ;;  %v12665_v55 = vld [vmem:[%s13572_s18 + $0x11cc] ss:$16 sps:$4 sm:$0xff]  }
 0x563   : > { %9343 = vmatprep.subr.bf16.mxu1 %v12614_v18  ;;  %v8998_v60 = vpop.f32.mrb[40].mxu0  ;;  %v12668_v18 = vld [vmem:[%s13572_s18 + $0x13cc] ss:$16 sps:$4 sm:$0xff]  }
 0x564   : > { %v9039_v50 = vpop.f32.mrb[40].mxu1  ;;  %v8999_v11 = vadd.f32 %v8998_v60, %v14210_v34  ;;  %v9000_v20 = vpop.f32.mrb[41].mxu0  ;;  %v12623_v34 = vld [vmem:[%s13572_s18 + $0x10ec] ss:$16 sps:$4 sm:$0xff]   ;;  %v12669_v60 = vld [vmem:[%s13572_s18 + $0x11e8] ss:$16 sps:$4 sm:$0xff]  }
 0x565   : > { %v9041_v32 = vpop.f32.mrb[41].mxu1  ;;  %v9001_v57 = vadd.f32 %v9000_v20, %v14212_v62  ;;  %v9002_v22 = vpop.f32.mrb[42].mxu0  ;;  %9303 = vmatpush1.bf16.msra.mxu0 %v12609_v23  ;;  %v12626_v62 = vld [vmem:[%s13572_s18 + $0x12ec] ss:$16 sps:$4 sm:$0xff]   ;;  %v12663_v23 = vld [vmem:[%s13572_s18 + $0x11c8] ss:$16 sps:$4 sm:$0xff]  }
 0x566   : > { %v9043_v12 = vpop.f32.mrb[42].mxu1  ;;  %9344 = vmatpush1.bf16.msra.mxu1 %v12612_v1  ;;  %v14978_v21 = vadd.f32 %v9039_v50, %v8999_v11  ;;  %v9003_v24 = vpop.f32.mrb[43].mxu0  ;;  %9304 = vmatprep.subr.bf16.mxu0 %v12617_v8  ;;  %v12666_v1 = vld [vmem:[%s13572_s18 + $0x13c8] ss:$16 sps:$4 sm:$0xff]   ;;  %v12671_v8 = vld [vmem:[%s13572_s18 + $0x11ec] ss:$16 sps:$4 sm:$0xff]  }
 0x567   : > { %v9044_v40 = vpop.f32.mrb[43].mxu1  ;;  %9345 = vmatprep.subr.bf16.mxu1 %v12620_v47  ;;  %v14982_v31 = vadd.f32 %v9041_v32, %v9001_v57  ;;  %v12674_v47 = vld [vmem:[%s13572_s18 + $0x13ec] ss:$16 sps:$4 sm:$0xff]   ;;  %v12672_v50 = vld [vmem:[%s13572_s18 + $0x13e8] ss:$16 sps:$4 sm:$0xff]  }
 0x568   : > { %v12677_v11 = vld [vmem:[%s13572_s18 + $0x140c] ss:$16 sps:$4 sm:$0xff]   ;;  %v12675_v32 = vld [vmem:[%s13572_s18 + $0x1408] ss:$16 sps:$4 sm:$0xff]  }
 0x569   : > { %9305 = vmatpush1.bf16.msra.mxu0 %v12615_v26  ;;  %v12680_v20 = vld [vmem:[%s13572_s18 + $0x160c] ss:$16 sps:$4 sm:$0xff]   ;;  %v12678_v57 = vld [vmem:[%s13572_s18 + $0x1608] ss:$16 sps:$4 sm:$0xff]  }
 0x56a   : > { %9346 = vmatpush1.bf16.msra.mxu1 %v12618_v28  ;;  %9306 = vmatprep.subr.bf16.mxu0 %v12623_v34  ;;  %v12683_v22 = vld [vmem:[%s13572_s18 + $0x142c] ss:$16 sps:$4 sm:$0xff]   ;;  %v12681_v26 = vld [vmem:[%s13572_s18 + $0x1428] ss:$16 sps:$4 sm:$0xff]  }
 0x56b   : > { %9347 = vmatprep.subr.bf16.mxu1 %v12626_v62  ;;  %v12686_v12 = vld [vmem:[%s13572_s18 + $0x162c] ss:$16 sps:$4 sm:$0xff]   ;;  %v12684_v28 = vld [vmem:[%s13572_s18 + $0x1628] ss:$16 sps:$4 sm:$0xff]  }
 0x56c   : > { %v12689_v24 = vld [vmem:[%s13572_s18 + $0x144c] ss:$16 sps:$4 sm:$0xff]  }
 0x56d   : > { %9307 = vmatpush1.bf16.msra.mxu0 %v12621_v36  ;;  %v12692_v40 = vld [vmem:[%s13572_s18 + $0x164c] ss:$16 sps:$4 sm:$0xff]   ;;  %v12693_v36 = vld [vmem:[%s13572_s18 + $0x1468] ss:$16 sps:$4 sm:$0xff]  }
 0x56e   : > { %9348 = vmatpush1.bf16.msra.mxu1 %v12624_v33  ;;  %9308 = vmatprep.subr.bf16.mxu0 %v12629_v53  ;;  %v12695_v34 = vld [vmem:[%s13572_s18 + $0x146c] ss:$16 sps:$4 sm:$0xff]   ;;  %v12699_v53 = vld [vmem:[%s13572_s18 + $0x1488] ss:$16 sps:$4 sm:$0xff]  }
 0x56f   : > { %9349 = vmatprep.subr.bf16.mxu1 %v12632_v27  ;;  %v12698_v62 = vld [vmem:[%s13572_s18 + $0x166c] ss:$16 sps:$4 sm:$0xff]   ;;  %v12702_v27 = vld [vmem:[%s13572_s18 + $0x1688] ss:$16 sps:$4 sm:$0xff]  }
 0x570   : > { %v12704_v33 = vld [vmem:[%s13572_s18 + $0x168c] ss:$16 sps:$4 sm:$0xff]  }
 0x571   : > { %9309 = vmatpush1.bf16.msra.mxu0 %v12627_v30  ;;  %v12707_v30 = vld [vmem:[%s13572_s18 + $0x14ac] ss:$16 sps:$4 sm:$0xff]  }
 0x572   : > { %9350 = vmatpush1.bf16.msra.mxu1 %v12630_v37  ;;  %9310 = vmatprep.subr.bf16.mxu0 %v12635_v13  ;;  %v12710_v37 = vld [vmem:[%s13572_s18 + $0x16ac] ss:$16 sps:$4 sm:$0xff]   ;;  %v12705_v13 = vld [vmem:[%s13572_s18 + $0x14a8] ss:$16 sps:$4 sm:$0xff]  }
 0x573   : > { %9351 = vmatprep.subr.bf16.mxu1 %v12638_v6  ;;  %v12708_v6 = vld [vmem:[%s13572_s18 + $0x16a8] ss:$16 sps:$4 sm:$0xff]  }
 0x575   : > { %9311 = vmatpush1.bf16.msra.mxu0 %v12633_v35  ;;  %v12713_v35 = vld [vmem:[%s13572_s18 + $0x14cc] ss:$16 sps:$4 sm:$0xff]  }
 0x576   : > { %9352 = vmatpush1.bf16.msra.mxu1 %v12636_v43  ;;  %9312 = vmatprep.subr.bf16.mxu0 %v12641_v49  ;;  %v12716_v43 = vld [vmem:[%s13572_s18 + $0x16cc] ss:$16 sps:$4 sm:$0xff]  }
 0x577   : > { %9353 = vmatprep.subr.bf16.mxu1 %v12644_v4 }
 0x579   : > { %9313 = vmatpush1.bf16.msra.mxu0 %v12639_v41 }
 0x57a   : > { %9354 = vmatpush1.bf16.msra.mxu1 %v12642_v19  ;;  %9314 = vmatprep.subr.bf16.mxu0 %v12647_v14 }
 0x57b   : > { %9355 = vmatprep.subr.bf16.mxu1 %v12650_v16 }
 0x57d   : > { %9315 = vmatpush1.bf16.msra.mxu0 %v12645_v59 }
 0x57e   : > { %9356 = vmatpush1.bf16.msra.mxu1 %v12648_v63  ;;  %9316 = vmatprep.subr.bf16.mxu0 %v12653_v48  ;;  %v12711_v48 = vld [vmem:[%s13572_s18 + $0x14c8] ss:$16 sps:$4 sm:$0xff]  }
 0x57f   : > { %9357 = vmatprep.subr.bf16.mxu1 %v12656_v54  ;;  %v12714_v54 = vld [vmem:[%s13572_s18 + $0x16c8] ss:$16 sps:$4 sm:$0xff]  }
 0x581   : > { %9317 = vmatpush1.bf16.msra.mxu0 %v12651_v5 }
 0x582   : > { %9358 = vmatpush1.bf16.msra.mxu1 %v12654_v7  ;;  %9318 = vmatprep.subr.bf16.mxu0 %v12659_v10 }
 0x583   : > { %9359 = vmatprep.subr.bf16.mxu1 %v12662_v39 }
 0x585   : > { %9319 = vmatpush1.bf16.msra.mxu0 %v12657_v46  ;;  %v12717_v46 = vld [vmem:[%s13572_s18 + $0x14e8] ss:$16 sps:$4 sm:$0xff]  }
 0x586   : > { %9360 = vmatpush1.bf16.msra.mxu1 %v12660_v42  ;;  %9320 = vmatprep.subr.bf16.mxu0 %v12665_v55  ;;  %v12720_v42 = vld [vmem:[%s13572_s18 + $0x16e8] ss:$16 sps:$4 sm:$0xff]   ;;  %v12725_v55 = vld [vmem:[%s13572_s18 + $0x150c] ss:$16 sps:$4 sm:$0xff]  }
 0x587   : > { %9361 = vmatprep.subr.bf16.mxu1 %v12668_v18  ;;  %v12728_v18 = vld [vmem:[%s13572_s18 + $0x170c] ss:$16 sps:$4 sm:$0xff]  }
 0x589   : > { %9321 = vmatpush1.bf16.msra.mxu0 %v12663_v23  ;;  %v12723_v23 = vld [vmem:[%s13572_s18 + $0x1508] ss:$16 sps:$4 sm:$0xff]  }
 0x58a   : > { %9362 = vmatpush1.bf16.msra.mxu1 %v12666_v1  ;;  %9322 = vmatprep.subr.bf16.mxu0 %v12671_v8  ;;  %v12726_v1 = vld [vmem:[%s13572_s18 + $0x1708] ss:$16 sps:$4 sm:$0xff]   ;;  %v12731_v8 = vld [vmem:[%s13572_s18 + $0x152c] ss:$16 sps:$4 sm:$0xff]  }
 0x58b   : > { %9363 = vmatprep.subr.bf16.mxu1 %v12674_v47  ;;  %v12734_v47 = vld [vmem:[%s13572_s18 + $0x172c] ss:$16 sps:$4 sm:$0xff]  }
 0x58d   : > { %9323 = vmatpush1.bf16.msra.mxu0 %v12669_v60  ;;  %v12729_v60 = vld [vmem:[%s13572_s18 + $0x1528] ss:$16 sps:$4 sm:$0xff]  }
 0x58e   : > { %9364 = vmatpush1.bf16.msra.mxu1 %v12672_v50  ;;  %9374 = vmatprep.subr.bf16.mxu0 %v12677_v11  ;;  %v12732_v50 = vld [vmem:[%s13572_s18 + $0x1728] ss:$16 sps:$4 sm:$0xff]   ;;  %v12737_v11 = vld [vmem:[%s13572_s18 + $0x154c] ss:$16 sps:$4 sm:$0xff]  }
 0x58f   : > { %9415 = vmatprep.subr.bf16.mxu1 %v12680_v20  ;;  %v12740_v20 = vld [vmem:[%s13572_s18 + $0x174c] ss:$16 sps:$4 sm:$0xff]  }
 0x590   : > { %9325 = vmatmul.mubr.bf16.vlgmr.msra.gmra.mrb[56].mxu0 %v14354_v0  ;;  %v12687_v0 = vld [vmem:[%s13572_s18 + $0x1448] ss:$16 sps:$4 sm:$0xff]  }
 0x591   : > { %9366 = vmatmul.mubr.bf16.vlgmr.msra.gmra.mrb[56].mxu1 %v14367_v51  ;;  %9375 = vmatpush1.bf16.msra.mxu0 %v12675_v32  ;;  %v12690_v51 = vld [vmem:[%s13572_s18 + $0x1648] ss:$16 sps:$4 sm:$0xff]  }
 0x592   : > { %9416 = vmatpush1.bf16.msra.mxu1 %v12678_v57  ;;  %9376 = vmatprep.subr.bf16.mxu0 %v12683_v22  ;;  %v12735_v32 = vld [vmem:[%s13572_s18 + $0x1548] ss:$16 sps:$4 sm:$0xff]   ;;  %v12743_v22 = vld [vmem:[%s13572_s18 + $0x156c] ss:$16 sps:$4 sm:$0xff]  }
 0x593   : > { %9417 = vmatprep.subr.bf16.mxu1 %v12686_v12  ;;  %9406 = vmatprep.mubr.bf16.mxu0 %v14363_v9  ;;  %v12696_v9 = vld [vmem:[%s13572_s18 + $0x1668] ss:$16 sps:$4 sm:$0xff]   ;;  %v12746_v12 = vld [vmem:[%s13572_s18 + $0x176c] ss:$16 sps:$4 sm:$0xff]  }
 0x594   : > { %9447 = vmatprep.mubr.bf16.mxu1 %v14373_v17  ;;  %v12701_v17 = vld [vmem:[%s13572_s18 + $0x148c] ss:$16 sps:$4 sm:$0xff]   ;;  %v12738_v57 = vld [vmem:[%s13572_s18 + $0x1748] ss:$16 sps:$4 sm:$0xff]  }
 0x595   : > { %9377 = vmatpush1.bf16.msra.mxu0 %v12681_v26  ;;  %v12741_v26 = vld [vmem:[%s13572_s18 + $0x1568] ss:$16 sps:$4 sm:$0xff]  }
 0x596   : > { %9418 = vmatpush1.bf16.msra.mxu1 %v12684_v28  ;;  %9378 = vmatprep.subr.bf16.mxu0 %v12689_v24  ;;  %v12744_v28 = vld [vmem:[%s13572_s18 + $0x1768] ss:$16 sps:$4 sm:$0xff]   ;;  %v12749_v24 = vld [vmem:[%s13572_s18 + $0x158c] ss:$16 sps:$4 sm:$0xff]  }
 0x597   : > { %9419 = vmatprep.subr.bf16.mxu1 %v12692_v40  ;;  %v12752_v40 = vld [vmem:[%s13572_s18 + $0x178c] ss:$16 sps:$4 sm:$0xff]  }
 0x599   : > { %9379 = vmatpush1.bf16.msra.mxu0 %v12687_v0  ;;  %v12747_v0 = vld [vmem:[%s13572_s18 + $0x1588] ss:$16 sps:$4 sm:$0xff]  }
 0x59a   : > { %9420 = vmatpush1.bf16.msra.mxu1 %v12690_v51  ;;  %9380 = vmatprep.subr.bf16.mxu0 %v12695_v34  ;;  %v12750_v51 = vld [vmem:[%s13572_s18 + $0x1788] ss:$16 sps:$4 sm:$0xff]   ;;  %v12755_v34 = vld [vmem:[%s13572_s18 + $0x15ac] ss:$16 sps:$4 sm:$0xff]  }
 0x59b   : > { %9421 = vmatprep.subr.bf16.mxu1 %v12698_v62  ;;  %v12758_v62 = vld [vmem:[%s13572_s18 + $0x17ac] ss:$16 sps:$4 sm:$0xff]  }
 0x59d   : > { %9381 = vmatpush1.bf16.msra.mxu0 %v12693_v36  ;;  %v12753_v36 = vld [vmem:[%s13572_s18 + $0x15a8] ss:$16 sps:$4 sm:$0xff]  }
 0x59e   : > { %9422 = vmatpush1.bf16.msra.mxu1 %v12696_v9  ;;  %9382 = vmatprep.subr.bf16.mxu0 %v12701_v17  ;;  %v12756_v9 = vld [vmem:[%s13572_s18 + $0x17a8] ss:$16 sps:$4 sm:$0xff]   ;;  %v12761_v17 = vld [vmem:[%s13572_s18 + $0x15cc] ss:$16 sps:$4 sm:$0xff]  }
 0x59f   : > { %9423 = vmatprep.subr.bf16.mxu1 %v12704_v33  ;;  %v12764_v33 = vld [vmem:[%s13572_s18 + $0x17cc] ss:$16 sps:$4 sm:$0xff]  }
 0x5a1   : > { %9383 = vmatpush1.bf16.msra.mxu0 %v12699_v53  ;;  %v12759_v53 = vld [vmem:[%s13572_s18 + $0x15c8] ss:$16 sps:$4 sm:$0xff]  }
 0x5a2   : > { %9424 = vmatpush1.bf16.msra.mxu1 %v12702_v27  ;;  %9384 = vmatprep.subr.bf16.mxu0 %v12707_v30  ;;  %v12762_v27 = vld [vmem:[%s13572_s18 + $0x17c8] ss:$16 sps:$4 sm:$0xff]   ;;  %v12767_v30 = vld [vmem:[%s13572_s18 + $0x15ec] ss:$16 sps:$4 sm:$0xff]  }
 0x5a3   : > { %9425 = vmatprep.subr.bf16.mxu1 %v12710_v37  ;;  %v9080_v49 = vpop.f32.mrb[44].mxu0  ;;  %v12770_v37 = vld [vmem:[%s13572_s18 + $0x17ec] ss:$16 sps:$4 sm:$0xff]  }
 0x5a4   : > { %v9121_v4 = vpop.f32.mrb[44].mxu1  ;;  %v9081_v41 = vadd.f32 %v9080_v49, %v14978_v21  ;;  %v9082_v19 = vpop.f32.mrb[45].mxu0  ;;  %v12719_v21 = vld [vmem:[%s13572_s18 + $0x14ec] ss:$16 sps:$4 sm:$0xff]   ;;  %v12771_v49 = vld [vmem:[%s13572_s18 + $0x1808] ss:$16 sps:$4 sm:$0xff]  }
 0x5a5   : > { %v9123_v14 = vpop.f32.mrb[45].mxu1  ;;  %v9083_v16 = vadd.f32 %v9082_v19, %v14982_v31  ;;  %v9084_v59 = vpop.f32.mrb[46].mxu0  ;;  %9385 = vmatpush1.bf16.msra.mxu0 %v12705_v13  ;;  %v12722_v31 = vld [vmem:[%s13572_s18 + $0x16ec] ss:$16 sps:$4 sm:$0xff]   ;;  %v12765_v13 = vld [vmem:[%s13572_s18 + $0x15e8] ss:$16 sps:$4 sm:$0xff]  }
 0x5a6   : > { %v9125_v63 = vpop.f32.mrb[46].mxu1  ;;  %9426 = vmatpush1.bf16.msra.mxu1 %v12708_v6  ;;  %v15052_v5 = vadd.f32 %v9121_v4, %v9081_v41  ;;  %v9085_v7 = vpop.f32.mrb[47].mxu0  ;;  %9386 = vmatprep.subr.bf16.mxu0 %v12713_v35  ;;  %v12768_v6 = vld [vmem:[%s13572_s18 + $0x17e8] ss:$16 sps:$4 sm:$0xff]   ;;  %v12773_v35 = vld [vmem:[%s13572_s18 + $0x180c] ss:$16 sps:$4 sm:$0xff]  }
 0x5a7   : > { %v9126_v10 = vpop.f32.mrb[47].mxu1  ;;  %9427 = vmatprep.subr.bf16.mxu1 %v12716_v43  ;;  %v15056_v39 = vadd.f32 %v9123_v14, %v9083_v16  ;;  %v12776_v43 = vld [vmem:[%s13572_s18 + $0x1a0c] ss:$16 sps:$4 sm:$0xff]   ;;  %v12774_v4 = vld [vmem:[%s13572_s18 + $0x1a08] ss:$16 sps:$4 sm:$0xff]  }
 0x5a8   : > { %v12779_v41 = vld [vmem:[%s13572_s18 + $0x182c] ss:$16 sps:$4 sm:$0xff]   ;;  %v12777_v14 = vld [vmem:[%s13572_s18 + $0x1828] ss:$16 sps:$4 sm:$0xff]  }
 0x5a9   : > { %9387 = vmatpush1.bf16.msra.mxu0 %v12711_v48  ;;  %v12782_v19 = vld [vmem:[%s13572_s18 + $0x1a2c] ss:$16 sps:$4 sm:$0xff]   ;;  %v12780_v16 = vld [vmem:[%s13572_s18 + $0x1a28] ss:$16 sps:$4 sm:$0xff]  }
 0x5aa   : > { %9428 = vmatpush1.bf16.msra.mxu1 %v12714_v54  ;;  %9388 = vmatprep.subr.bf16.mxu0 %v12719_v21  ;;  %v12785_v59 = vld [vmem:[%s13572_s18 + $0x184c] ss:$16 sps:$4 sm:$0xff]   ;;  %v12789_v7 = vld [vmem:[%s13572_s18 + $0x1868] ss:$16 sps:$4 sm:$0xff]  }
 0x5ab   : > { %9429 = vmatprep.subr.bf16.mxu1 %v12722_v31  ;;  %v12788_v63 = vld [vmem:[%s13572_s18 + $0x1a4c] ss:$16 sps:$4 sm:$0xff]   ;;  %v12795_v21 = vld [vmem:[%s13572_s18 + $0x1888] ss:$16 sps:$4 sm:$0xff]  }
 0x5ac   : > { %v12791_v48 = vld [vmem:[%s13572_s18 + $0x186c] ss:$16 sps:$4 sm:$0xff]   ;;  %v12798_v31 = vld [vmem:[%s13572_s18 + $0x1a88] ss:$16 sps:$4 sm:$0xff]  }
 0x5ad   : > { %9389 = vmatpush1.bf16.msra.mxu0 %v12717_v46  ;;  %v12794_v54 = vld [vmem:[%s13572_s18 + $0x1a6c] ss:$16 sps:$4 sm:$0xff]  }
 0x5ae   : > { %9430 = vmatpush1.bf16.msra.mxu1 %v12720_v42  ;;  %9390 = vmatprep.subr.bf16.mxu0 %v12725_v55  ;;  %v12800_v10 = vld [vmem:[%s13572_s18 + $0x1a8c] ss:$16 sps:$4 sm:$0xff]   ;;  %v12801_v55 = vld [vmem:[%s13572_s18 + $0x18a8] ss:$16 sps:$4 sm:$0xff]  }
 0x5af   : > { %9431 = vmatprep.subr.bf16.mxu1 %v12728_v18  ;;  %v12803_v46 = vld [vmem:[%s13572_s18 + $0x18ac] ss:$16 sps:$4 sm:$0xff]   ;;  %v12804_v18 = vld [vmem:[%s13572_s18 + $0x1aa8] ss:$16 sps:$4 sm:$0xff]  }
 0x5b0   : > { %v12806_v42 = vld [vmem:[%s13572_s18 + $0x1aac] ss:$16 sps:$4 sm:$0xff]  }
 0x5b1   : > { %9391 = vmatpush1.bf16.msra.mxu0 %v12723_v23  ;;  %v12809_v23 = vld [vmem:[%s13572_s18 + $0x18cc] ss:$16 sps:$4 sm:$0xff]  }
 0x5b2   : > { %9432 = vmatpush1.bf16.msra.mxu1 %v12726_v1  ;;  %9392 = vmatprep.subr.bf16.mxu0 %v12731_v8  ;;  %v12812_v1 = vld [vmem:[%s13572_s18 + $0x1acc] ss:$16 sps:$4 sm:$0xff]  }
 0x5b3   : > { %9433 = vmatprep.subr.bf16.mxu1 %v12734_v47 }
 0x5b5   : > { %9393 = vmatpush1.bf16.msra.mxu0 %v12729_v60 }
 0x5b6   : > { %9434 = vmatpush1.bf16.msra.mxu1 %v12732_v50  ;;  %9394 = vmatprep.subr.bf16.mxu0 %v12737_v11 }
 0x5b7   : > { %9435 = vmatprep.subr.bf16.mxu1 %v12740_v20 }
 0x5b9   : > { %9395 = vmatpush1.bf16.msra.mxu0 %v12735_v32 }
 0x5ba   : > { %9436 = vmatpush1.bf16.msra.mxu1 %v12738_v57  ;;  %9396 = vmatprep.subr.bf16.mxu0 %v12743_v22  ;;  %v12807_v22 = vld [vmem:[%s13572_s18 + $0x18c8] ss:$16 sps:$4 sm:$0xff]  }
 0x5bb   : > { %9437 = vmatprep.subr.bf16.mxu1 %v12746_v12  ;;  %v12810_v12 = vld [vmem:[%s13572_s18 + $0x1ac8] ss:$16 sps:$4 sm:$0xff]  }
 0x5bd   : > { %9397 = vmatpush1.bf16.msra.mxu0 %v12741_v26 }
 0x5be   : > { %9438 = vmatpush1.bf16.msra.mxu1 %v12744_v28  ;;  %9398 = vmatprep.subr.bf16.mxu0 %v12749_v24 }
 0x5bf   : > { %9439 = vmatprep.subr.bf16.mxu1 %v12752_v40 }
 0x5c1   : > { %9399 = vmatpush1.bf16.msra.mxu0 %v12747_v0  ;;  %v12813_v0 = vld [vmem:[%s13572_s18 + $0x18e8] ss:$16 sps:$4 sm:$0xff]  }
 0x5c2   : > { %9440 = vmatpush1.bf16.msra.mxu1 %v12750_v51  ;;  %9400 = vmatprep.subr.bf16.mxu0 %v12755_v34  ;;  %v12816_v51 = vld [vmem:[%s13572_s18 + $0x1ae8] ss:$16 sps:$4 sm:$0xff]   ;;  %v12821_v34 = vld [vmem:[%s13572_s18 + $0x190c] ss:$16 sps:$4 sm:$0xff]  }
 0x5c3   : > { %9441 = vmatprep.subr.bf16.mxu1 %v12758_v62  ;;  %v12824_v62 = vld [vmem:[%s13572_s18 + $0x1b0c] ss:$16 sps:$4 sm:$0xff]  }
 0x5c5   : > { %9401 = vmatpush1.bf16.msra.mxu0 %v12753_v36  ;;  %v12819_v36 = vld [vmem:[%s13572_s18 + $0x1908] ss:$16 sps:$4 sm:$0xff]  }
 0x5c6   : > { %9442 = vmatpush1.bf16.msra.mxu1 %v12756_v9  ;;  %9402 = vmatprep.subr.bf16.mxu0 %v12761_v17  ;;  %v12822_v9 = vld [vmem:[%s13572_s18 + $0x1b08] ss:$16 sps:$4 sm:$0xff]   ;;  %v12827_v17 = vld [vmem:[%s13572_s18 + $0x192c] ss:$16 sps:$4 sm:$0xff]  }
 0x5c7   : > { %9443 = vmatprep.subr.bf16.mxu1 %v12764_v33  ;;  %v12830_v33 = vld [vmem:[%s13572_s18 + $0x1b2c] ss:$16 sps:$4 sm:$0xff]  }
 0x5c9   : > { %9403 = vmatpush1.bf16.msra.mxu0 %v12759_v53  ;;  %v12825_v53 = vld [vmem:[%s13572_s18 + $0x1928] ss:$16 sps:$4 sm:$0xff]  }
 0x5ca   : > { %9444 = vmatpush1.bf16.msra.mxu1 %v12762_v27  ;;  %9404 = vmatprep.subr.bf16.mxu0 %v12767_v30  ;;  %v12828_v27 = vld [vmem:[%s13572_s18 + $0x1b28] ss:$16 sps:$4 sm:$0xff]   ;;  %v12833_v30 = vld [vmem:[%s13572_s18 + $0x194c] ss:$16 sps:$4 sm:$0xff]  }
 0x5cb   : > { %9445 = vmatprep.subr.bf16.mxu1 %v12770_v37  ;;  %v12836_v37 = vld [vmem:[%s13572_s18 + $0x1b4c] ss:$16 sps:$4 sm:$0xff]  }
 0x5cd   : > { %9405 = vmatpush1.bf16.msra.mxu0 %v12765_v13  ;;  %v12831_v13 = vld [vmem:[%s13572_s18 + $0x1948] ss:$16 sps:$4 sm:$0xff]  }
 0x5ce   : > { %9446 = vmatpush1.bf16.msra.mxu1 %v12768_v6  ;;  %9456 = vmatprep.subr.bf16.mxu0 %v12773_v35  ;;  %v12834_v6 = vld [vmem:[%s13572_s18 + $0x1b48] ss:$16 sps:$4 sm:$0xff]   ;;  %v12839_v35 = vld [vmem:[%s13572_s18 + $0x196c] ss:$16 sps:$4 sm:$0xff]  }
 0x5cf   : > { %9497 = vmatprep.subr.bf16.mxu1 %v12776_v43  ;;  %v12842_v43 = vld [vmem:[%s13572_s18 + $0x1b6c] ss:$16 sps:$4 sm:$0xff]  }
 0x5d0   : > { %9407 = vmatmul.mubr.bf16.vlgmr.msra.gmra.mrb[60].mxu0 %v14451_v2  ;;  %v12783_v2 = vld [vmem:[%s13572_s18 + $0x1848] ss:$16 sps:$4 sm:$0xff]  }
 0x5d1   : > { %9448 = vmatmul.mubr.bf16.vlgmr.msra.gmra.mrb[60].mxu1 %v14464_v52  ;;  %9457 = vmatpush1.bf16.msra.mxu0 %v12771_v49  ;;  %v12786_v52 = vld [vmem:[%s13572_s18 + $0x1a48] ss:$16 sps:$4 sm:$0xff]  }
 0x5d2   : > { %9498 = vmatpush1.bf16.msra.mxu1 %v12774_v4  ;;  %9458 = vmatprep.subr.bf16.mxu0 %v12779_v41  ;;  %v12837_v49 = vld [vmem:[%s13572_s18 + $0x1968] ss:$16 sps:$4 sm:$0xff]   ;;  %v12845_v41 = vld [vmem:[%s13572_s18 + $0x198c] ss:$16 sps:$4 sm:$0xff]  }
 0x5d3   : > { %9499 = vmatprep.subr.bf16.mxu1 %v12782_v19  ;;  %9488 = vmatprep.mubr.bf16.mxu0 %v14460_v25  ;;  %v12792_v25 = vld [vmem:[%s13572_s18 + $0x1a68] ss:$16 sps:$4 sm:$0xff]   ;;  %v12848_v19 = vld [vmem:[%s13572_s18 + $0x1b8c] ss:$16 sps:$4 sm:$0xff]  }
 0x5d4   : > { %9529 = vmatprep.mubr.bf16.mxu1 %v14470_v29  ;;  %v12797_v29 = vld [vmem:[%s13572_s18 + $0x188c] ss:$16 sps:$4 sm:$0xff]   ;;  %v12840_v4 = vld [vmem:[%s13572_s18 + $0x1b68] ss:$16 sps:$4 sm:$0xff]  }
 0x5d5   : > { %9459 = vmatpush1.bf16.msra.mxu0 %v12777_v14  ;;  %v12843_v14 = vld [vmem:[%s13572_s18 + $0x1988] ss:$16 sps:$4 sm:$0xff]  }
 0x5d6   : > { %9500 = vmatpush1.bf16.msra.mxu1 %v12780_v16  ;;  %9460 = vmatprep.subr.bf16.mxu0 %v12785_v59  ;;  %v12846_v16 = vld [vmem:[%s13572_s18 + $0x1b88] ss:$16 sps:$4 sm:$0xff]   ;;  %v12851_v59 = vld [vmem:[%s13572_s18 + $0x19ac] ss:$16 sps:$4 sm:$0xff]  }
 0x5d7   : > { %9501 = vmatprep.subr.bf16.mxu1 %v12788_v63  ;;  %v12854_v63 = vld [vmem:[%s13572_s18 + $0x1bac] ss:$16 sps:$4 sm:$0xff]  }
 0x5d9   : > { %9461 = vmatpush1.bf16.msra.mxu0 %v12783_v2  ;;  %v12849_v2 = vld [vmem:[%s13572_s18 + $0x19a8] ss:$16 sps:$4 sm:$0xff]  }
 0x5da   : > { %9502 = vmatpush1.bf16.msra.mxu1 %v12786_v52  ;;  %9462 = vmatprep.subr.bf16.mxu0 %v12791_v48  ;;  %v12852_v52 = vld [vmem:[%s13572_s18 + $0x1ba8] ss:$16 sps:$4 sm:$0xff]   ;;  %v12857_v48 = vld [vmem:[%s13572_s18 + $0x19cc] ss:$16 sps:$4 sm:$0xff]  }
 0x5db   : > { %9503 = vmatprep.subr.bf16.mxu1 %v12794_v54  ;;  %v12860_v54 = vld [vmem:[%s13572_s18 + $0x1bcc] ss:$16 sps:$4 sm:$0xff]  }
 0x5dd   : > { %9463 = vmatpush1.bf16.msra.mxu0 %v12789_v7  ;;  %v12855_v7 = vld [vmem:[%s13572_s18 + $0x19c8] ss:$16 sps:$4 sm:$0xff]  }
 0x5de   : > { %9504 = vmatpush1.bf16.msra.mxu1 %v12792_v25  ;;  %9464 = vmatprep.subr.bf16.mxu0 %v12797_v29  ;;  %v12858_v25 = vld [vmem:[%s13572_s18 + $0x1bc8] ss:$16 sps:$4 sm:$0xff]   ;;  %v12863_v29 = vld [vmem:[%s13572_s18 + $0x19ec] ss:$16 sps:$4 sm:$0xff]  }
 0x5df   : > { %9505 = vmatprep.subr.bf16.mxu1 %v12800_v10  ;;  %v12866_v10 = vld [vmem:[%s13572_s18 + $0x1bec] ss:$16 sps:$4 sm:$0xff]  }
 0x5e1   : > { %9465 = vmatpush1.bf16.msra.mxu0 %v12795_v21  ;;  %v12861_v21 = vld [vmem:[%s13572_s18 + $0x19e8] ss:$16 sps:$4 sm:$0xff]  }
 0x5e2   : > { %9506 = vmatpush1.bf16.msra.mxu1 %v12798_v31  ;;  %9466 = vmatprep.subr.bf16.mxu0 %v12803_v46  ;;  %v12864_v31 = vld [vmem:[%s13572_s18 + $0x1be8] ss:$16 sps:$4 sm:$0xff]   ;;  %v12869_v46 = vld [vmem:[%s13572_s18 + $0x1c0c] ss:$16 sps:$4 sm:$0xff]  }
 0x5e3   : > { %9507 = vmatprep.subr.bf16.mxu1 %v12806_v42  ;;  %v9162_v8 = vpop.f32.mrb[48].mxu0  ;;  %v12872_v42 = vld [vmem:[%s13572_s18 + $0x1e0c] ss:$16 sps:$4 sm:$0xff]  }
 0x5e4   : > { %v9203_v47 = vpop.f32.mrb[48].mxu1  ;;  %v9163_v60 = vadd.f32 %v9162_v8, %v15052_v5  ;;  %v9164_v50 = vpop.f32.mrb[49].mxu0  ;;  %v12815_v5 = vld [vmem:[%s13572_s18 + $0x18ec] ss:$16 sps:$4 sm:$0xff]   ;;  %v12873_v8 = vld [vmem:[%s13572_s18 + $0x1c28] ss:$16 sps:$4 sm:$0xff]  }
 0x5e5   : > { %v9205_v11 = vpop.f32.mrb[49].mxu1  ;;  %v9165_v20 = vadd.f32 %v9164_v50, %v15056_v39  ;;  %v9166_v32 = vpop.f32.mrb[50].mxu0  ;;  %9467 = vmatpush1.bf16.msra.mxu0 %v12801_v55  ;;  %v12818_v39 = vld [vmem:[%s13572_s18 + $0x1aec] ss:$16 sps:$4 sm:$0xff]   ;;  %v12867_v55 = vld [vmem:[%s13572_s18 + $0x1c08] ss:$16 sps:$4 sm:$0xff]  }
 0x5e6   : > { %v9207_v57 = vpop.f32.mrb[50].mxu1  ;;  %9508 = vmatpush1.bf16.msra.mxu1 %v12804_v18  ;;  %v15126_v26 = vadd.f32 %v9203_v47, %v9163_v60  ;;  %v9167_v28 = vpop.f32.mrb[51].mxu0  ;;  %9468 = vmatprep.subr.bf16.mxu0 %v12809_v23  ;;  %v12870_v18 = vld [vmem:[%s13572_s18 + $0x1e08] ss:$16 sps:$4 sm:$0xff]   ;;  %v12875_v23 = vld [vmem:[%s13572_s18 + $0x1c2c] ss:$16 sps:$4 sm:$0xff]  }
 0x5e7   : > { %v9208_v24 = vpop.f32.mrb[51].mxu1  ;;  %9509 = vmatprep.subr.bf16.mxu1 %v12812_v1  ;;  %v15130_v40 = vadd.f32 %v9205_v11, %v9165_v20  ;;  %v12878_v1 = vld [vmem:[%s13572_s18 + $0x1e2c] ss:$16 sps:$4 sm:$0xff]   ;;  %v12876_v47 = vld [vmem:[%s13572_s18 + $0x1e28] ss:$16 sps:$4 sm:$0xff]  }
 0x5e8   : > { %v12881_v60 = vld [vmem:[%s13572_s18 + $0x1c4c] ss:$16 sps:$4 sm:$0xff]   ;;  %v12885_v32 = vld [vmem:[%s13572_s18 + $0x1c68] ss:$16 sps:$4 sm:$0xff]  }
 0x5e9   : > { %9469 = vmatpush1.bf16.msra.mxu0 %v12807_v22  ;;  %v12884_v50 = vld [vmem:[%s13572_s18 + $0x1e4c] ss:$16 sps:$4 sm:$0xff]   ;;  %v12891_v22 = vld [vmem:[%s13572_s18 + $0x1c88] ss:$16 sps:$4 sm:$0xff]  }
 0x5ea   : > { %9510 = vmatpush1.bf16.msra.mxu1 %v12810_v12  ;;  %9470 = vmatprep.subr.bf16.mxu0 %v12815_v5  ;;  %v12887_v11 = vld [vmem:[%s13572_s18 + $0x1c6c] ss:$16 sps:$4 sm:$0xff]   ;;  %v12894_v12 = vld [vmem:[%s13572_s18 + $0x1e88] ss:$16 sps:$4 sm:$0xff]  }
 0x5eb   : > { %9511 = vmatprep.subr.bf16.mxu1 %v12818_v39  ;;  %v12890_v20 = vld [vmem:[%s13572_s18 + $0x1e6c] ss:$16 sps:$4 sm:$0xff]   ;;  %v12897_v5 = vld [vmem:[%s13572_s18 + $0x1ca8] ss:$16 sps:$4 sm:$0xff]  }
 0x5ec   : > { %v12896_v57 = vld [vmem:[%s13572_s18 + $0x1e8c] ss:$16 sps:$4 sm:$0xff]   ;;  %v12900_v39 = vld [vmem:[%s13572_s18 + $0x1ea8] ss:$16 sps:$4 sm:$0xff]  }
 0x5ed   : > { %9471 = vmatpush1.bf16.msra.mxu0 %v12813_v0  ;;  %v12899_v28 = vld [vmem:[%s13572_s18 + $0x1cac] ss:$16 sps:$4 sm:$0xff]  }
 0x5ee   : > { %9512 = vmatpush1.bf16.msra.mxu1 %v12816_v51  ;;  %9472 = vmatprep.subr.bf16.mxu0 %v12821_v34  ;;  %v12902_v24 = vld [vmem:[%s13572_s18 + $0x1eac] ss:$16 sps:$4 sm:$0xff]  }
 0x5ef   : > { %9513 = vmatprep.subr.bf16.mxu1 %v12824_v62  ;;  %v12905_v0 = vld [vmem:[%s13572_s18 + $0x1ccc] ss:$16 sps:$4 sm:$0xff]  }
 0x5f0   : > { %v12908_v51 = vld [vmem:[%s13572_s18 + $0x1ecc] ss:$16 sps:$4 sm:$0xff]  }
 0x5f1   : > { %9473 = vmatpush1.bf16.msra.mxu0 %v12819_v36 }
 0x5f2   : > { %9514 = vmatpush1.bf16.msra.mxu1 %v12822_v9  ;;  %9474 = vmatprep.subr.bf16.mxu0 %v12827_v17 }
 0x5f3   : > { %9515 = vmatprep.subr.bf16.mxu1 %v12830_v33 }
 0x5f5   : > { %9475 = vmatpush1.bf16.msra.mxu0 %v12825_v53 }
 0x5f6   : > { %9516 = vmatpush1.bf16.msra.mxu1 %v12828_v27  ;;  %9476 = vmatprep.subr.bf16.mxu0 %v12833_v30  ;;  %v12903_v30 = vld [vmem:[%s13572_s18 + $0x1cc8] ss:$16 sps:$4 sm:$0xff]  }
 0x5f7   : > { %9517 = vmatprep.subr.bf16.mxu1 %v12836_v37  ;;  %v12906_v37 = vld [vmem:[%s13572_s18 + $0x1ec8] ss:$16 sps:$4 sm:$0xff]  }
 0x5f9   : > { %9477 = vmatpush1.bf16.msra.mxu0 %v12831_v13 }
 0x5fa   : > { %9518 = vmatpush1.bf16.msra.mxu1 %v12834_v6  ;;  %9478 = vmatprep.subr.bf16.mxu0 %v12839_v35 }
 0x5fb   : > { %9519 = vmatprep.subr.bf16.mxu1 %v12842_v43 }
 0x5fd   : > { %9479 = vmatpush1.bf16.msra.mxu0 %v12837_v49  ;;  %v12909_v49 = vld [vmem:[%s13572_s18 + $0x1ce8] ss:$16 sps:$4 sm:$0xff]  }
 0x5fe   : > { %9520 = vmatpush1.bf16.msra.mxu1 %v12840_v4  ;;  %9480 = vmatprep.subr.bf16.mxu0 %v12845_v41  ;;  %v12912_v4 = vld [vmem:[%s13572_s18 + $0x1ee8] ss:$16 sps:$4 sm:$0xff]   ;;  %v12917_v41 = vld [vmem:[%s13572_s18 + $0x1d0c] ss:$16 sps:$4 sm:$0xff]  }
 0x5ff   : > { %9521 = vmatprep.subr.bf16.mxu1 %v12848_v19  ;;  %v12920_v19 = vld [vmem:[%s13572_s18 + $0x1f0c] ss:$16 sps:$4 sm:$0xff]  }
 0x601   : > { %9481 = vmatpush1.bf16.msra.mxu0 %v12843_v14  ;;  %v12915_v14 = vld [vmem:[%s13572_s18 + $0x1d08] ss:$16 sps:$4 sm:$0xff]  }
 0x602   : > { %9522 = vmatpush1.bf16.msra.mxu1 %v12846_v16  ;;  %9482 = vmatprep.subr.bf16.mxu0 %v12851_v59  ;;  %v12918_v16 = vld [vmem:[%s13572_s18 + $0x1f08] ss:$16 sps:$4 sm:$0xff]   ;;  %v12923_v59 = vld [vmem:[%s13572_s18 + $0x1d2c] ss:$16 sps:$4 sm:$0xff]  }
 0x603   : > { %9523 = vmatprep.subr.bf16.mxu1 %v12854_v63  ;;  %v12926_v63 = vld [vmem:[%s13572_s18 + $0x1f2c] ss:$16 sps:$4 sm:$0xff]  }
 0x605   : > { %9483 = vmatpush1.bf16.msra.mxu0 %v12849_v2  ;;  %v12921_v2 = vld [vmem:[%s13572_s18 + $0x1d28] ss:$16 sps:$4 sm:$0xff]  }
 0x606   : > { %9524 = vmatpush1.bf16.msra.mxu1 %v12852_v52  ;;  %9484 = vmatprep.subr.bf16.mxu0 %v12857_v48  ;;  %v12924_v52 = vld [vmem:[%s13572_s18 + $0x1f28] ss:$16 sps:$4 sm:$0xff]   ;;  %v12929_v48 = vld [vmem:[%s13572_s18 + $0x1d4c] ss:$16 sps:$4 sm:$0xff]  }
 0x607   : > { %9525 = vmatprep.subr.bf16.mxu1 %v12860_v54  ;;  %v12932_v54 = vld [vmem:[%s13572_s18 + $0x1f4c] ss:$16 sps:$4 sm:$0xff]  }
 0x609   : > { %9485 = vmatpush1.bf16.msra.mxu0 %v12855_v7  ;;  %v12927_v7 = vld [vmem:[%s13572_s18 + $0x1d48] ss:$16 sps:$4 sm:$0xff]  }
 0x60a   : > { %9526 = vmatpush1.bf16.msra.mxu1 %v12858_v25  ;;  %9486 = vmatprep.subr.bf16.mxu0 %v12863_v29  ;;  %v12930_v25 = vld [vmem:[%s13572_s18 + $0x1f48] ss:$16 sps:$4 sm:$0xff]   ;;  %v12935_v29 = vld [vmem:[%s13572_s18 + $0x1d6c] ss:$16 sps:$4 sm:$0xff]  }
 0x60b   : > { %9527 = vmatprep.subr.bf16.mxu1 %v12866_v10  ;;  %v12938_v10 = vld [vmem:[%s13572_s18 + $0x1f6c] ss:$16 sps:$4 sm:$0xff]  }
 0x60d   : > { %9487 = vmatpush1.bf16.msra.mxu0 %v12861_v21  ;;  %v12933_v21 = vld [vmem:[%s13572_s18 + $0x1d68] ss:$16 sps:$4 sm:$0xff]  }
 0x60e   : > { %9528 = vmatpush1.bf16.msra.mxu1 %v12864_v31  ;;  %9538 = vmatprep.subr.bf16.mxu0 %v12869_v46  ;;  %v12936_v31 = vld [vmem:[%s13572_s18 + $0x1f68] ss:$16 sps:$4 sm:$0xff]   ;;  %v12941_v46 = vld [vmem:[%s13572_s18 + $0x1d8c] ss:$16 sps:$4 sm:$0xff]  }
 0x60f   : > { %9579 = vmatprep.subr.bf16.mxu1 %v12872_v42  ;;  %v12944_v42 = vld [vmem:[%s13572_s18 + $0x1f8c] ss:$16 sps:$4 sm:$0xff]  }
 0x610   : > { %9489 = vmatmul.mubr.bf16.vlgmr.msra.gmra.mrb[64].mxu0 %v14547_v44  ;;  %v12879_v44 = vld [vmem:[%s13572_s18 + $0x1c48] ss:$16 sps:$4 sm:$0xff]  }
 0x611   : > { %9530 = vmatmul.mubr.bf16.vlgmr.msra.gmra.mrb[64].mxu1 %v14560_v15  ;;  %9539 = vmatpush1.bf16.msra.mxu0 %v12867_v55  ;;  %v12882_v15 = vld [vmem:[%s13572_s18 + $0x1e48] ss:$16 sps:$4 sm:$0xff]  }
 0x612   : > { %9580 = vmatpush1.bf16.msra.mxu1 %v12870_v18  ;;  %9540 = vmatprep.subr.bf16.mxu0 %v12875_v23  ;;  %v12939_v55 = vld [vmem:[%s13572_s18 + $0x1d88] ss:$16 sps:$4 sm:$0xff]   ;;  %v12947_v23 = vld [vmem:[%s13572_s18 + $0x1dac] ss:$16 sps:$4 sm:$0xff]  }
 0x613   : > { %9581 = vmatprep.subr.bf16.mxu1 %v12878_v1  ;;  %9570 = vmatprep.mubr.bf16.mxu0 %v14556_v58  ;;  %v12888_v58 = vld [vmem:[%s13572_s18 + $0x1e68] ss:$16 sps:$4 sm:$0xff]   ;;  %v12950_v1 = vld [vmem:[%s13572_s18 + $0x1fac] ss:$16 sps:$4 sm:$0xff]  }
 0x614   : > { %9611 = vmatprep.mubr.bf16.mxu1 %v14566_v3  ;;  %v12893_v3 = vld [vmem:[%s13572_s18 + $0x1c8c] ss:$16 sps:$4 sm:$0xff]   ;;  %v12942_v18 = vld [vmem:[%s13572_s18 + $0x1f88] ss:$16 sps:$4 sm:$0xff]  }
 0x615   : > { %9541 = vmatpush1.bf16.msra.mxu0 %v12873_v8  ;;  %v12945_v8 = vld [vmem:[%s13572_s18 + $0x1da8] ss:$16 sps:$4 sm:$0xff]  }
 0x616   : > { %9582 = vmatpush1.bf16.msra.mxu1 %v12876_v47  ;;  %9542 = vmatprep.subr.bf16.mxu0 %v12881_v60  ;;  %v12948_v47 = vld [vmem:[%s13572_s18 + $0x1fa8] ss:$16 sps:$4 sm:$0xff]   ;;  %v12953_v60 = vld [vmem:[%s13572_s18 + $0x1dcc] ss:$16 sps:$4 sm:$0xff]  }
 0x617   : > { %9583 = vmatprep.subr.bf16.mxu1 %v12884_v50  ;;  %v12956_v50 = vld [vmem:[%s13572_s18 + $0x1fcc] ss:$16 sps:$4 sm:$0xff]  }
 0x619   : > { %9543 = vmatpush1.bf16.msra.mxu0 %v12879_v44  ;;  %v12951_v44 = vld [vmem:[%s13572_s18 + $0x1dc8] ss:$16 sps:$4 sm:$0xff]  }
 0x61a   : > { %9584 = vmatpush1.bf16.msra.mxu1 %v12882_v15  ;;  %9544 = vmatprep.subr.bf16.mxu0 %v12887_v11  ;;  %v12954_v15 = vld [vmem:[%s13572_s18 + $0x1fc8] ss:$16 sps:$4 sm:$0xff]   ;;  %v12959_v11 = vld [vmem:[%s13572_s18 + $0x1dec] ss:$16 sps:$4 sm:$0xff]  }
 0x61b   : > { %9585 = vmatprep.subr.bf16.mxu1 %v12890_v20  ;;  %v12962_v20 = vld [vmem:[%s13572_s18 + $0x1fec] ss:$16 sps:$4 sm:$0xff]  }
 0x61d   : > { %9545 = vmatpush1.bf16.msra.mxu0 %v12885_v32  ;;  %v12957_v32 = vld [vmem:[%s13572_s18 + $0x1de8] ss:$16 sps:$4 sm:$0xff]  }
 0x61e   : > { %9586 = vmatpush1.bf16.msra.mxu1 %v12888_v58  ;;  %9546 = vmatprep.subr.bf16.mxu0 %v12893_v3  ;;  %v12960_v58 = vld [vmem:[%s13572_s18 + $0x1fe8] ss:$16 sps:$4 sm:$0xff]  }
 0x61f   : > { %9587 = vmatprep.subr.bf16.mxu1 %v12896_v57 }
 0x621   : > { %9547 = vmatpush1.bf16.msra.mxu0 %v12891_v22 }
 0x622   : > { %9588 = vmatpush1.bf16.msra.mxu1 %v12894_v12  ;;  %9548 = vmatprep.subr.bf16.mxu0 %v12899_v28 }
 0x623   : > { %9589 = vmatprep.subr.bf16.mxu1 %v12902_v24  ;;  %v9244_v34 = vpop.f32.mrb[52].mxu0 }
 0x624   : > { %v9285_v62 = vpop.f32.mrb[52].mxu1  ;;  %v9245_v36 = vadd.f32 %v9244_v34, %v15126_v26  ;;  %v9246_v9 = vpop.f32.mrb[53].mxu0  ;;  %v12911_v26 = vld [vmem:[%s13572_s18 + $0x1cec] ss:$16 sps:$4 sm:$0xff]  }
 0x625   : > { %v9287_v17 = vpop.f32.mrb[53].mxu1  ;;  %v9247_v33 = vadd.f32 %v9246_v9, %v15130_v40  ;;  %v9248_v53 = vpop.f32.mrb[54].mxu0  ;;  %9549 = vmatpush1.bf16.msra.mxu0 %v12897_v5  ;;  %v12914_v40 = vld [vmem:[%s13572_s18 + $0x1eec] ss:$16 sps:$4 sm:$0xff]  }
 0x626   : > { %v9289_v27 = vpop.f32.mrb[54].mxu1  ;;  %9590 = vmatpush1.bf16.msra.mxu1 %v12900_v39  ;;  %v15200_v13 = vadd.f32 %v9285_v62, %v9245_v36  ;;  %v9249_v6 = vpop.f32.mrb[55].mxu0  ;;  %9550 = vmatprep.subr.bf16.mxu0 %v12905_v0 }
 0x627   : > { %v9290_v35 = vpop.f32.mrb[55].mxu1  ;;  %9591 = vmatprep.subr.bf16.mxu1 %v12908_v51  ;;  %v15204_v43 = vadd.f32 %v9287_v17, %v9247_v33 }
 0x629   : > { %9551 = vmatpush1.bf16.msra.mxu0 %v12903_v30 }
 0x62a   : > { %9592 = vmatpush1.bf16.msra.mxu1 %v12906_v37  ;;  %9552 = vmatprep.subr.bf16.mxu0 %v12911_v26 }
 0x62b   : > { %9593 = vmatprep.subr.bf16.mxu1 %v12914_v40 }
 0x62d   : > { %9553 = vmatpush1.bf16.msra.mxu0 %v12909_v49 }
 0x62e   : > { %9594 = vmatpush1.bf16.msra.mxu1 %v12912_v4  ;;  %9554 = vmatprep.subr.bf16.mxu0 %v12917_v41 }
 0x62f   : > { %9595 = vmatprep.subr.bf16.mxu1 %v12920_v19 }
 0x631   : > { %9555 = vmatpush1.bf16.msra.mxu0 %v12915_v14 }
 0x632   : > { %9596 = vmatpush1.bf16.msra.mxu1 %v12918_v16  ;;  %9556 = vmatprep.subr.bf16.mxu0 %v12923_v59 }
 0x633   : > { %9597 = vmatprep.subr.bf16.mxu1 %v12926_v63 }
 0x635   : > { %9557 = vmatpush1.bf16.msra.mxu0 %v12921_v2  ;;  %v9632_v2 = vsub.s32 2, %v13788_v61 }
 0x636   : > { %9598 = vmatpush1.bf16.msra.mxu1 %v12924_v52  ;;  %9558 = vmatprep.subr.bf16.mxu0 %v12929_v48  ;;  %v9636_v52 = vsub.s32 3, %v13788_v61 }
 0x637   : > { %9599 = vmatprep.subr.bf16.mxu1 %v12932_v54 }
 0x639   : > { %9559 = vmatpush1.bf16.msra.mxu0 %v12927_v7 }
 0x63a   : > { %9600 = vmatpush1.bf16.msra.mxu1 %v12930_v25  ;;  %9560 = vmatprep.subr.bf16.mxu0 %v12935_v29  ;;  %v12963_v25 = vld [vmem:[%s13587_s30] sm:$0xf] }
 0x63b   : > { %9601 = vmatprep.subr.bf16.mxu1 %v12938_v10  ;;  %v9633_v29 = vrot.slane %v12963_v25, %v9632_v2 }
 0x63d   : > { %9561 = vmatpush1.bf16.msra.mxu0 %v12933_v21 }
 0x63e   : > { %9602 = vmatpush1.bf16.msra.mxu1 %v12936_v31  ;;  %9562 = vmatprep.subr.bf16.mxu0 %v12941_v46  ;;  %v9637_v46 = vrot.slane %v12963_v25, %v9636_v52 }
 0x63f   : > { %9603 = vmatprep.subr.bf16.mxu1 %v12944_v42 }
 0x641   : > { %9563 = vmatpush1.bf16.msra.mxu0 %v12939_v55 }
 0x642   : > { %9604 = vmatpush1.bf16.msra.mxu1 %v12942_v18  ;;  %9564 = vmatprep.subr.bf16.mxu0 %v12947_v23 }
 0x643   : > { %9605 = vmatprep.subr.bf16.mxu1 %v12950_v1 }
 0x645   : > { %9565 = vmatpush1.bf16.msra.mxu0 %v12945_v8 }
 0x646   : > { %9606 = vmatpush1.bf16.msra.mxu1 %v12948_v47  ;;  %9566 = vmatprep.subr.bf16.mxu0 %v12953_v60 }
 0x647   : > { %9607 = vmatprep.subr.bf16.mxu1 %v12956_v50  ;;  %v12964_v50 = vld [vmem:[%s13589_s12] sm:$0xf] }
 0x648   : > { %v9672_v61 = vrot.slane %v12964_v50, %v9632_v2 }
 0x649   : > { %9567 = vmatpush1.bf16.msra.mxu0 %v12951_v44 }
 0x64a   : > { %9608 = vmatpush1.bf16.msra.mxu1 %v12954_v15  ;;  %9568 = vmatprep.subr.bf16.mxu0 %v12959_v11  ;;  %v9676_v15 = vrot.slane %v12964_v50, %v9636_v52 }
 0x64b   : > { %9609 = vmatprep.subr.bf16.mxu1 %v12962_v20 }
 0x64d   : > { %9569 = vmatpush1.bf16.msra.mxu0 %v12957_v32 }
 0x64e   : > { %9610 = vmatpush1.bf16.msra.mxu1 %v12960_v58 }
 0x650   : > { %9571 = vmatmul.mubr.bf16.vlgmr.msra.gmra.mrb[68].mxu0 %v14636_v38 }
 0x651   : > { %9612 = vmatmul.mubr.bf16.vlgmr.msra.gmra.mrb[68].mxu1 %v14646_v45 }
 0x663   : > { %v9326_v3 = vpop.f32.mrb[56].mxu0 }
 0x664   : > { %v9367_v57 = vpop.f32.mrb[56].mxu1  ;;  %v9327_v22 = vadd.f32 %v9326_v3, %v15200_v13  ;;  %v9328_v12 = vpop.f32.mrb[57].mxu0 }
 0x665   : > { %v9369_v28 = vpop.f32.mrb[57].mxu1  ;;  %v9329_v24 = vadd.f32 %v9328_v12, %v15204_v43  ;;  %v9330_v5 = vpop.f32.mrb[58].mxu0 }
 0x666   : > { %v9371_v39 = vpop.f32.mrb[58].mxu1  ;;  %v9368_v0 = vadd.f32 %v9367_v57, %v9327_v22  ;;  %v9331_v51 = vpop.f32.mrb[59].mxu0 }
 0x667   : > { %v9372_v34 = vpop.f32.mrb[59].mxu1  ;;  %v9370_v62 = vadd.f32 %v9369_v28, %v9329_v24  ;;  %v9658_v24 = vld [vmem:[%s13583_s16] sm:$0x3] }
 0x6a3   : > { %v9408_v36 = vpop.f32.mrb[60].mxu0 }
 0x6a4   : > { %v9449_v9 = vpop.f32.mrb[60].mxu1  ;;  %v9409_v17 = vadd.f32 %v9408_v36, %v9368_v0  ;;  %v9410_v38 = vpop.f32.mrb[61].mxu0 }
 0x6a5   : > { %v9451_v33 = vpop.f32.mrb[61].mxu1  ;;  %v9411_v45 = vadd.f32 %v9410_v38, %v9370_v62  ;;  %v9412_v53 = vpop.f32.mrb[62].mxu0 }
 0x6a6   : > { %v9453_v27 = vpop.f32.mrb[62].mxu1  ;;  %v9450_v30 = vadd.f32 %v9449_v9, %v9409_v17  ;;  %v9413_v37 = vpop.f32.mrb[63].mxu0 }
 0x6a7   : > { %v9454_v13 = vpop.f32.mrb[63].mxu1  ;;  %v9452_v6 = vadd.f32 %v9451_v33, %v9411_v45 }
 0x6e3   : > { %v9490_v35 = vpop.f32.mrb[64].mxu0 }
 0x6e4   : > { %v9531_v26 = vpop.f32.mrb[64].mxu1  ;;  %v9491_v40 = vadd.f32 %v9490_v35, %v9450_v30  ;;  %v9492_v43 = vpop.f32.mrb[65].mxu0 }
 0x6e5   : > { %v9533_v49 = vpop.f32.mrb[65].mxu1  ;;  %v9493_v4 = vadd.f32 %v9492_v43, %v9452_v6  ;;  %v9494_v41 = vpop.f32.mrb[66].mxu0 }
 0x6e6   : > { %v9535_v19 = vpop.f32.mrb[66].mxu1  ;;  %v9532_v14 = vadd.f32 %v9531_v26, %v9491_v40  ;;  %v9495_v16 = vpop.f32.mrb[67].mxu0 }
 0x6e7   : > { %v9536_v59 = vpop.f32.mrb[67].mxu1  ;;  %v9534_v63 = vadd.f32 %v9533_v49, %v9493_v4 }
 0x723   : > { %v9572_v48 = vpop.f32.mrb[68].mxu0 }
 0x724   : > { %v9613_v54 = vpop.f32.mrb[68].mxu1  ;;  %v9573_v7 = vadd.f32 %v9572_v48, %v9532_v14  ;;  %v9574_v10 = vpop.f32.mrb[69].mxu0 }
 0x725   : > { %v9615_v21 = vpop.f32.mrb[69].mxu1  ;;  %v9575_v31 = vadd.f32 %v9574_v10, %v9534_v63  ;;  %v9576_v42 = vpop.f32.mrb[70].mxu0 }
 0x726   : > { %v9617_v55 = vpop.f32.mrb[70].mxu1  ;;  %v9614_v18 = vadd.f32 %v9613_v54, %v9573_v7  ;;  %v9577_v23 = vpop.f32.mrb[71].mxu0 }
 0x727   : > { %v9618_v1 = vpop.f32.mrb[71].mxu1  ;;  %v9616_v8 = vadd.f32 %v9615_v21, %v9575_v31 }
 0x728   : > { %v9644_v47 = vadd.f32 %v9633_v29, %v9614_v18 }
 0x729   : > { %v9645_v60 = vadd.f32 %v9637_v46, %v9616_v8 }
 0x72a   : > { %vm9648_vm14 = vcmp.gt.f32.partialorder %v9644_v47, 0.0  ;;  %v9652_v44 = vmul.f32 0.01, %v9644_v47 }
 0x72b   : > { %v9653_v11 = vmul.f32 0.01, %v9645_v60  ;;  %vm9649_vm15 = vcmp.gt.f32.partialorder %v9645_v60, 0.0 }
 0x72c   : > { %v9656_v20 = vsel %vm9648_vm14, %v9644_v47, %v9652_v44 }
 0x72d   : > { %v9657_v32 = vsel %vm9649_vm15, %v9645_v60, %v9653_v11  ;;  %v9683_v58 = vmul.f32 %v9672_v61, %v9656_v20 }
 0x72e   : > { %v9684_v3 = vmul.f32 %v9676_v15, %v9657_v32 }
 0x72f   : > { %v9689_v57 = vsel %vm9685_vm13, %v9683_v58, 0.0 }
 0x730   : > { %v9690_v22 = vadd.f32 %v9689_v57, %v14918_v56  ;;  %v9691_v12 = vsel %vm9685_vm13, %v9684_v3, 0.0 }
 0x732   : > { %v9692_v28 = vadd.f32 %v9691_v12, %v9690_v22 }
 0x734   : > { %9693 = vadd.xlane.f32.xlu0 %v9692_v28 }
 0x7c1   : > { %v9694_v5 = vpop.xlane.xlu0 %9693 }
 0x7c2   : > { %v9695_v39 = vadd.f32 %v9694_v5, %v9658_v24 }
 0x7c4   : > { %9697 = vst.msk [vmem:[%s13583_s16] sm:$0x3] %vm9696_vm0, %v9695_v39 }
 0x7c5 PF: > { %s19_s8 = sadd.s32 1, %s13215_s8   ;;  %s15351_s24 = sld [smem:[#allocation15_spill]] }
 0x7c6   : > { %p16_p10 = scmp.ge.s32.totalorder %s19_s8, 10   ;;  %s15352_s27 = sld [smem:[#allocation18_spill]] }
 0x7c7   : > { %s15353_s28 = sld [smem:[#allocation19_spill]]  ;;  %s15354_s29 = sld [smem:[#allocation21_spill]] }
 0x7c8   : > { %s15355_s30 = sld [smem:[#allocation22_spill]]  ;;  %s15356_s25 = smov %s13195_s26 }
 0x7c9   : > { %s15357_s26 = smov %s13441_s10  ;;  %18 = sbr.rel (!%p16_p10) target bundleno = 10 (0xa), region = 132 }
 0x7d0   :  { %9717 = vsyncpa [#allocation5], 1 }
 0x7d1   :  { %9719 = vsyncpa [#allocation5 + $0x1], 1 }
 0x7d2   :  { %9720 = vsyncpa [#allocation7], 1 }

</bundles_post_ra>
